<compile_context>
chip_gen: v7x
topology: tpu7x:2x2x1
jax: 0.10.0
libtpu: 0.0.40
codegen_flags: <defaults>
</compile_context>

<pallas_src>
import numpy as np
import jax
import jax.numpy as jnp
from jax.experimental import pallas as pl
from jax.experimental.pallas import tpu as pltpu

# ----- model config (small, DBRX-like structure) ------------------------------
D_MODEL = 64
N_HEADS = 4
KV_HEADS = 2
HEAD_DIM = D_MODEL // N_HEADS                 # 16
KV_DIM = KV_HEADS * HEAD_DIM                  # 32
QKV_DIM = D_MODEL + 2 * KV_DIM                # 128
NUM_GROUPS = N_HEADS // KV_HEADS              # 2
CLIP_QKV = 8.0
ROPE_THETA = 500000.0
EPS = 1e-5
SM_SCALE = HEAD_DIM ** -0.5


# ----- constant rotate-half matrix (built once with numpy) --------------------
def _build_rot_matrix_np():
    half = HEAD_DIM // 2
    blk = np.zeros((HEAD_DIM, HEAD_DIM), np.float32)
    for j in range(half):
        blk[j + half, j] = -1.0        # out[:, j]        = -x[:, j + half]
        blk[j, j + half] = 1.0         # out[:, j + half] = +x[:, j]
    r = np.zeros((QKV_DIM, QKV_DIM), np.float32)
    for b in range(N_HEADS + KV_HEADS):    # q heads + k heads; v block stays 0
        r[b * HEAD_DIM:(b + 1) * HEAD_DIM, b * HEAD_DIM:(b + 1) * HEAD_DIM] = blk
    return r


_ROT_NP = _build_rot_matrix_np()


# ----- kernel 1: norm_1 + Wqkv + clip + rotary (+ q pre-scale) -----------------
def _norm_qkv_rope_kernel(x_ref, res_ref, n1w_ref, wqkv_ref, rot_ref,
                          cos_ref, sin_ref, qkv_ref, resout_ref):
    # FastLayerNorm.load_no_bias: h = x + residual; res_out = h; LN in f32.
    h = x_ref[...].astype(jnp.float32) + res_ref[...].astype(jnp.float32)
    resout_ref[...] = h.astype(resout_ref.dtype)
    mean = jnp.mean(h, axis=-1, keepdims=True)
    c = h - mean
    var = jnp.mean(c * c, axis=-1, keepdims=True)
    normed = c * jax.lax.rsqrt(var + EPS) * n1w_ref[...].astype(jnp.float32)

    # qkv = normed @ Wqkv^T  (contract on the [out, in] weight's last axis,
    # no wrapper-side transpose), then clip_qkv clamp.
    qkv = jax.lax.dot_general(normed, wqkv_ref[...],
                              (((1,), (1,)), ((), ())),
                              preferred_element_type=jnp.float32)
    qkv = jnp.clip(qkv, -CLIP_QKV, CLIP_QKV)

    # NeoX rotary on q & k lanes (+ softmax_scale folded into the q lanes of
    # cos/sin), identity on the v lanes -- one lane-dense fused multiply-add:
    #   out = qkv * cos_all + (qkv @ R) * sin_all
    rot = jnp.dot(qkv, rot_ref[...], preferred_element_type=jnp.float32)
    qkv_ref[...] = (qkv * cos_ref[...] + rot * sin_ref[...]).astype(qkv_ref.dtype)


# ----- kernel 2: causal GQA attention + out_proj + norm_2 ----------------------
def _attn_oproj_norm_kernel(qt_ref, kv_ref, res_ref, wo_ref, n2w_ref,
                            normed_ref, resout_ref):
    # TODO(synk): for long prefill, tile the KV axis with online-softmax scratch
    # (m/l/acc) instead of holding the full [T, 128] K/V block per grid step.
    i = pl.program_id(0)
    tq = qt_ref.shape[0]
    t = kv_ref.shape[0]

    q = qt_ref[...][:, :D_MODEL]          # (tq, 64)  pre-scaled + rotated
    kv = kv_ref[...]                      # (t, 128)  [q | k_rot | v]
    wo = wo_ref[...]                      # (64, 64)  PyTorch [out, in]

    # causal mask bias, shared across heads (diagonal always unmasked)
    q_pos = i * tq + jax.lax.broadcasted_iota(jnp.int32, (tq, t), 0)
    k_pos = jax.lax.broadcasted_iota(jnp.int32, (tq, t), 1)
    bias = jnp.where(k_pos <= q_pos, 0.0, -1e30).astype(jnp.float32)

    acc = jnp.zeros((tq, D_MODEL), jnp.float32)
    for h in range(N_HEADS):              # static unroll over heads
        hk = h // NUM_GROUPS              # in-kernel GQA head mapping (no repeat)
        q_h = q[:, h * HEAD_DIM:(h + 1) * HEAD_DIM]
        k_h = kv[:, D_MODEL + hk * HEAD_DIM:D_MODEL + (hk + 1) * HEAD_DIM]
        v_h = kv[:, D_MODEL + KV_DIM + hk * HEAD_DIM:
                    D_MODEL + KV_DIM + (hk + 1) * HEAD_DIM]

        s = jax.lax.dot_general(q_h, k_h, (((1,), (1,)), ((), ())),
                                preferred_element_type=jnp.float32) + bias
        m = jnp.max(s, axis=-1, keepdims=True)
        p = jnp.exp(s - m)
        l = jnp.sum(p, axis=-1, keepdims=True)
        o_h = jnp.dot(p, v_h, preferred_element_type=jnp.float32)     # (tq, 16)
        o_h = o_h * pl.reciprocal(l, approx=True)                     # EUP divide

        # fold out_proj:  attn @ Wo^T == sum_h  o_h @ Wo[:, h*Dh:(h+1)*Dh]^T
        wo_h = wo[:, h * HEAD_DIM:(h + 1) * HEAD_DIM]                 # (64, 16)
        acc = acc + jax.lax.dot_general(o_h, wo_h, (((1,), (1,)), ((), ())),
                                        preferred_element_type=jnp.float32)

    # norm_2: residual add + LayerNorm (f32 math)
    h2 = acc + res_ref[...].astype(jnp.float32)
    resout_ref[...] = h2.astype(resout_ref.dtype)
    mean = jnp.mean(h2, axis=-1, keepdims=True)
    c = h2 - mean
    var = jnp.mean(c * c, axis=-1, keepdims=True)
    normed_ref[...] = (c * jax.lax.rsqrt(var + EPS)
                       * n2w_ref[...].astype(jnp.float32)).astype(normed_ref.dtype)


# ----- wrapper -----------------------------------------------------------------
def _rope_tables(cos, sin):
    """Full-width, per-lane cos/sin tables for the [T, 128] qkv layout.

    q lanes get softmax_scale folded in; v lanes are identity (cos=1, sin=0)."""
    t = cos.shape[0]
    cos_h = jnp.concatenate([cos, cos], axis=-1)   # [T, HEAD_DIM]
    sin_h = jnp.concatenate([sin, sin], axis=-1)
    cos_all = jnp.concatenate(
        [jnp.tile(cos_h, (1, N_HEADS)) * SM_SCALE,
         jnp.tile(cos_h, (1, KV_HEADS)),
         jnp.ones((t, KV_DIM), cos.dtype)], axis=-1)
    sin_all = jnp.concatenate(
        [jnp.tile(sin_h, (1, N_HEADS)) * SM_SCALE,
         jnp.tile(sin_h, (1, KV_HEADS)),
         jnp.zeros((t, KV_DIM), sin.dtype)], axis=-1)
    return cos_all, sin_all


def dbrx_norm_attention_norm(hidden_states, residual, cos, sin, kv_cache, slots,
                             params, *, token_tile=64, query_tile=64):
    t, d = hidden_states.shape
    assert d == D_MODEL and t % token_tile == 0 and t % query_tile == 0
    if residual is None:
        residual = jnp.zeros_like(hidden_states)

    cos_all, sin_all = _rope_tables(cos, sin)
    rot = jnp.asarray(_ROT_NP)
    n1w = params["norm_1_w"].reshape(1, D_MODEL)
    n2w = params["norm_2_w"].reshape(1, D_MODEL)
    par = pltpu.CompilerParams(dimension_semantics=("parallel",))

    # ---- kernel 1: norm_1 + Wqkv + clip_qkv + rotary --------------------------
    qkv_rot, res = pl.pallas_call(
        _norm_qkv_rope_kernel,
        out_shape=(jax.ShapeDtypeStruct((t, QKV_DIM), jnp.float32),
                   jax.ShapeDtypeStruct((t, D_MODEL), hidden_states.dtype)),
        grid=(t // token_tile,),
        in_specs=[
            pl.BlockSpec((token_tile, D_MODEL), lambda i: (i, 0)),   # hidden
            pl.BlockSpec((token_tile, D_MODEL), lambda i: (i, 0)),   # residual
            pl.BlockSpec((1, D_MODEL), lambda i: (0, 0)),            # norm_1 w
            pl.BlockSpec((QKV_DIM, D_MODEL), lambda i: (0, 0)),      # Wqkv [out,in]
            pl.BlockSpec((QKV_DIM, QKV_DIM), lambda i: (0, 0)),      # rotate-half R
            pl.BlockSpec((token_tile, QKV_DIM), lambda i: (i, 0)),   # cos_all
            pl.BlockSpec((token_tile, QKV_DIM), lambda i: (i, 0)),   # sin_all
        ],
        out_specs=(pl.BlockSpec((token_tile, QKV_DIM), lambda i: (i, 0)),
                   pl.BlockSpec((token_tile, D_MODEL), lambda i: (i, 0))),
        compiler_params=par,
    )(hidden_states, residual, n1w, params["wqkv"], rot, cos_all, sin_all)

    # ---- paged_attention.reshape_and_cache equivalent (glue) ------------------
    # Caches are donated at the jit boundary so XLA performs the scatter in place.
    # TODO(synk): replace with a dedicated Pallas scatter kernel (scalar-prefetched
    # slots + input_output_aliases) for realistic paged caches.
    k_cache, v_cache = kv_cache
    k_new = qkv_rot[:, D_MODEL:D_MODEL + KV_DIM].reshape(t, KV_HEADS, HEAD_DIM)
    v_new = qkv_rot[:, D_MODEL + KV_DIM:].reshape(t, KV_HEADS, HEAD_DIM)
    k_cache = k_cache.at[slots].set(k_new.astype(k_cache.dtype))
    v_cache = v_cache.at[slots].set(v_new.astype(v_cache.dtype))

    # ---- kernel 2: prefill causal attention + out_proj + norm_2 ---------------
    # TODO(synk): decode path (paged_attention.attention over block_tables) not implemented.
    normed_out, attn_res = pl.pallas_call(
        _attn_oproj_norm_kernel,
        out_shape=(jax.ShapeDtypeStruct((t, D_MODEL), hidden_states.dtype),
                   jax.ShapeDtypeStruct((t, D_MODEL), hidden_states.dtype)),
        grid=(t // query_tile,),
        in_specs=[
            pl.BlockSpec((query_tile, QKV_DIM), lambda i: (i, 0)),   # q tile
            pl.BlockSpec((t, QKV_DIM), lambda i: (0, 0)),            # full K/V
            pl.BlockSpec((query_tile, D_MODEL), lambda i: (i, 0)),   # residual (res)
            pl.BlockSpec((D_MODEL, D_MODEL), lambda i: (0, 0)),      # Wo [out,in]
            pl.BlockSpec((1, D_MODEL), lambda i: (0, 0)),            # norm_2 w
        ],
        out_specs=(pl.BlockSpec((query_tile, D_MODEL), lambda i: (i, 0)),
                   pl.BlockSpec((query_tile, D_MODEL), lambda i: (i, 0))),
        compiler_params=par,
    )(qkv_rot, qkv_rot, res, params["wo"], n2w)

    return (normed_out, attn_res), (k_cache, v_cache)


# ----- pure-JAX reference (for correctness check) ------------------------------
def _reference(hidden, residual, cos, sin, params):
    def ln(x, w):
        mu = x.mean(-1, keepdims=True)
        var = ((x - mu) ** 2).mean(-1, keepdims=True)
        return (x - mu) / jnp.sqrt(var + EPS) * w

    t = hidden.shape[0]
    h = hidden + residual
    n1 = ln(h, params["norm_1_w"])
    qkv = jnp.clip(n1 @ params["wqkv"].T, -CLIP_QKV, CLIP_QKV)
    q = qkv[:, :D_MODEL].reshape(t, N_HEADS, HEAD_DIM)
    k = qkv[:, D_MODEL:D_MODEL + KV_DIM].reshape(t, KV_HEADS, HEAD_DIM)
    v = qkv[:, D_MODEL + KV_DIM:].reshape(t, KV_HEADS, HEAD_DIM)

    def rope(x):
        d2 = HEAD_DIM // 2
        x1, x2 = x[..., :d2], x[..., d2:]
        c, s = cos[:, None, :], sin[:, None, :]
        return jnp.concatenate([x1 * c - x2 * s, x2 * c + x1 * s], axis=-1)

    q, k = rope(q), rope(k)
    kh = jnp.repeat(k, NUM_GROUPS, axis=1)
    vh = jnp.repeat(v, NUM_GROUPS, axis=1)
    s = jnp.einsum("qhd,khd->hqk", q, kh) * SM_SCALE
    causal = jnp.tril(jnp.ones((t, t), bool))
    s = jnp.where(causal[None], s, -jnp.inf)
    p = jax.nn.softmax(s, axis=-1)
    o = jnp.einsum("hqk,khd->qhd", p, vh).reshape(t, D_MODEL)
    attn_out = o @ params["wo"].T
    h2 = attn_out + h
    return ln(h2, params["norm_2_w"]), h2, k, v


# ----- demo ---------------------------------------------------------------------
if __name__ == "__main__":
    key = jax.random.PRNGKey(0)
    ks = jax.random.split(key, 6)

    T = 128  # total flattened tokens (single prefill sequence)
    hidden = jax.random.normal(ks[0], (T, D_MODEL), jnp.float32)
    residual = jax.random.normal(ks[1], (T, D_MODEL), jnp.float32)

    params = {
        "norm_1_w": 1.0 + 0.1 * jax.random.normal(ks[2], (D_MODEL,), jnp.float32),
        "wqkv": 0.05 * jax.random.normal(ks[3], (QKV_DIM, D_MODEL), jnp.float32),
        "wo": 0.05 * jax.random.normal(ks[4], (D_MODEL, D_MODEL), jnp.float32),
        "norm_2_w": 1.0 + 0.1 * jax.random.normal(ks[5], (D_MODEL,), jnp.float32),
    }

    # rotary cos/sin (rope_theta = 500000, dim = head_dim)
    positions = jnp.arange(T, dtype=jnp.float32)
    inv_freq = 1.0 / (ROPE_THETA ** (jnp.arange(0, HEAD_DIM, 2, dtype=jnp.float32) / HEAD_DIM))
    freqs = positions[:, None] * inv_freq[None, :]
    cos = jnp.cos(freqs)            # [T, HEAD_DIM // 2]
    sin = jnp.sin(freqs)

    # simple flat kv cache: [num_slots, kv_heads, head_dim]
    num_slots = 2 * T
    k_cache = jnp.zeros((num_slots, KV_HEADS, HEAD_DIM), jnp.float32)
    v_cache = jnp.zeros((num_slots, KV_HEADS, HEAD_DIM), jnp.float32)
    slots = jnp.arange(T, dtype=jnp.int32)

    fwd = jax.jit(dbrx_norm_attention_norm, donate_argnums=(4,))
    (normed_out, attn_res), (k_cache_out, v_cache_out) = fwd(
        hidden, residual, cos, sin, (k_cache, v_cache), slots, params)
    jax.block_until_ready((normed_out, attn_res, k_cache_out, v_cache_out))

    assert normed_out.shape == (T, D_MODEL) and attn_res.shape == (T, D_MODEL)

    ref_normed, ref_res, ref_k, ref_v = _reference(hidden, residual, cos, sin, params)

    def _maxdiff(a, b):
        return float(jnp.max(jnp.abs(a - b)))

    assert _maxdiff(normed_out, ref_normed) < 3e-2, _maxdiff(normed_out, ref_normed)
    assert _maxdiff(attn_res, ref_res) < 3e-2, _maxdiff(attn_res, ref_res)
    assert _maxdiff(k_cache_out[:T], ref_k) < 3e-2, _maxdiff(k_cache_out[:T], ref_k)
    assert _maxdiff(v_cache_out[:T], ref_v) < 3e-2, _maxdiff(v_cache_out[:T], ref_v)

    print("KERNEL_OK")
</pallas_src>

<mosaic_0001>
module attributes {stable_mosaic.version = 11 : i64} {
  func.func @_norm_qkv_rope_kernel(%arg0: i32, %arg1: memref<64x64xf32, #tpu.memory_space<vmem>>, %arg2: memref<64x64xf32, #tpu.memory_space<vmem>>, %arg3: memref<1x64xf32, #tpu.memory_space<vmem>>, %arg4: memref<128x64xf32, #tpu.memory_space<vmem>>, %arg5: memref<128x128xf32, #tpu.memory_space<vmem>>, %arg6: memref<64x128xf32, #tpu.memory_space<vmem>>, %arg7: memref<64x128xf32, #tpu.memory_space<vmem>>, %arg8: memref<64x128xf32, #tpu.memory_space<vmem>>, %arg9: memref<64x64xf32, #tpu.memory_space<vmem>>) attributes {dimension_semantics = [#tpu.dimension_semantics<parallel>], iteration_bounds = array<i64: 2>, scalar_prefetch = 0 : i64, scratch_operands = 0 : i64, tpu.core_type = #tpu.core_type<tc>, window_params = [{transform_indices = @transform_0, window_bounds = array<i64: 64, 64>}, {transform_indices = @transform_1, window_bounds = array<i64: 64, 64>}, {pipeline_mode = #tpu.pipeline_mode<synchronous>, transform_indices = @transform_2, window_bounds = array<i64: 1, 64>}, {pipeline_mode = #tpu.pipeline_mode<synchronous>, transform_indices = @transform_3, window_bounds = array<i64: 128, 64>}, {pipeline_mode = #tpu.pipeline_mode<synchronous>, transform_indices = @transform_4, window_bounds = array<i64: 128, 128>}, {transform_indices = @transform_5, window_bounds = array<i64: 64, 128>}, {transform_indices = @transform_6, window_bounds = array<i64: 64, 128>}, {transform_indices = @transform_7, window_bounds = array<i64: 64, 128>}, {transform_indices = @transform_8, window_bounds = array<i64: 64, 64>}]} {
    %c0 = arith.constant 0 : index
    %c0_0 = arith.constant 0 : index
    %0 = vector.load %arg1[%c0, %c0_0] : memref<64x64xf32, #tpu.memory_space<vmem>>, vector<64x64xf32>
    %c0_1 = arith.constant 0 : index
    %c0_2 = arith.constant 0 : index
    %1 = vector.load %arg2[%c0_1, %c0_2] : memref<64x64xf32, #tpu.memory_space<vmem>>, vector<64x64xf32>
    %2 = arith.addf %0, %1 : vector<64x64xf32>
    %c0_3 = arith.constant 0 : index
    %c0_4 = arith.constant 0 : index
    %3 = vector.load %arg9[%c0_3, %c0_4] : memref<64x64xf32, #tpu.memory_space<vmem>>, vector<64x64xf32>
    tpu.vector_store %arg9[%c0_3, %c0_4], %2 {strides = array<i32>} : memref<64x64xf32, #tpu.memory_space<vmem>>, vector<64x64xf32>,
    %cst = arith.constant dense<0.000000e+00> : vector<64xf32>
    %4 = vector.multi_reduction <add>, %2, %cst [1] : vector<64x64xf32> to vector<64xf32>
    %5 = vector.shape_cast %4 : vector<64xf32> to vector<64x1xf32>
    %cst_5 = arith.constant 6.400000e+01 : f32
    %6 = vector.broadcast %cst_5 : f32 to vector<64x1xf32>
    %7 = arith.divf %5, %6 : vector<64x1xf32>
    %8 = vector.broadcast %7 : vector<64x1xf32> to vector<64x64xf32>
    %9 = arith.subf %2, %8 : vector<64x64xf32>
    %10 = arith.mulf %9, %9 : vector<64x64xf32>
    %cst_6 = arith.constant dense<0.000000e+00> : vector<64xf32>
    %11 = vector.multi_reduction <add>, %10, %cst_6 [1] : vector<64x64xf32> to vector<64xf32>
    %12 = vector.shape_cast %11 : vector<64xf32> to vector<64x1xf32>
    %cst_7 = arith.constant 6.400000e+01 : f32
    %13 = vector.broadcast %cst_7 : f32 to vector<64x1xf32>
    %14 = arith.divf %12, %13 : vector<64x1xf32>
    %cst_8 = arith.constant 9.99999974E-6 : f32
    %15 = vector.broadcast %cst_8 : f32 to vector<64x1xf32>
    %16 = arith.addf %14, %15 : vector<64x1xf32>
    %17 = math.rsqrt %16 : vector<64x1xf32>
    %18 = vector.broadcast %17 : vector<64x1xf32> to vector<64x64xf32>
    %19 = arith.mulf %9, %18 : vector<64x64xf32>
    %c0_9 = arith.constant 0 : index
    %c0_10 = arith.constant 0 : index
    %20 = vector.load %arg3[%c0_9, %c0_10] : memref<1x64xf32, #tpu.memory_space<vmem>>, vector<1x64xf32>
    %21 = vector.broadcast %20 : vector<1x64xf32> to vector<64x64xf32>
    %22 = arith.mulf %19, %21 : vector<64x64xf32>
    %c0_11 = arith.constant 0 : index
    %c0_12 = arith.constant 0 : index
    %23 = vector.load %arg4[%c0_11, %c0_12] : memref<128x64xf32, #tpu.memory_space<vmem>>, vector<128x64xf32>
    %cst_13 = arith.constant dense<0.000000e+00> : vector<64x128xf32>
    %24 = tpu.matmul %22, %23, %cst_13 {dimension_numbers = #tpu.dot_dimension_numbers<[1], [1], [0], [0], [0, 0, 1, 0], [], []>} : vector<64x64xf32>, vector<128x64xf32>, vector<64x128xf32> -> vector<64x128xf32>
    %cst_14 = arith.constant -8.000000e+00 : f32
    %cst_15 = arith.constant 8.000000e+00 : f32
    %25 = vector.broadcast %cst_14 : f32 to vector<64x128xf32>
    %26 = arith.maximumf %25, %24 : vector<64x128xf32>
    %27 = vector.broadcast %cst_15 : f32 to vector<64x128xf32>
    %28 = arith.minimumf %27, %26 : vector<64x128xf32>
    %c0_16 = arith.constant 0 : index
    %c0_17 = arith.constant 0 : index
    %29 = vector.load %arg5[%c0_16, %c0_17] : memref<128x128xf32, #tpu.memory_space<vmem>>, vector<128x128xf32>
    %cst_18 = arith.constant dense<0.000000e+00> : vector<64x128xf32>
    %30 = tpu.matmul %28, %29, %cst_18 {dimension_numbers = #tpu.dot_dimension_numbers<[1], [0], [0], [1], [0, 0, 1, 1], [], []>} : vector<64x128xf32>, vector<128x128xf32>, vector<64x128xf32> -> vector<64x128xf32>
    %c0_19 = arith.constant 0 : index
    %c0_20 = arith.constant 0 : index
    %31 = vector.load %arg6[%c0_19, %c0_20] : memref<64x128xf32, #tpu.memory_space<vmem>>, vector<64x128xf32>
    %32 = arith.mulf %28, %31 : vector<64x128xf32>
    %c0_21 = arith.constant 0 : index
    %c0_22 = arith.constant 0 : index
    %33 = vector.load %arg7[%c0_21, %c0_22] : memref<64x128xf32, #tpu.memory_space<vmem>>, vector<64x128xf32>
    %34 = arith.mulf %30, %33 : vector<64x128xf32>
    %35 = arith.addf %32, %34 : vector<64x128xf32>
    %c0_23 = arith.constant 0 : index
    %c0_24 = arith.constant 0 : index
    %36 = vector.load %arg8[%c0_23, %c0_24] : memref<64x128xf32, #tpu.memory_space<vmem>>, vector<64x128xf32>
    tpu.vector_store %arg8[%c0_23, %c0_24], %35 {strides = array<i32>} : memref<64x128xf32, #tpu.memory_space<vmem>>, vector<64x128xf32>,
    return
  }
  func.func @transform_0(%arg0: i32) -> (i32, i32) {
    %c0_i32 = arith.constant 0 : i32
    %c0_i32_0 = arith.constant 0 : i32
    return %arg0, %c0_i32 : i32, i32
  }
  func.func @transform_1(%arg0: i32) -> (i32, i32) {
    %c0_i32 = arith.constant 0 : i32
    %c0_i32_0 = arith.constant 0 : i32
    return %arg0, %c0_i32 : i32, i32
  }
  func.func @transform_2(%arg0: i32) -> (i32, i32) {
    %c0_i32 = arith.constant 0 : i32
    %c0_i32_0 = arith.constant 0 : i32
    %c0_i32_1 = arith.constant 0 : i32
    return %c0_i32, %c0_i32_0 : i32, i32
  }
  func.func @transform_3(%arg0: i32) -> (i32, i32) {
    %c0_i32 = arith.constant 0 : i32
    %c0_i32_0 = arith.constant 0 : i32
    %c0_i32_1 = arith.constant 0 : i32
    return %c0_i32, %c0_i32_0 : i32, i32
  }
  func.func @transform_4(%arg0: i32) -> (i32, i32) {
    %c0_i32 = arith.constant 0 : i32
    %c0_i32_0 = arith.constant 0 : i32
    %c0_i32_1 = arith.constant 0 : i32
    return %c0_i32, %c0_i32_0 : i32, i32
  }
  func.func @transform_5(%arg0: i32) -> (i32, i32) {
    %c0_i32 = arith.constant 0 : i32
    %c0_i32_0 = arith.constant 0 : i32
    return %arg0, %c0_i32 : i32, i32
  }
  func.func @transform_6(%arg0: i32) -> (i32, i32) {
    %c0_i32 = arith.constant 0 : i32
    %c0_i32_0 = arith.constant 0 : i32
    return %arg0, %c0_i32 : i32, i32
  }
  func.func @transform_7(%arg0: i32) -> (i32, i32) {
    %c0_i32 = arith.constant 0 : i32
    %c0_i32_0 = arith.constant 0 : i32
    return %arg0, %c0_i32 : i32, i32
  }
  func.func @transform_8(%arg0: i32) -> (i32, i32) {
    %c0_i32 = arith.constant 0 : i32
    %c0_i32_0 = arith.constant 0 : i32
    return %arg0, %c0_i32 : i32, i32
  }
}

module attributes {stable_mosaic.version = 11 : i64} {
  func.func @_attn_oproj_norm_kernel(%arg0: i32, %arg1: memref<64x128xf32, #tpu.memory_space<vmem>>, %arg2: memref<128x128xf32, #tpu.memory_space<vmem>>, %arg3: memref<64x64xf32, #tpu.memory_space<vmem>>, %arg4: memref<64x64xf32, #tpu.memory_space<vmem>>, %arg5: memref<1x64xf32, #tpu.memory_space<vmem>>, %arg6: memref<64x64xf32, #tpu.memory_space<vmem>>, %arg7: memref<64x64xf32, #tpu.memory_space<vmem>>) attributes {dimension_semantics = [#tpu.dimension_semantics<parallel>], iteration_bounds = array<i64: 2>, scalar_prefetch = 0 : i64, scratch_operands = 0 : i64, tpu.core_type = #tpu.core_type<tc>, window_params = [{transform_indices = @transform_0, window_bounds = array<i64: 64, 128>}, {pipeline_mode = #tpu.pipeline_mode<synchronous>, transform_indices = @transform_1, window_bounds = array<i64: 128, 128>}, {transform_indices = @transform_2, window_bounds = array<i64: 64, 64>}, {pipeline_mode = #tpu.pipeline_mode<synchronous>, transform_indices = @transform_3, window_bounds = array<i64: 64, 64>}, {pipeline_mode = #tpu.pipeline_mode<synchronous>, transform_indices = @transform_4, window_bounds = array<i64: 1, 64>}, {transform_indices = @transform_5, window_bounds = array<i64: 64, 64>}, {transform_indices = @transform_6, window_bounds = array<i64: 64, 64>}]} {
    %c0 = arith.constant 0 : index
    %c0_0 = arith.constant 0 : index
    %0 = vector.load %arg1[%c0, %c0_0] : memref<64x128xf32, #tpu.memory_space<vmem>>, vector<64x128xf32>
    %1 = vector.extract_strided_slice %0 {offsets = [0, 0], sizes = [64, 64], strides = [1, 1]} : vector<64x128xf32> to vector<64x64xf32>
    %c0_1 = arith.constant 0 : index
    %c0_2 = arith.constant 0 : index
    %2 = vector.load %arg2[%c0_1, %c0_2] : memref<128x128xf32, #tpu.memory_space<vmem>>, vector<128x128xf32>
    %c0_3 = arith.constant 0 : index
    %c0_4 = arith.constant 0 : index
    %3 = vector.load %arg4[%c0_3, %c0_4] : memref<64x64xf32, #tpu.memory_space<vmem>>, vector<64x64xf32>
    %c64_i32 = arith.constant 64 : i32
    %4 = arith.muli %arg0, %c64_i32 : i32
    %5 = tpu.iota {dimensions = array<i32: 0>} : vector<64x128xi32>
    %6 = vector.broadcast %4 : i32 to vector<64x128xi32>
    %7 = arith.addi %6, %5 : vector<64x128xi32>
    %8 = tpu.iota {dimensions = array<i32: 1>} : vector<64x128xi32>
    %9 = arith.cmpi sle, %8, %7 : vector<64x128xi32>
    %cst = arith.constant 0.000000e+00 : f32
    %cst_5 = arith.constant -1.000000e+30 : f32
    %10 = vector.broadcast %cst : f32 to vector<64x128xf32>
    %11 = vector.broadcast %cst_5 : f32 to vector<64x128xf32>
    %12 = arith.select %9, %10, %11 : vector<64x128xi1>, vector<64x128xf32>
    %cst_6 = arith.constant 0.000000e+00 : f32
    %13 = vector.broadcast %cst_6 : f32 to vector<64x64xf32>
    %14 = vector.extract_strided_slice %1 {offsets = [0, 0], sizes = [64, 16], strides = [1, 1]} : vector<64x64xf32> to vector<64x16xf32>
    %15 = vector.extract_strided_slice %2 {offsets = [0, 64], sizes = [128, 16], strides = [1, 1]} : vector<128x128xf32> to vector<128x16xf32>
    %16 = vector.extract_strided_slice %2 {offsets = [0, 96], sizes = [128, 16], strides = [1, 1]} : vector<128x128xf32> to vector<128x16xf32>
    %cst_7 = arith.constant dense<0.000000e+00> : vector<64x128xf32>
    %17 = tpu.matmul %14, %15, %cst_7 {dimension_numbers = #tpu.dot_dimension_numbers<[1], [1], [0], [0], [0, 0, 1, 0], [], []>} : vector<64x16xf32>, vector<128x16xf32>, vector<64x128xf32> -> vector<64x128xf32>
    %18 = arith.addf %17, %12 : vector<64x128xf32>
    %cst_8 = arith.constant dense<0xFF800000> : vector<64xf32>
    %19 = vector.multi_reduction <maximumf>, %18, %cst_8 [1] : vector<64x128xf32> to vector<64xf32>
    %20 = vector.shape_cast %19 : vector<64xf32> to vector<64x1xf32>
    %21 = vector.broadcast %20 : vector<64x1xf32> to vector<64x128xf32>
    %22 = arith.subf %18, %21 : vector<64x128xf32>
    %23 = math.exp %22 : vector<64x128xf32>
    %cst_9 = arith.constant dense<0.000000e+00> : vector<64xf32>
    %24 = vector.multi_reduction <add>, %23, %cst_9 [1] : vector<64x128xf32> to vector<64xf32>
    %25 = vector.shape_cast %24 : vector<64xf32> to vector<64x1xf32>
    %cst_10 = arith.constant dense<0.000000e+00> : vector<64x16xf32>
    %26 = tpu.matmul %23, %16, %cst_10 {dimension_numbers = #tpu.dot_dimension_numbers<[1], [0], [0], [1], [0, 0, 1, 1], [], []>} : vector<64x128xf32>, vector<128x16xf32>, vector<64x16xf32> -> vector<64x16xf32>
    %27 = tpu.reciprocal %25 {approx = true} : vector<64x1xf32> -> vector<64x1xf32>
    %28 = vector.broadcast %27 : vector<64x1xf32> to vector<64x16xf32>
    %29 = arith.mulf %26, %28 : vector<64x16xf32>
    %30 = vector.extract_strided_slice %3 {offsets = [0, 0], sizes = [64, 16], strides = [1, 1]} : vector<64x64xf32> to vector<64x16xf32>
    %cst_11 = arith.constant dense<0.000000e+00> : vector<64x64xf32>
    %31 = tpu.matmul %29, %30, %cst_11 {dimension_numbers = #tpu.dot_dimension_numbers<[1], [1], [0], [0], [0, 0, 1, 0], [], []>} : vector<64x16xf32>, vector<64x16xf32>, vector<64x64xf32> -> vector<64x64xf32>
    %32 = arith.addf %13, %31 : vector<64x64xf32>
    %33 = vector.extract_strided_slice %1 {offsets = [0, 16], sizes = [64, 16], strides = [1, 1]} : vector<64x64xf32> to vector<64x16xf32>
    %34 = vector.extract_strided_slice %2 {offsets = [0, 64], sizes = [128, 16], strides = [1, 1]} : vector<128x128xf32> to vector<128x16xf32>
    %35 = vector.extract_strided_slice %2 {offsets = [0, 96], sizes = [128, 16], strides = [1, 1]} : vector<128x128xf32> to vector<128x16xf32>
    %cst_12 = arith.constant dense<0.000000e+00> : vector<64x128xf32>
    %36 = tpu.matmul %33, %34, %cst_12 {dimension_numbers = #tpu.dot_dimension_numbers<[1], [1], [0], [0], [0, 0, 1, 0], [], []>} : vector<64x16xf32>, vector<128x16xf32>, vector<64x128xf32> -> vector<64x128xf32>
    %37 = arith.addf %36, %12 : vector<64x128xf32>
    %cst_13 = arith.constant dense<0xFF800000> : vector<64xf32>
    %38 = vector.multi_reduction <maximumf>, %37, %cst_13 [1] : vector<64x128xf32> to vector<64xf32>
    %39 = vector.shape_cast %38 : vector<64xf32> to vector<64x1xf32>
    %40 = vector.broadcast %39 : vector<64x1xf32> to vector<64x128xf32>
    %41 = arith.subf %37, %40 : vector<64x128xf32>
    %42 = math.exp %41 : vector<64x128xf32>
    %cst_14 = arith.constant dense<0.000000e+00> : vector<64xf32>
    %43 = vector.multi_reduction <add>, %42, %cst_14 [1] : vector<64x128xf32> to vector<64xf32>
    %44 = vector.shape_cast %43 : vector<64xf32> to vector<64x1xf32>
    %cst_15 = arith.constant dense<0.000000e+00> : vector<64x16xf32>
    %45 = tpu.matmul %42, %35, %cst_15 {dimension_numbers = #tpu.dot_dimension_numbers<[1], [0], [0], [1], [0, 0, 1, 1], [], []>} : vector<64x128xf32>, vector<128x16xf32>, vector<64x16xf32> -> vector<64x16xf32>
    %46 = tpu.reciprocal %44 {approx = true} : vector<64x1xf32> -> vector<64x1xf32>
    %47 = vector.broadcast %46 : vector<64x1xf32> to vector<64x16xf32>
    %48 = arith.mulf %45, %47 : vector<64x16xf32>
    %49 = vector.extract_strided_slice %3 {offsets = [0, 16], sizes = [64, 16], strides = [1, 1]} : vector<64x64xf32> to vector<64x16xf32>
    %cst_16 = arith.constant dense<0.000000e+00> : vector<64x64xf32>
    %50 = tpu.matmul %48, %49, %cst_16 {dimension_numbers = #tpu.dot_dimension_numbers<[1], [1], [0], [0], [0, 0, 1, 0], [], []>} : vector<64x16xf32>, vector<64x16xf32>, vector<64x64xf32> -> vector<64x64xf32>
    %51 = arith.addf %32, %50 : vector<64x64xf32>
    %52 = vector.extract_strided_slice %1 {offsets = [0, 32], sizes = [64, 16], strides = [1, 1]} : vector<64x64xf32> to vector<64x16xf32>
    %53 = vector.extract_strided_slice %2 {offsets = [0, 80], sizes = [128, 16], strides = [1, 1]} : vector<128x128xf32> to vector<128x16xf32>
    %54 = vector.extract_strided_slice %2 {offsets = [0, 112], sizes = [128, 16], strides = [1, 1]} : vector<128x128xf32> to vector<128x16xf32>
    %cst_17 = arith.constant dense<0.000000e+00> : vector<64x128xf32>
    %55 = tpu.matmul %52, %53, %cst_17 {dimension_numbers = #tpu.dot_dimension_numbers<[1], [1], [0], [0], [0, 0, 1, 0], [], []>} : vector<64x16xf32>, vector<128x16xf32>, vector<64x128xf32> -> vector<64x128xf32>
    %56 = arith.addf %55, %12 : vector<64x128xf32>
    %cst_18 = arith.constant dense<0xFF800000> : vector<64xf32>
    %57 = vector.multi_reduction <maximumf>, %56, %cst_18 [1] : vector<64x128xf32> to vector<64xf32>
    %58 = vector.shape_cast %57 : vector<64xf32> to vector<64x1xf32>
    %59 = vector.broadcast %58 : vector<64x1xf32> to vector<64x128xf32>
    %60 = arith.subf %56, %59 : vector<64x128xf32>
    %61 = math.exp %60 : vector<64x128xf32>
    %cst_19 = arith.constant dense<0.000000e+00> : vector<64xf32>
    %62 = vector.multi_reduction <add>, %61, %cst_19 [1] : vector<64x128xf32> to vector<64xf32>
    %63 = vector.shape_cast %62 : vector<64xf32> to vector<64x1xf32>
    %cst_20 = arith.constant dense<0.000000e+00> : vector<64x16xf32>
    %64 = tpu.matmul %61, %54, %cst_20 {dimension_numbers = #tpu.dot_dimension_numbers<[1], [0], [0], [1], [0, 0, 1, 1], [], []>} : vector<64x128xf32>, vector<128x16xf32>, vector<64x16xf32> -> vector<64x16xf32>
    %65 = tpu.reciprocal %63 {approx = true} : vector<64x1xf32> -> vector<64x1xf32>
    %66 = vector.broadcast %65 : vector<64x1xf32> to vector<64x16xf32>
    %67 = arith.mulf %64, %66 : vector<64x16xf32>
    %68 = vector.extract_strided_slice %3 {offsets = [0, 32], sizes = [64, 16], strides = [1, 1]} : vector<64x64xf32> to vector<64x16xf32>
    %cst_21 = arith.constant dense<0.000000e+00> : vector<64x64xf32>
    %69 = tpu.matmul %67, %68, %cst_21 {dimension_numbers = #tpu.dot_dimension_numbers<[1], [1], [0], [0], [0, 0, 1, 0], [], []>} : vector<64x16xf32>, vector<64x16xf32>, vector<64x64xf32> -> vector<64x64xf32>
    %70 = arith.addf %51, %69 : vector<64x64xf32>
    %71 = vector.extract_strided_slice %1 {offsets = [0, 48], sizes = [64, 16], strides = [1, 1]} : vector<64x64xf32> to vector<64x16xf32>
    %72 = vector.extract_strided_slice %2 {offsets = [0, 80], sizes = [128, 16], strides = [1, 1]} : vector<128x128xf32> to vector<128x16xf32>
    %73 = vector.extract_strided_slice %2 {offsets = [0, 112], sizes = [128, 16], strides = [1, 1]} : vector<128x128xf32> to vector<128x16xf32>
    %cst_22 = arith.constant dense<0.000000e+00> : vector<64x128xf32>
    %74 = tpu.matmul %71, %72, %cst_22 {dimension_numbers = #tpu.dot_dimension_numbers<[1], [1], [0], [0], [0, 0, 1, 0], [], []>} : vector<64x16xf32>, vector<128x16xf32>, vector<64x128xf32> -> vector<64x128xf32>
    %75 = arith.addf %74, %12 : vector<64x128xf32>
    %cst_23 = arith.constant dense<0xFF800000> : vector<64xf32>
    %76 = vector.multi_reduction <maximumf>, %75, %cst_23 [1] : vector<64x128xf32> to vector<64xf32>
    %77 = vector.shape_cast %76 : vector<64xf32> to vector<64x1xf32>
    %78 = vector.broadcast %77 : vector<64x1xf32> to vector<64x128xf32>
    %79 = arith.subf %75, %78 : vector<64x128xf32>
    %80 = math.exp %79 : vector<64x128xf32>
    %cst_24 = arith.constant dense<0.000000e+00> : vector<64xf32>
    %81 = vector.multi_reduction <add>, %80, %cst_24 [1] : vector<64x128xf32> to vector<64xf32>
    %82 = vector.shape_cast %81 : vector<64xf32> to vector<64x1xf32>
    %cst_25 = arith.constant dense<0.000000e+00> : vector<64x16xf32>
    %83 = tpu.matmul %80, %73, %cst_25 {dimension_numbers = #tpu.dot_dimension_numbers<[1], [0], [0], [1], [0, 0, 1, 1], [], []>} : vector<64x128xf32>, vector<128x16xf32>, vector<64x16xf32> -> vector<64x16xf32>
    %84 = tpu.reciprocal %82 {approx = true} : vector<64x1xf32> -> vector<64x1xf32>
    %85 = vector.broadcast %84 : vector<64x1xf32> to vector<64x16xf32>
    %86 = arith.mulf %83, %85 : vector<64x16xf32>
    %87 = vector.extract_strided_slice %3 {offsets = [0, 48], sizes = [64, 16], strides = [1, 1]} : vector<64x64xf32> to vector<64x16xf32>
    %cst_26 = arith.constant dense<0.000000e+00> : vector<64x64xf32>
    %88 = tpu.matmul %86, %87, %cst_26 {dimension_numbers = #tpu.dot_dimension_numbers<[1], [1], [0], [0], [0, 0, 1, 0], [], []>} : vector<64x16xf32>, vector<64x16xf32>, vector<64x64xf32> -> vector<64x64xf32>
    %89 = arith.addf %70, %88 : vector<64x64xf32>
    %c0_27 = arith.constant 0 : index
    %c0_28 = arith.constant 0 : index
    %90 = vector.load %arg3[%c0_27, %c0_28] : memref<64x64xf32, #tpu.memory_space<vmem>>, vector<64x64xf32>
    %91 = arith.addf %89, %90 : vector<64x64xf32>
    %c0_29 = arith.constant 0 : index
    %c0_30 = arith.constant 0 : index
    %92 = vector.load %arg7[%c0_29, %c0_30] : memref<64x64xf32, #tpu.memory_space<vmem>>, vector<64x64xf32>
    tpu.vector_store %arg7[%c0_29, %c0_30], %91 {strides = array<i32>} : memref<64x64xf32, #tpu.memory_space<vmem>>, vector<64x64xf32>,
    %cst_31 = arith.constant dense<0.000000e+00> : vector<64xf32>
    %93 = vector.multi_reduction <add>, %91, %cst_31 [1] : vector<64x64xf32> to vector<64xf32>
    %94 = vector.shape_cast %93 : vector<64xf32> to vector<64x1xf32>
    %cst_32 = arith.constant 6.400000e+01 : f32
    %95 = vector.broadcast %cst_32 : f32 to vector<64x1xf32>
    %96 = arith.divf %94, %95 : vector<64x1xf32>
    %97 = vector.broadcast %96 : vector<64x1xf32> to vector<64x64xf32>
    %98 = arith.subf %91, %97 : vector<64x64xf32>
    %99 = arith.mulf %98, %98 : vector<64x64xf32>
    %cst_33 = arith.constant dense<0.000000e+00> : vector<64xf32>
    %100 = vector.multi_reduction <add>, %99, %cst_33 [1] : vector<64x64xf32> to vector<64xf32>
    %101 = vector.shape_cast %100 : vector<64xf32> to vector<64x1xf32>
    %cst_34 = arith.constant 6.400000e+01 : f32
    %102 = vector.broadcast %cst_34 : f32 to vector<64x1xf32>
    %103 = arith.divf %101, %102 : vector<64x1xf32>
    %cst_35 = arith.constant 9.99999974E-6 : f32
    %104 = vector.broadcast %cst_35 : f32 to vector<64x1xf32>
    %105 = arith.addf %103, %104 : vector<64x1xf32>
    %106 = math.rsqrt %105 : vector<64x1xf32>
    %107 = vector.broadcast %106 : vector<64x1xf32> to vector<64x64xf32>
    %108 = arith.mulf %98, %107 : vector<64x64xf32>
    %c0_36 = arith.constant 0 : index
    %c0_37 = arith.constant 0 : index
    %109 = vector.load %arg5[%c0_36, %c0_37] : memref<1x64xf32, #tpu.memory_space<vmem>>, vector<1x64xf32>
    %110 = vector.broadcast %109 : vector<1x64xf32> to vector<64x64xf32>
    %111 = arith.mulf %108, %110 : vector<64x64xf32>
    %c0_38 = arith.constant 0 : index
    %c0_39 = arith.constant 0 : index
    %112 = vector.load %arg6[%c0_38, %c0_39] : memref<64x64xf32, #tpu.memory_space<vmem>>, vector<64x64xf32>
    tpu.vector_store %arg6[%c0_38, %c0_39], %111 {strides = array<i32>} : memref<64x64xf32, #tpu.memory_space<vmem>>, vector<64x64xf32>,
    return
  }
  func.func @transform_0(%arg0: i32) -> (i32, i32) {
    %c0_i32 = arith.constant 0 : i32
    %c0_i32_0 = arith.constant 0 : i32
    return %arg0, %c0_i32 : i32, i32
  }
  func.func @transform_1(%arg0: i32) -> (i32, i32) {
    %c0_i32 = arith.constant 0 : i32
    %c0_i32_0 = arith.constant 0 : i32
    %c0_i32_1 = arith.constant 0 : i32
    return %c0_i32, %c0_i32_0 : i32, i32
  }
  func.func @transform_2(%arg0: i32) -> (i32, i32) {
    %c0_i32 = arith.constant 0 : i32
    %c0_i32_0 = arith.constant 0 : i32
    return %arg0, %c0_i32 : i32, i32
  }
  func.func @transform_3(%arg0: i32) -> (i32, i32) {
    %c0_i32 = arith.constant 0 : i32
    %c0_i32_0 = arith.constant 0 : i32
    %c0_i32_1 = arith.constant 0 : i32
    return %c0_i32, %c0_i32_0 : i32, i32
  }
  func.func @transform_4(%arg0: i32) -> (i32, i32) {
    %c0_i32 = arith.constant 0 : i32
    %c0_i32_0 = arith.constant 0 : i32
    %c0_i32_1 = arith.constant 0 : i32
    return %c0_i32, %c0_i32_0 : i32, i32
  }
  func.func @transform_5(%arg0: i32) -> (i32, i32) {
    %c0_i32 = arith.constant 0 : i32
    %c0_i32_0 = arith.constant 0 : i32
    return %arg0, %c0_i32 : i32, i32
  }
  func.func @transform_6(%arg0: i32) -> (i32, i32) {
    %c0_i32 = arith.constant 0 : i32
    %c0_i32_0 = arith.constant 0 : i32
    return %arg0, %c0_i32 : i32, i32
  }
}

</mosaic_0001>

<bundles_post_ra>
// kernel: dbrx_norm_attention_norm.2
= control target key start
LH: loop header
LB: loop body
LE: loop exit
PB: predicated region body
PF: predicated region fallthrough
CT: control target
= control target key end

     0   :  { %s1391_s27 = smov 0   ;;  %s1737_s0 = inlined_call_operand.vmem [shape: f32[128,64], index: 0, kind: input, shape index: {}]   ;;  %s1738_s1 = inlined_call_operand.vmem [shape: f32[128,64], index: 1, kind: input, shape index: {}]   ;;  %s1739_s2 = inlined_call_operand.vmem [shape: f32[1,64], index: 2, kind: input, shape index: {}]   ;;  %s1740_s3 = inlined_call_operand.vmem [shape: f32[128,64], index: 3, kind: input, shape index: {}]   ;;  %s1741_s4 = inlined_call_operand.vmem [shape: f32[128,128], index: 4, kind: input, shape index: {}]   ;;  %s1742_s5 = inlined_call_operand.vmem [shape: f32[128,128], index: 5, kind: input, shape index: {}]   ;;  %s1743_s6 = inlined_call_operand.vmem [shape: f32[128,128], index: 6, kind: input, shape index: {}]   ;;  %s1744_s7 = inlined_call_operand.vmem [shape: f32[128,128], index: 7, kind: output, shape index: {0}]   ;;  %s1745_s8 = inlined_call_operand.vmem [shape: f32[128,64], index: 8, kind: output, shape index: {1}]  }
   0x1 LB: > { %s1046_s28 = sadd.s32 4294967295, %s1344_s27   ;;  %p1050_p0 = scmp.ge.s32.totalorder %s1344_s27, 1  ;;  %s1344_s27 = sphi %s1391_s27, %s19_s27  }
   0x2   : > { %p299_p1 = scmp.lt.s32.totalorder %s1344_s27, 3 }
   0x4   : > { %p300_p2 = pnand %p1050_p0, %p299_p1 }
   0x5   : > { %s1051_s29 = sshll.u32 (!%p300_p2), %s1046_s28, 3  ;;  %vm413_vm0 = vcmask (!%p300_p2), 523264   ;;  %v542_v32 = vld [vmem:[%s1740_s3] sm:$0xff] (!%p300_p2)  ;;  %v543_v33 = vld [vmem:[%s1740_s3 + $0x8] sm:$0xff] (!%p300_p2)  ;;  %v544_v36 = vld [vmem:[%s1740_s3 + $0x10] sm:$0xff] (!%p300_p2) }
   0x6   : > { %303 = sbr.rel (%p300_p2) target bundleno = 781 (0x30d), region = 48  ;;  %p354_p3 = scmp.lt.s32.totalorder (!%p300_p2), %s1051_s29, 15  ;;  %vm1499_vm1 = vmpackc.low (!%p300_p2), %vm413_vm0, %vm413_vm0  ;;  %v1234_v35 = vpack.c.bf16 (!%p300_p2), %v543_v33, %v542_v32  ;;  %v545_v37 = vld [vmem:[%s1740_s3 + $0x18] sm:$0xff] (!%p300_p2)  ;;  %v546_v39 = vld [vmem:[%s1740_s3 + $0x20] sm:$0xff] (!%p300_p2) }
   0x7   : > { %v1240_v38 = vpack.c.bf16 (!%p300_p2), %v545_v37, %v544_v36  ;;  %v547_v40 = vld [vmem:[%s1740_s3 + $0x28] sm:$0xff] (!%p300_p2)  ;;  %v548_v42 = vld [vmem:[%s1740_s3 + $0x30] sm:$0xff] (!%p300_p2)  ;;  %v549_v43 = vld [vmem:[%s1740_s3 + $0x38] sm:$0xff] (!%p300_p2) }
   0x8   : > { %1236 = vmatprep.subr.msk.bf16.mxu0 (!%p300_p2), %vm1499_vm1, %v1234_v35  ;;  %v1246_v41 = vpack.c.bf16 (!%p300_p2), %v547_v40, %v546_v39  ;;  %v1252_v44 = vpack.c.bf16 (!%p300_p2), %v549_v43, %v548_v42  ;;  %v550_v45 = vld [vmem:[%s1740_s3 + $0x40] sm:$0xff] (!%p300_p2)  ;;  %v551_v46 = vld [vmem:[%s1740_s3 + $0x48] sm:$0xff] (!%p300_p2)  ;;  %v552_v48 = vld [vmem:[%s1740_s3 + $0x50] sm:$0xff] (!%p300_p2) }
   0x9   : > { %1239 = vmatpush3.bf16.xpose.msk.msra.mxu0 (!%p300_p2), %vm1499_vm1, %v1234_v35  ;;  %v1258_v47 = vpack.c.bf16 (!%p300_p2), %v551_v46, %v550_v45  ;;  %v553_v49 = vld [vmem:[%s1740_s3 + $0x58] sm:$0xff] (!%p300_p2)  ;;  %v751_v33 = vld [vmem:[%s1741_s4] sm:$0xff] (!%p300_p2)  ;;  %v752_v35 = vld [vmem:[%s1741_s4 + $0x8] sm:$0xff] (!%p300_p2) }
   0xa   : > { %1242 = vmatprep.subr.msk.bf16.mxu0 (!%p300_p2), %vm1499_vm1, %v1240_v38  ;;  %v1264_v50 = vpack.c.bf16 (!%p300_p2), %v553_v49, %v552_v48  ;;  %v753_v36 = vld [vmem:[%s1741_s4 + $0x10] sm:$0xff] (!%p300_p2)  ;;  %v1282_v37 = vpack.c.bf16 (!%p300_p2), %v752_v35, %v751_v33  ;;  %v755_v34 = vld [vmem:[%s1741_s4 + $0x20] sm:$0xff] (!%p300_p2)  ;;  %v756_v40 = vld [vmem:[%s1741_s4 + $0x28] sm:$0xff] (!%p300_p2) }
   0xb   : > { %v757_v42 = vld [vmem:[%s1741_s4 + $0x30] sm:$0xff] (!%p300_p2)  ;;  %v758_v43 = vld [vmem:[%s1741_s4 + $0x38] sm:$0xff] (!%p300_p2)  ;;  %v759_v45 = vld [vmem:[%s1741_s4 + $0x40] sm:$0xff] (!%p300_p2) }
   0xc   : > { %1283 = vmatprep.subr.bf16.mxu1 (!%p300_p2), %v1282_v37  ;;  %v760_v46 = vld [vmem:[%s1741_s4 + $0x48] sm:$0xff] (!%p300_p2)  ;;  %v761_v48 = vld [vmem:[%s1741_s4 + $0x50] sm:$0xff] (!%p300_p2)  ;;  %v762_v49 = vld [vmem:[%s1741_s4 + $0x58] sm:$0xff] (!%p300_p2) }
   0xd   : > { %s1749_s29 = smov (!%p354_p3, %s1051_s29), 15  ;;  %1285 = vmatpush3.bf16.msra.mxu1 %v1282_v37 }
   0xe   : > { %s1399_s30 = sshll.u32 %s1749_s29, 3 }
   0xf   : > { %s1405_s11 = scalar_lea.vmem %s1737_s0, %s1399_s30  ;;  %s1411_s14 = scalar_lea.vmem %s1738_s1, %s1399_s30 }
  0x10   : > { %s1417_s17 = scalar_lea.vmem %s1745_s8, %s1399_s30  ;;  %v389_v0 = vld [vmem:[%s1405_s11] sm:$0xff]  ;;  %v391_v2 = vld [vmem:[%s1405_s11 + $0x10] sm:$0xff]  ;;  %v390_v5 = vld [vmem:[%s1405_s11 + $0x8] sm:$0xff]  ;;  %s1696_s26 = scalar_lea.vmem %s1742_s5, %s1399_s30 }
  0x11   : > { %v397_v1 = vld [vmem:[%s1411_s14] sm:$0xff]  ;;  %v399_v4 = vld [vmem:[%s1411_s14 + $0x10] sm:$0xff]  ;;  %v398_v6 = vld [vmem:[%s1411_s14 + $0x8] sm:$0xff]  ;;  %1245 = vmatpush3.bf16.xpose.msk.msra.mxu0 %vm1499_vm1, %v1240_v38  ;;  %s1702_s9 = scalar_lea.vmem %s1743_s6, %s1399_s30  ;;  %s1713_s12 = scalar_lea.vmem %s1744_s7, %s1399_s30 }
  0x12   : > { %v1422_v3 = vadd.f32 %v397_v1, %v389_v0  ;;  %v1427_v7 = vadd.f32 %v399_v4, %v391_v2  ;;  %v1429_v8 = vadd.f32 %v398_v6, %v390_v5  ;;  %v392_v9 = vld [vmem:[%s1405_s11 + $0x18] sm:$0xff]  ;;  %v393_v11 = vld [vmem:[%s1405_s11 + $0x20] sm:$0xff]  ;;  %v394_v15 = vld [vmem:[%s1405_s11 + $0x28] sm:$0xff]  ;;  %1248 = vmatprep.subr.msk.bf16.mxu0 %vm1499_vm1, %v1246_v41 }
  0x13   : > { %v400_v10 = vld [vmem:[%s1411_s14 + $0x18] sm:$0xff]  ;;  %v401_v14 = vld [vmem:[%s1411_s14 + $0x20] sm:$0xff]  ;;  %v402_v16 = vld [vmem:[%s1411_s14 + $0x28] sm:$0xff] }
  0x14   : > { %v422_v12 = vsel %vm413_vm0, %v1422_v3, 0.0  ;;  %414 = vst.msk [vmem:[%s1417_s17] sm:$0xff] %vm413_vm0, %v1422_v3  ;;  %v1439_v13 = vadd.f32 %v400_v10, %v392_v9  ;;  %v428_v17 = vsel %vm413_vm0, %v1427_v7, 0.0  ;;  %416 = vst.msk [vmem:[%s1417_s17 + $0x10] sm:$0xff] %vm413_vm0, %v1427_v7  ;;  %v1452_v18 = vadd.f32 %v401_v14, %v393_v11  ;;  %v395_v20 = vld [vmem:[%s1405_s11 + $0x30] sm:$0xff]  ;;  %v396_v22 = vld [vmem:[%s1405_s11 + $0x38] sm:$0xff] }
  0x15   : > { %423 = vadd.xlane.f32.xlu0 %v422_v12  ;;  %415 = vst.msk [vmem:[%s1417_s17 + $0x8] sm:$0xff] %vm413_vm0, %v1429_v8  ;;  %v1454_v19 = vadd.f32 %v402_v16, %v394_v15  ;;  %v403_v21 = vld [vmem:[%s1411_s14 + $0x30] sm:$0xff]  ;;  %429 = vadd.xlane.f32.xlu1 %v428_v17  ;;  %v425_v23 = vsel %vm413_vm0, %v1429_v8, 0.0  ;;  %v404_v25 = vld [vmem:[%s1411_s14 + $0x38] sm:$0xff] }
  0x16   : > { %417 = vst.msk [vmem:[%s1417_s17 + $0x18] sm:$0xff] %vm413_vm0, %v1439_v13  ;;  %v1464_v24 = vadd.f32 %v403_v21, %v395_v20  ;;  %v431_v26 = vsel %vm413_vm0, %v1439_v13, 0.0  ;;  %418 = vst.msk [vmem:[%s1417_s17 + $0x20] sm:$0xff] %vm413_vm0, %v1452_v18  ;;  %v1475_v27 = vadd.f32 %v404_v25, %v396_v22  ;;  %v434_v28 = vsel %vm413_vm0, %v1452_v18, 0.0  ;;  %v754_v38 = vld [vmem:[%s1741_s4 + $0x18] sm:$0xff] }
  0x17   : > { %419 = vst.msk [vmem:[%s1417_s17 + $0x28] sm:$0xff] %vm413_vm0, %v1454_v19  ;;  %v437_v29 = vsel %vm413_vm0, %v1454_v19, 0.0  ;;  %v1286_v39 = vpack.c.bf16 %v754_v38, %v753_v36 }
  0x18   : > { %420 = vst.msk [vmem:[%s1417_s17 + $0x30] sm:$0xff] %vm413_vm0, %v1464_v24  ;;  %421 = vst.msk [vmem:[%s1417_s17 + $0x38] sm:$0xff] %vm413_vm0, %v1475_v27  ;;  %v440_v30 = vsel %vm413_vm0, %v1464_v24, 0.0  ;;  %v443_v31 = vsel %vm413_vm0, %v1475_v27, 0.0 }
  0x19   : > { %426 = vadd.xlane.f32.xlu0 %v425_v23  ;;  %432 = vadd.xlane.f32.xlu1 %v431_v26 }
  0x1a   : > { %1251 = vmatpush3.bf16.xpose.msk.msra.mxu0 %vm1499_vm1, %v1246_v41  ;;  %1287 = vmatprep.subr.bf16.mxu1 %v1286_v39  ;;  %v1290_v41 = vpack.c.bf16 %v756_v40, %v755_v34 }
  0x1b   : > { %1254 = vmatprep.subr.msk.bf16.mxu0 %vm1499_vm1, %v1252_v44  ;;  %1289 = vmatpush3.bf16.msra.mxu1 %v1286_v39 }
  0x1c   : > { %1291 = vmatprep.subr.bf16.mxu1 %v1290_v41 }
  0x1d   : > { %435 = vadd.xlane.f32.xlu0 %v434_v28  ;;  %438 = vadd.xlane.f32.xlu1 %v437_v29  ;;  %v555_v28 = vld [vmem:[%s1740_s3 + $0x68] sm:$0xff] }
  0x1f   : > { %1293 = vmatpush3.bf16.msra.mxu1 %v1290_v41 }
  0x21   : > { %441 = vadd.xlane.f32.xlu0 %v440_v30  ;;  %444 = vadd.xlane.f32.xlu1 %v443_v31  ;;  %v556_v30 = vld [vmem:[%s1740_s3 + $0x70] sm:$0xff]  ;;  %v557_v31 = vld [vmem:[%s1740_s3 + $0x78] sm:$0xff] }
  0x22   : > { %1257 = vmatpush3.bf16.xpose.msk.msra.mxu0 %vm1499_vm1, %v1252_v44  ;;  %v1276_v32 = vpack.c.bf16 %v557_v31, %v556_v30  ;;  %v1294_v44 = vpack.c.bf16 %v758_v43, %v757_v42 }
  0x23   : > { %1260 = vmatprep.subr.msk.bf16.mxu0 %vm1499_vm1, %v1258_v47 }
  0x24   : > { %1295 = vmatprep.subr.bf16.mxu1 %v1294_v44 }
  0x25   : > { %1297 = vmatpush3.bf16.msra.mxu1 %v1294_v44 }
  0x2a   : > { %1263 = vmatpush3.bf16.xpose.msk.msra.mxu0 %vm1499_vm1, %v1258_v47  ;;  %v1298_v47 = vpack.c.bf16 %v760_v46, %v759_v45 }
  0x2b   : > { %1266 = vmatprep.subr.msk.bf16.mxu0 %vm1499_vm1, %v1264_v50 }
  0x2c   : > { %1299 = vmatprep.subr.bf16.mxu1 %v1298_v47 }
  0x2d   : > { %1301 = vmatpush3.bf16.msra.mxu1 %v1298_v47 }
  0x32   : > { %1269 = vmatpush3.bf16.xpose.msk.msra.mxu0 %vm1499_vm1, %v1264_v50  ;;  %v1302_v50 = vpack.c.bf16 %v762_v49, %v761_v48 }
  0x34   : > { %1303 = vmatprep.subr.bf16.mxu1 %v1302_v50 }
  0x35   : > { %1305 = vmatpush3.bf16.msra.mxu1 %v1302_v50 }
  0xa2   : > { %v424_v51 = vpop.xlane.xlu0 %423  ;;  %v430_v53 = vpop.xlane.xlu1 %429 }
  0xa3   : > { %v447_v52 = vmul.f32 0.015625, %v424_v51  ;;  %v449_v54 = vmul.f32 0.015625, %v430_v53  ;;  %v763_v51 = vld [vmem:[%s1741_s4 + $0x60] sm:$0xff] }
  0xa5   : > { %v1558_v55 = vsub.f32 %v1422_v3, %v447_v52  ;;  %v1561_v56 = vsub.f32 %v1427_v7, %v449_v54  ;;  %v764_v52 = vld [vmem:[%s1741_s4 + $0x68] sm:$0xff] }
  0xa6   : > { %v427_v57 = vpop.xlane.xlu0 %426  ;;  %v433_v59 = vpop.xlane.xlu1 %432  ;;  %v1306_v53 = vpack.c.bf16 %v764_v52, %v763_v51 }
  0xa7   : > { %v448_v58 = vmul.f32 0.015625, %v427_v57  ;;  %v463_v60 = vmul.f32 %v1558_v55, %v1558_v55  ;;  %v450_v61 = vmul.f32 0.015625, %v433_v59  ;;  %v465_v62 = vmul.f32 %v1561_v56, %v1561_v56 }
  0xa8   : > { %1307 = vmatprep.subr.bf16.mxu1 %v1306_v53 }
  0xa9   : > { %v1568_v63 = vsub.f32 %v1429_v8, %v448_v58  ;;  %v471_v0 = vsel %vm413_vm0, %v463_v60, 0.0  ;;  %v1572_v1 = vsub.f32 %v1439_v13, %v450_v61  ;;  %v477_v5 = vsel %vm413_vm0, %v465_v62, 0.0  ;;  %1309 = vmatpush3.bf16.msra.mxu1 %v1306_v53 }
  0xaa   : > { %472 = vadd.xlane.f32.xlu0 %v471_v0  ;;  %v436_v2 = vpop.xlane.xlu0 %435  ;;  %v439_v4 = vpop.xlane.xlu1 %438 }
  0xab   : > { %v451_v3 = vmul.f32 0.015625, %v436_v2  ;;  %v464_v6 = vmul.f32 %v1568_v63, %v1568_v63  ;;  %v452_v7 = vmul.f32 0.015625, %v439_v4  ;;  %v466_v9 = vmul.f32 %v1572_v1, %v1572_v1 }
  0xad   : > { %v1580_v8 = vsub.f32 %v1452_v18, %v451_v3  ;;  %v474_v10 = vsel %vm413_vm0, %v464_v6, 0.0  ;;  %v1584_v11 = vsub.f32 %v1454_v19, %v452_v7  ;;  %v480_v15 = vsel %vm413_vm0, %v466_v9, 0.0 }
  0xae   : > { %478 = vadd.xlane.f32.xlu0 %v477_v5  ;;  %475 = vadd.xlane.f32.xlu1 %v474_v10  ;;  %v442_v12 = vpop.xlane.xlu0 %441  ;;  %v445_v14 = vpop.xlane.xlu1 %444 }
  0xaf   : > { %v453_v13 = vmul.f32 0.015625, %v442_v12  ;;  %v467_v16 = vmul.f32 %v1580_v8, %v1580_v8  ;;  %v454_v17 = vmul.f32 0.015625, %v445_v14  ;;  %v468_v18 = vmul.f32 %v1584_v11, %v1584_v11 }
  0xb1   : > { %v1592_v20 = vsub.f32 %v1464_v24, %v453_v13  ;;  %v483_v19 = vsel %vm413_vm0, %v467_v16, 0.0  ;;  %v1596_v21 = vsub.f32 %v1475_v27, %v454_v17  ;;  %v486_v22 = vsel %vm413_vm0, %v468_v18, 0.0  ;;  %v554_v27 = vld [vmem:[%s1740_s3 + $0x60] sm:$0xff] }
  0xb2   : > { %481 = vadd.xlane.f32.xlu1 %v480_v15  ;;  %484 = vadd.xlane.f32.xlu0 %v483_v19  ;;  %v1270_v29 = vpack.c.bf16 %v555_v28, %v554_v27  ;;  %v1063_v18 = vld [vmem:[%s1739_s2] ss:$0 sm:$0xff] }
  0xb3   : > { %v469_v23 = vmul.f32 %v1592_v20, %v1592_v20  ;;  %v470_v25 = vmul.f32 %v1596_v21, %v1596_v21 }
  0xb4   : > { %1272 = vmatprep.subr.msk.bf16.mxu0 %vm1499_vm1, %v1270_v29 }
  0xb5   : > { %v489_v26 = vsel %vm413_vm0, %v469_v23, 0.0  ;;  %v492_v24 = vsel %vm413_vm0, %v470_v25, 0.0  ;;  %1275 = vmatpush3.bf16.xpose.msk.msra.mxu0 %vm1499_vm1, %v1270_v29 }
  0xb6   : > { %487 = vadd.xlane.f32.xlu1 %v486_v22  ;;  %490 = vadd.xlane.f32.xlu0 %v489_v26 }
  0xb7   : > { %1278 = vmatprep.subr.msk.bf16.mxu0 %vm1499_vm1, %v1276_v32 }
  0xba   : > { %493 = vadd.xlane.f32.xlu1 %v492_v24 }
  0xbd   : > { %1281 = vmatpush3.bf16.xpose.msk.msra.mxu0 %vm1499_vm1, %v1276_v32 }
 0x137   : > { %v473_v54 = vpop.xlane.xlu0 %472 }
 0x138   : > { %v495_v57 = vmul.f32 0.015625, %v473_v54 }
 0x13a   : > { %v503_v58 = vadd.f32 1e-05, %v495_v57 }
 0x13b   : > { %v476_v59 = vpop.xlane.xlu1 %475  ;;  %v479_v60 = vpop.xlane.xlu0 %478 }
 0x13c   : > { %1322 = vrsqrt.f32 %v503_v58  ;;  %v496_v61 = vmul.f32 0.015625, %v476_v59  ;;  %v497_v62 = vmul.f32 0.015625, %v479_v60  ;;  %v873_v60 = vld [vmem:[%s1696_s26 + $0x8] sm:$0xff] }
 0x13e   : > { %v504_v0 = vadd.f32 1e-05, %v496_v61  ;;  %v505_v2 = vadd.f32 1e-05, %v497_v62  ;;  %v889_v61 = vld [vmem:[%s1702_s9 + $0x8] sm:$0xff]  ;;  %v872_v62 = vld [vmem:[%s1696_s26] sm:$0xff] }
 0x13f   : > { %v482_v3 = vpop.xlane.xlu1 %481  ;;  %v485_v4 = vpop.xlane.xlu0 %484 }
 0x140   : > { %1324 = vrsqrt.f32 %v504_v0  ;;  %v498_v5 = vmul.f32 0.015625, %v482_v3  ;;  %v499_v6 = vmul.f32 0.015625, %v485_v4  ;;  %v888_v0 = vld [vmem:[%s1702_s9] sm:$0xff] }
 0x141   : > { %1326 = vrsqrt.f32 %v505_v2 }
 0x142   : > { %v506_v7 = vadd.f32 1e-05, %v498_v5  ;;  %v507_v9 = vadd.f32 1e-05, %v499_v6 }
 0x143   : > { %v488_v10 = vpop.xlane.xlu1 %487  ;;  %v491_v12 = vpop.xlane.xlu0 %490 }
 0x144   : > { %1328 = vrsqrt.f32 %v506_v7  ;;  %v500_v13 = vmul.f32 0.015625, %v488_v10  ;;  %v501_v14 = vmul.f32 0.015625, %v491_v12  ;;  %v875_v7 = vld [vmem:[%s1696_s26 + $0x18] sm:$0xff]  ;;  %v874_v12 = vld [vmem:[%s1696_s26 + $0x10] sm:$0xff] }
 0x145   : > { %1330 = vrsqrt.f32 %v507_v9  ;;  %v891_v10 = vld [vmem:[%s1702_s9 + $0x18] sm:$0xff] }
 0x146   : > { %v1323_v15 = vpop.eup %1322  ;;  %v508_v16 = vadd.f32 1e-05, %v500_v13  ;;  %v509_v17 = vadd.f32 1e-05, %v501_v14  ;;  %v890_v14 = vld [vmem:[%s1702_s9 + $0x10] sm:$0xff] }
 0x147   : > { %v494_v19 = vpop.xlane.xlu1 %493  ;;  %v519_v22 = vmul.f32 %v1323_v15, %v1558_v55 }
 0x148   : > { %1332 = vrsqrt.f32 %v508_v16  ;;  %v502_v23 = vmul.f32 0.015625, %v494_v19 }
 0x149   : > { %1334 = vrsqrt.f32 %v509_v17  ;;  %v534_v25 = vmul.f32 %v1063_v18, %v519_v22 }
 0x14a   : > { %v1325_v26 = vpop.eup %1324  ;;  %v510_v24 = vadd.f32 1e-05, %v502_v23  ;;  %v877_v23 = vld [vmem:[%s1696_s26 + $0x28] sm:$0xff] }
 0x14b   : > { %v1327_v27 = vpop.eup %1326  ;;  %1178 = vmatprep.mubr.msk.f32.mxu0 %vm413_vm0, %v534_v25  ;;  %v520_v28 = vmul.f32 %v1325_v26, %v1568_v63  ;;  %v893_v26 = vld [vmem:[%s1702_s9 + $0x28] sm:$0xff] }
 0x14c   : > { %1336 = vrsqrt.f32 %v510_v24  ;;  %v521_v29 = vmul.f32 %v1327_v27, %v1561_v56  ;;  %v876_v24 = vld [vmem:[%s1696_s26 + $0x20] sm:$0xff] }
 0x14d   : > { %v535_v30 = vmul.f32 %v1063_v18, %v520_v28  ;;  %v892_v28 = vld [vmem:[%s1702_s9 + $0x20] sm:$0xff] }
 0x14e   : > { %v1329_v31 = vpop.eup %1328  ;;  %v536_v32 = vmul.f32 %v1063_v18, %v521_v29 }
 0x14f   : > { %v1331_v33 = vpop.eup %1330  ;;  %1179 = vmatmul.mubr.msk.f32.vlgmr.msra.gmra.mrb[0].mxu0 %vm413_vm0, %v535_v30  ;;  %v522_v55 = vmul.f32 %v1329_v31, %v1572_v1 }
 0x150   : > { %1181 = vmatprep.mubr.msk.f32.mxu0 %vm413_vm0, %v536_v32  ;;  %v523_v35 = vmul.f32 %v1331_v33, %v1580_v8 }
 0x151   : > { %v537_v36 = vmul.f32 %v1063_v18, %v522_v55 }
 0x152   : > { %v1333_v37 = vpop.eup %1332  ;;  %v538_v38 = vmul.f32 %v1063_v18, %v523_v35  ;;  %v879_v35 = vld [vmem:[%s1696_s26 + $0x38] sm:$0xff] }
 0x153   : > { %v1335_v39 = vpop.eup %1334  ;;  %1182 = vmatmul.mubr.msk.f32.gmra.mrb[2].mxu0 %vm413_vm0, %v537_v36  ;;  %v524_v56 = vmul.f32 %v1333_v37, %v1584_v11  ;;  %v765_v11 = vld [vmem:[%s1741_s4 + $0x70] sm:$0xff]  ;;  %v895_v37 = vld [vmem:[%s1702_s9 + $0x38] sm:$0xff] }
 0x154   : > { %1184 = vmatprep.mubr.msk.f32.mxu0 %vm413_vm0, %v538_v38  ;;  %v525_v63 = vmul.f32 %v1335_v39, %v1592_v20  ;;  %v766_v20 = vld [vmem:[%s1741_s4 + $0x78] sm:$0xff]  ;;  %v878_v38 = vld [vmem:[%s1696_s26 + $0x30] sm:$0xff] }
 0x155   : > { %v539_v34 = vmul.f32 %v1063_v18, %v524_v56  ;;  %v1310_v42 = vpack.c.bf16 %v766_v20, %v765_v11  ;;  %v894_v56 = vld [vmem:[%s1702_s9 + $0x30] sm:$0xff] }
 0x156   : > { %v1337_v40 = vpop.eup %1336  ;;  %v540_v41 = vmul.f32 %v1063_v18, %v525_v63 }
 0x157   : > { %1185 = vmatmul.mubr.msk.f32.gmra.mrb[4].mxu0 %vm413_vm0, %v539_v34  ;;  %v526_v1 = vmul.f32 %v1337_v40, %v1596_v21  ;;  %1311 = vmatprep.subr.bf16.mxu1 %v1310_v42 }
 0x158   : > { %1187 = vmatprep.mubr.msk.f32.mxu0 %vm413_vm0, %v540_v41  ;;  %1313 = vmatpush3.bf16.msra.mxu1 %v1310_v42 }
 0x159   : > { %v541_v8 = vmul.f32 %v1063_v18, %v526_v1 }
 0x15b   : > { %1188 = vmatmul.mubr.msk.f32.gmra.mrb[6].mxu0 %vm413_vm0, %v541_v8 }
 0x222   : > { %v1180_v43 = vpop.f32.mrb[0].mxu0 }
 0x223   : > { %v696_v44 = vpop.f32.mrb[1].mxu0  ;;  %v1089_v21 = vclamps-f32 %v1180_v43, 8.0 }
 0x224   : > { %v1088_v45 = vclamps-f32 %v696_v44, 8.0 }
 0x225   : > { %v881_v3 = vmul.f32 %v1089_v21, %v873_v60 }
 0x226   : > { %v1183_v46 = vpop.f32.mrb[2].mxu0  ;;  %1222 = vmatprep.mubr.f32.mxu1 %v1088_v45  ;;  %v880_v6 = vmul.f32 %v1088_v45, %v872_v62 }
 0x227   : > { %v706_v47 = vpop.f32.mrb[3].mxu0  ;;  %1223 = vmatmul.mubr.f32.vlgmr.msra.gmra.mrb[0].mxu1 %v1089_v21  ;;  %v1091_v49 = vclamps-f32 %v1183_v46, 8.0 }
 0x228   : > { %v1090_v48 = vclamps-f32 %v706_v47, 8.0 }
 0x229   : > { %v883_v17 = vmul.f32 %v1091_v49, %v875_v7 }
 0x22a   : > { %v1186_v50 = vpop.f32.mrb[4].mxu0  ;;  %1225 = vmatprep.mubr.f32.mxu1 %v1090_v48  ;;  %v882_v22 = vmul.f32 %v1090_v48, %v874_v12 }
 0x22b   : > { %v716_v51 = vpop.f32.mrb[5].mxu0  ;;  %1226 = vmatmul.mubr.f32.gmra.mrb[2].mxu1 %v1091_v49  ;;  %v1093_v53 = vclamps-f32 %v1186_v50, 8.0 }
 0x22c   : > { %v1092_v52 = vclamps-f32 %v716_v51, 8.0 }
 0x22d   : > { %v885_v31 = vmul.f32 %v1093_v53, %v877_v23 }
 0x22e   : > { %v1189_v54 = vpop.f32.mrb[6].mxu0  ;;  %1228 = vmatprep.mubr.f32.mxu1 %v1092_v52  ;;  %v884_v55 = vmul.f32 %v1092_v52, %v876_v24 }
 0x22f   : > { %v726_v57 = vpop.f32.mrb[7].mxu0  ;;  %1229 = vmatmul.mubr.f32.gmra.mrb[4].mxu1 %v1093_v53  ;;  %v1095_v59 = vclamps-f32 %v1189_v54, 8.0 }
 0x230   : > { %v1094_v58 = vclamps-f32 %v726_v57, 8.0 }
 0x231   : > { %v887_v40 = vmul.f32 %v1095_v59, %v879_v35 }
 0x232   : > { %1231 = vmatprep.mubr.f32.mxu1 %v1094_v58  ;;  %v886_v8 = vmul.f32 %v1094_v58, %v878_v38 }
 0x233   : > { %1232 = vmatmul.mubr.f32.gmra.mrb[6].mxu1 %v1095_v59 }
 0x2fa   : > { %v1224_v2 = vpop.f32.mrb[0].mxu1 }
 0x2fb   : > { %v897_v4 = vmul.f32 %v1224_v2, %v889_v61  ;;  %v833_v5 = vpop.f32.mrb[1].mxu1 }
 0x2fc   : > { %v896_v9 = vmul.f32 %v888_v0, %v833_v5 }
 0x2fd   : > { %v905_v13 = vadd.f32 %v897_v4, %v881_v3 }
 0x2fe   : > { %v904_v15 = vadd.f32 %v896_v9, %v880_v6  ;;  %v1227_v16 = vpop.f32.mrb[2].mxu1 }
 0x2ff   : > { %913 = vst [vmem:[%s1713_s12 + $0x8] sm:$0xff] %v905_v13  ;;  %v899_v18 = vmul.f32 %v1227_v16, %v891_v10  ;;  %v843_v19 = vpop.f32.mrb[3].mxu1 }
 0x300   : > { %912 = vst [vmem:[%s1713_s12] sm:$0xff] %v904_v15  ;;  %v898_v25 = vmul.f32 %v890_v14, %v843_v19 }
 0x301   : > { %v907_v27 = vadd.f32 %v899_v18, %v883_v17 }
 0x302   : > { %v906_v29 = vadd.f32 %v898_v25, %v882_v22  ;;  %v1230_v30 = vpop.f32.mrb[4].mxu1 }
 0x303   : > { %915 = vst [vmem:[%s1713_s12 + $0x18] sm:$0xff] %v907_v27  ;;  %v901_v32 = vmul.f32 %v1230_v30, %v893_v26  ;;  %v853_v33 = vpop.f32.mrb[5].mxu1 }
 0x304   : > { %914 = vst [vmem:[%s1713_s12 + $0x10] sm:$0xff] %v906_v29  ;;  %v900_v36 = vmul.f32 %v892_v28, %v853_v33 }
 0x305   : > { %v909_v39 = vadd.f32 %v901_v32, %v885_v31 }
 0x306   : > { %v908_v63 = vadd.f32 %v900_v36, %v884_v55  ;;  %v1233_v34 = vpop.f32.mrb[6].mxu1 }
 0x307   : > { %917 = vst [vmem:[%s1713_s12 + $0x28] sm:$0xff] %v909_v39  ;;  %v903_v41 = vmul.f32 %v1233_v34, %v895_v37  ;;  %v863_v1 = vpop.f32.mrb[7].mxu1 }
 0x308   : > { %916 = vst [vmem:[%s1713_s12 + $0x20] sm:$0xff] %v908_v63  ;;  %v902_v11 = vmul.f32 %v894_v56, %v863_v1 }
 0x309   : > { %v911_v20 = vadd.f32 %v903_v41, %v887_v40 }
 0x30a   : > { %v910_v42 = vadd.f32 %v902_v11, %v886_v8 }
 0x30b   : > { %919 = vst [vmem:[%s1713_s12 + $0x38] sm:$0xff] %v911_v20 }
 0x30c   : > { %918 = vst [vmem:[%s1713_s12 + $0x30] sm:$0xff] %v910_v42 }
 0x30d PF: > { %s19_s27 = sadd.s32 1, %s1344_s27  }
 0x30e   : > { %p16_p4 = scmp.ge.s32.totalorder %s19_s27, 4  }
 0x310   :  { %18 = sbr.rel (!%p16_p4) target bundleno = 1 (0x1), region = 99 }

// kernel: dbrx_norm_attention_norm.3
= control target key start
LH: loop header
LB: loop body
LE: loop exit
PB: predicated region body
PF: predicated region fallthrough
CT: control target
= control target key end

     0   :  { %s4540_s21 = smov 0   ;;  %s5799_s0 = inlined_call_operand.vmem [shape: f32[128,128], index: 0, kind: input, shape index: {}, may-alias: {0,1}]   ;;  %s5800_s1 = inlined_call_operand.vmem [shape: f32[128,128], index: 1, kind: input, shape index: {}, may-alias: {0,1}]   ;;  %s5801_s2 = inlined_call_operand.vmem [shape: f32[128,64], index: 2, kind: input, shape index: {}]   ;;  %s5802_s3 = inlined_call_operand.vmem [shape: f32[64,64], index: 3, kind: input, shape index: {}]   ;;  %s5803_s4 = inlined_call_operand.vmem [shape: f32[1,64], index: 4, kind: input, shape index: {}]   ;;  %s5804_s5 = inlined_call_operand.vmem [shape: f32[128,64], index: 5, kind: output, shape index: {0}]   ;;  %s5805_s6 = inlined_call_operand.vmem [shape: f32[128,64], index: 6, kind: output, shape index: {1}]  }
   0x1 LB: > { %s2756_s22 = sadd.s32 4294967295, %s4495_s21   ;;  %p2760_p0 = scmp.ge.s32.totalorder %s4495_s21, 1  ;;  %s4495_s21 = sphi %s4540_s21, %s17_s21  }
   0x2   : > { %p227_p1 = scmp.lt.s32.totalorder %s4495_s21, 3 }
   0x4   : > { %p228_p2 = pnand %p2760_p0, %p227_p1 }
   0x6   : > { %231 = sbr.rel (%p228_p2) target bundleno = 2543 (0x9ef), region = 40 }
   0xd   : > { %v299_v0 = vld [vmem:[%s5800_s1] sm:$0xff]  ;;  %v300_v1 = vld [vmem:[%s5800_s1 + $0x8] sm:$0xff]  ;;  %v301_v2 = vld [vmem:[%s5800_s1 + $0x10] sm:$0xff]  ;;  %s4497_s15 = smov 64   ;;  %s2761_s10 = sshll.u32 %s2756_s22, 3  ;;  %vm408_vm0 = vcmask 130048  }
   0xe   : > { %v4557_v3 = vpack.i.bf16 %v300_v1, %v299_v0  ;;  %v4562_v4 = vld [vmem:[%s5800_s1 + $0x18] sm:$0xff]  ;;  %v303_v5 = vld [vmem:[%s5800_s1 + $0x20] sm:$0xff]  ;;  %v304_v6 = vld [vmem:[%s5800_s1 + $0x28] sm:$0xff]  ;;  %p268_p3 = scmp.lt.s32.totalorder %s2761_s10, 15  ;;  %s2769_s16 = sshll.u32 %s2756_s22, 6  ;;  %vm2517_vm10 = vcmask 523264  }
   0xf   : > { %v4570_v7 = vpack.i.bf16 %v304_v6, %v303_v5  ;;  %v305_v8 = vld [vmem:[%s5800_s1 + $0x30] sm:$0xff]  ;;  %v4578_v9 = vld [vmem:[%s5800_s1 + $0x38] sm:$0xff]  ;;  %v4582_v10 = vpack.i.bf16 %v4562_v4, %v301_v2  ;;  %v307_v12 = vld [vmem:[%s5800_s1 + $0x40] sm:$0xff]  ;;  %s4500_s22 = smov 112   ;;  %s4501_s17 = smov 48  }
  0x10   : > { %4110 = vrot.lane.b32.xlu0 %v4557_v3, %s4497_s15  ;;  %v4586_v11 = vpack.i.bf16 %v4578_v9, %v305_v8  ;;  %v308_v13 = vld [vmem:[%s5800_s1 + $0x48] sm:$0xff]  ;;  %v309_v14 = vld [vmem:[%s5800_s1 + $0x50] sm:$0xff]  ;;  %v310_v15 = vld [vmem:[%s5800_s1 + $0x58] sm:$0xff]  ;;  %s5819_s10 = smov (!%p268_p3, %s2761_s10), 15  ;;  %s4502_s18 = smov 96  }
  0x11   : > { %4120 = vrot.lane.b32.xlu1 %v4570_v7, %s4497_s15  ;;  %v4601_v16 = vpack.i.bf16 %v308_v13, %v307_v12  ;;  %v4604_v17 = vpack.i.bf16 %v310_v15, %v309_v14  ;;  %v311_v18 = vld [vmem:[%s5800_s1 + $0x60] sm:$0xff]  ;;  %v312_v19 = vld [vmem:[%s5800_s1 + $0x68] sm:$0xff]  ;;  %v313_v20 = vld [vmem:[%s5800_s1 + $0x70] sm:$0xff]  ;;  %s4628_s11 = sshll.u32 %s5819_s10, 3 }
  0x12   : > { %v314_v21 = vld [vmem:[%s5800_s1 + $0x78] sm:$0xff]  ;;  %v4619_v22 = vpack.i.bf16 %v312_v19, %v311_v18  ;;  %s4634_s14 = scalar_lea.vmem %s5799_s0, %s4628_s11  ;;  %vm4655_vm1 = vmpackc.low %vm408_vm0, %vm408_vm0  ;;  %s5683_s30 = scalar_lea.vmem %s5801_s2, %s4628_s11 }
  0x13   : > { %v4622_v23 = vpack.i.bf16 %v314_v21, %v313_v20  ;;  %v4637_v24 = vld [vmem:[%s4634_s14] sm:$0xff]  ;;  %v4724_v58 = vld [vmem:[%s4634_s14 + $0x8] sm:$0xff]  ;;  %v4727_v59 = vld [vmem:[%s4634_s14 + $0x10] sm:$0xff]  ;;  %s5691_s9 = scalar_lea.vmem %s5805_s6, %s4628_s11 }
  0x14   : > { %4115 = vrot.lane.b32.xlu0 %v4582_v10, %s4497_s15  ;;  %3221 = vmatprep.mubr.msk.f32.mxu0 %vm408_vm0, %v4637_v24  ;;  %v4734_v60 = vld [vmem:[%s4634_s14 + $0x18] sm:$0xff]  ;;  %v4737_v61 = vld [vmem:[%s4634_s14 + $0x20] sm:$0xff]  ;;  %v4744_v62 = vld [vmem:[%s4634_s14 + $0x28] sm:$0xff] }
  0x15   : > { %4125 = vrot.lane.b32.xlu1 %v4586_v11, %s4497_s15  ;;  %v4747_v63 = vld [vmem:[%s4634_s14 + $0x30] sm:$0xff]  ;;  %v4754_v0 = vld [vmem:[%s4634_s14 + $0x38] sm:$0xff]  ;;  %s4503_s14 = smov 80  }
  0x18   : > { %4130 = vrot.lane.b32.xlu0 %v4601_v16, %s4497_s15 }
  0x19   : > { %4135 = vrot.lane.b32.xlu1 %v4604_v17, %s4497_s15 }
  0x1c   : > { %4140 = vrot.lane.b32.xlu0 %v4619_v22, %s4497_s15 }
  0x1d   : > { %4145 = vrot.lane.b32.xlu1 %v4622_v23, %s4497_s15  ;;  %s4498_s15 = smov 32  }
  0x20   : > { %4150 = vrot.lane.b32.xlu0 %v4557_v3, %s4498_s15 }
  0x21   : > { %4155 = vrot.lane.b32.xlu1 %v4582_v10, %s4498_s15 }
  0x24   : > { %4160 = vrot.lane.b32.xlu0 %v4570_v7, %s4498_s15 }
  0x25   : > { %4170 = vrot.lane.b32.xlu1 %v4601_v16, %s4498_s15 }
  0x28   : > { %4165 = vrot.lane.b32.xlu0 %v4586_v11, %s4498_s15 }
  0x29   : > { %4175 = vrot.lane.b32.xlu1 %v4604_v17, %s4498_s15 }
  0x82   : > { %v4111_v25 = vpop.permute.xlu0 %4110 }
  0x83   : > { %v4113_v26 = vunpack.i.h.bf16 %v4111_v25  ;;  %v4112_v27 = vunpack.i.l.bf16 %v4111_v25  ;;  %v4121_v31 = vpop.permute.xlu1 %4120 }
  0x84   : > { %v4123_v35 = vunpack.i.h.bf16 %v4121_v31  ;;  %v4122_v36 = vunpack.i.l.bf16 %v4121_v31 }
  0x85   : > { %v4659_v29 = vpack.c.bf16 %v4113_v26, %v4112_v27 }
  0x86   : > { %v4116_v30 = vpop.permute.xlu0 %4115  ;;  %v4672_v37 = vpack.c.bf16 %v4123_v35, %v4122_v36 }
  0x87   : > { %3655 = vmatprep.subr.msk.bf16.mxu0 %vm4655_vm1, %v4659_v29  ;;  %v4118_v32 = vunpack.i.h.bf16 %v4116_v30  ;;  %v4117_v33 = vunpack.i.l.bf16 %v4116_v30  ;;  %v4126_v38 = vpop.permute.xlu1 %4125 }
  0x88   : > { %3658 = vmatpush3.bf16.xpose.msk.msra.mxu0 %vm4655_vm1, %v4659_v29  ;;  %v4128_v39 = vunpack.i.h.bf16 %v4126_v38  ;;  %v4127_v40 = vunpack.i.l.bf16 %v4126_v38 }
  0x89   : > { %v4667_v34 = vpack.c.bf16 %v4118_v32, %v4117_v33 }
  0x8a   : > { %v4680_v41 = vpack.c.bf16 %v4128_v39, %v4127_v40  ;;  %v4131_v42 = vpop.permute.xlu0 %4130  ;;  %v324_v40 = vlaneseq }
  0x8b   : > { %3661 = vmatprep.subr.msk.bf16.mxu0 %vm4655_vm1, %v4667_v34  ;;  %v4133_v43 = vunpack.i.h.bf16 %v4131_v42  ;;  %v4132_v44 = vunpack.i.l.bf16 %v4131_v42  ;;  %v4136_v46 = vpop.permute.xlu1 %4135 }
  0x8c   : > { %v4138_v47 = vunpack.i.h.bf16 %v4136_v46  ;;  %v4137_v48 = vunpack.i.l.bf16 %v4136_v46  ;;  %v325_v42 = vshrl.u32 %v324_v40, 7 }
  0x8d   : > { %v4688_v45 = vpack.c.bf16 %v4133_v43, %v4132_v44  ;;  %v333_v44 = vstv %s2769_s16  ;;  %s5771_s16 = scalar_lea.vmem %s5804_s5, %s4628_s11 }
  0x8e   : > { %v4696_v49 = vpack.c.bf16 %v4138_v47, %v4137_v48  ;;  %v4141_v50 = vpop.permute.xlu0 %4140  ;;  %v326_v43 = vadd.s32 8, %v325_v42  ;;  %v343_v47 = vand.u32 127, %v324_v40  ;;  %v334_v48 = vadd.s32 %v333_v44, %v325_v42 }
  0x8f   : > { %v4143_v51 = vunpack.i.h.bf16 %v4141_v50  ;;  %v4142_v52 = vunpack.i.l.bf16 %v4141_v50  ;;  %v4146_v54 = vpop.permute.xlu1 %4145  ;;  %v4499_v50 = vmov -1e+30   ;;  %v332_v40 = vadd.s32 56, %v325_v42 }
  0x90   : > { %3664 = vmatpush3.bf16.xpose.msk.msra.mxu0 %vm4655_vm1, %v4667_v34  ;;  %v4148_v55 = vunpack.i.h.bf16 %v4146_v54  ;;  %v4147_v56 = vunpack.i.l.bf16 %v4146_v54  ;;  %v335_v46 = vadd.s32 %v333_v44, %v326_v43  ;;  %vm344_vm3 = vcmp.le.s32.totalorder %v343_v47, %v334_v48 }
  0x91   : > { %3667 = vmatprep.subr.msk.bf16.mxu0 %vm4655_vm1, %v4672_v37  ;;  %v4704_v53 = vpack.c.bf16 %v4143_v51, %v4142_v52  ;;  %v4786_v52 = vsel %vm344_vm3, 0.0, %v4499_v50 }
  0x92   : > { %v4712_v57 = vpack.c.bf16 %v4148_v55, %v4147_v56  ;;  %v4151_v1 = vpop.permute.xlu0 %4150  ;;  %vm345_vm2 = vcmp.le.s32.totalorder %v343_v47, %v335_v46 }
  0x93   : > { %v4153_v2 = vunpack.i.h.bf16 %v4151_v1  ;;  %v4152_v5 = vunpack.i.l.bf16 %v4151_v1  ;;  %v4156_v8 = vpop.permute.xlu1 %4155  ;;  %v4784_v51 = vsel %vm345_vm2, 0.0, %v4499_v50 }
  0x94   : > { %v4158_v12 = vunpack.i.h.bf16 %v4156_v8  ;;  %v4157_v13 = vunpack.i.l.bf16 %v4156_v8 }
  0x95   : > { %v4758_v6 = vpack.c.bf16 %v4153_v2, %v4152_v5 }
  0x96   : > { %v4761_v14 = vpack.c.bf16 %v4158_v12, %v4157_v13  ;;  %v4161_v15 = vpop.permute.xlu0 %4160 }
  0x97   : > { %3702 = vmatprep.subr.bf16.mxu1 %v4758_v6  ;;  %v4171_v18 = vpop.permute.xlu1 %4170  ;;  %v4163_v19 = vunpack.i.h.bf16 %v4161_v15  ;;  %v4162_v20 = vunpack.i.l.bf16 %v4161_v15 }
  0x98   : > { %3670 = vmatpush3.bf16.xpose.msk.msra.mxu0 %vm4655_vm1, %v4672_v37  ;;  %3704 = vmatpush3.bf16.msra.mxu1 %v4758_v6  ;;  %v4173_v26 = vunpack.i.h.bf16 %v4171_v18  ;;  %v4172_v27 = vunpack.i.l.bf16 %v4171_v18  ;;  %v327_v18 = vadd.s32 16, %v325_v42 }
  0x99   : > { %3673 = vmatprep.subr.msk.bf16.mxu0 %vm4655_vm1, %v4680_v41  ;;  %3706 = vmatprep.subr.bf16.mxu1 %v4761_v14  ;;  %v4765_v21 = vpack.c.bf16 %v4163_v19, %v4162_v20  ;;  %v328_v19 = vadd.s32 24, %v325_v42 }
  0x9a   : > { %v4166_v25 = vpop.permute.xlu0 %4165  ;;  %v4772_v35 = vpack.c.bf16 %v4173_v26, %v4172_v27  ;;  %v336_v20 = vadd.s32 %v333_v44, %v327_v18  ;;  %v331_v27 = vadd.s32 48, %v325_v42 }
  0x9b   : > { %v4168_v30 = vunpack.i.h.bf16 %v4166_v25  ;;  %v4167_v31 = vunpack.i.l.bf16 %v4166_v25  ;;  %v4176_v32 = vpop.permute.xlu1 %4175  ;;  %v329_v25 = vadd.s32 32, %v325_v42  ;;  %v337_v26 = vadd.s32 %v333_v44, %v328_v19 }
  0x9c   : > { %3708 = vmatpush3.bf16.msra.mxu1 %v4761_v14  ;;  %v4178_v36 = vunpack.i.h.bf16 %v4176_v32  ;;  %v4177_v38 = vunpack.i.l.bf16 %v4176_v32  ;;  %vm346_vm4 = vcmp.le.s32.totalorder %v343_v47, %v336_v20  ;;  %v330_v32 = vadd.s32 40, %v325_v42 }
  0x9d   : > { %3710 = vmatprep.subr.bf16.mxu1 %v4765_v21  ;;  %v4769_v33 = vpack.c.bf16 %v4168_v30, %v4167_v31  ;;  %v338_v30 = vadd.s32 %v333_v44, %v329_v25  ;;  %vm347_vm5 = vcmp.le.s32.totalorder %v343_v47, %v337_v26  ;;  %v340_v31 = vadd.s32 %v333_v44, %v331_v27 }
  0x9e   : > { %v4776_v39 = vpack.c.bf16 %v4178_v36, %v4177_v38  ;;  %v4794_v36 = vsel %vm346_vm4, 0.0, %v4499_v50  ;;  %v4796_v38 = vsel %vm347_vm5, 0.0, %v4499_v50  ;;  %v339_v46 = vadd.s32 %v333_v44, %v330_v32 }
  0x9f   : > { %vm348_vm6 = vcmp.le.s32.totalorder %v343_v47, %v338_v30  ;;  %vm350_vm7 = vcmp.le.s32.totalorder %v343_v47, %v340_v31 }
  0xa0   : > { %3676 = vmatpush3.bf16.xpose.msk.msra.mxu0 %vm4655_vm1, %v4680_v41  ;;  %3712 = vmatpush3.bf16.msra.mxu1 %v4765_v21  ;;  %v4806_v18 = vsel %vm350_vm7, 0.0, %v4499_v50  ;;  %vm349_vm8 = vcmp.le.s32.totalorder %v343_v47, %v339_v46 }
  0xa1   : > { %3679 = vmatprep.subr.msk.bf16.mxu0 %vm4655_vm1, %v4688_v45  ;;  %3714 = vmatprep.subr.bf16.mxu1 %v4769_v33 }
  0xa4   : > { %3716 = vmatpush3.bf16.msra.mxu1 %v4769_v33 }
  0xa5   : > { %3718 = vmatprep.subr.bf16.mxu1 %v4772_v35 }
  0xa8   : > { %3682 = vmatpush3.bf16.xpose.msk.msra.mxu0 %vm4655_vm1, %v4688_v45  ;;  %3720 = vmatpush3.bf16.msra.mxu1 %v4772_v35 }
  0xa9   : > { %3685 = vmatprep.subr.msk.bf16.mxu0 %vm4655_vm1, %v4696_v49  ;;  %3722 = vmatprep.subr.bf16.mxu1 %v4776_v39 }
  0xac   : > { %3724 = vmatpush3.bf16.msra.mxu1 %v4776_v39 }
  0xb0   : > { %3688 = vmatpush3.bf16.xpose.msk.msra.mxu0 %vm4655_vm1, %v4696_v49 }
  0xb1   : > { %3691 = vmatprep.subr.msk.bf16.mxu0 %vm4655_vm1, %v4704_v53 }
  0xb8   : > { %3694 = vmatpush3.bf16.xpose.msk.msra.mxu0 %vm4655_vm1, %v4704_v53 }
  0xb9   : > { %3697 = vmatprep.subr.msk.bf16.mxu0 %vm4655_vm1, %v4712_v57 }
  0xc0   : > { %3700 = vmatpush3.bf16.xpose.msk.msra.mxu0 %vm4655_vm1, %v4712_v57 }
  0xc7   : > { %3222 = vmatmul.mubr.msk.f32.vlgmr.msra.gmra.mrb[0].mxu0 %vm408_vm0, %v4724_v58 }
  0xc8   : > { %3224 = vmatprep.mubr.msk.f32.mxu0 %vm408_vm0, %v4727_v59 }
  0xcb   : > { %3225 = vmatmul.mubr.msk.f32.gmra.mrb[2].mxu0 %vm408_vm0, %v4734_v60 }
  0xcc   : > { %3227 = vmatprep.mubr.msk.f32.mxu0 %vm408_vm0, %v4737_v61 }
  0xcf   : > { %3228 = vmatmul.mubr.msk.f32.gmra.mrb[4].mxu0 %vm408_vm0, %v4744_v62 }
  0xd0   : > { %3230 = vmatprep.mubr.msk.f32.mxu0 %vm408_vm0, %v4747_v63 }
  0xd3   : > { %3231 = vmatmul.mubr.msk.f32.gmra.mrb[6].mxu0 %vm408_vm0, %v4754_v0 }
 0x19a   : > { %v3223_v54 = vpop.f32.mrb[0].mxu0 }
 0x19b   : > { %v537_v55 = vadd.f32 %v3223_v54, %v4784_v51  ;;  %v531_v56 = vpop.f32.mrb[1].mxu0  ;;  %v4804_v54 = vsel %vm348_vm6, 0.0, %v4499_v50 }
 0x19c   : > { %v532_v1 = vadd.f32 %v531_v56, %v4786_v52  ;;  %v341_v56 = vadd.s32 %v333_v44, %v332_v40 }
 0x19d   : > { %572 = vmax.xlane.f32.xlu0 %v537_v55 }
 0x19e   : > { %570 = vmax.xlane.f32.xlu1 %v532_v1  ;;  %v3226_v2 = vpop.f32.mrb[2].mxu0  ;;  %vm351_vm9 = vcmp.le.s32.totalorder %v343_v47, %v341_v56 }
 0x19f   : > { %v541_v5 = vpop.f32.mrb[3].mxu0  ;;  %v4802_v48 = vadd.f32 %v3226_v2, %v4796_v38  ;;  %v4819_v2 = vsel %vm351_vm9, 0.0, %v4499_v50 }
 0x1a0   : > { %v4799_v43 = vadd.f32 %v541_v5, %v4794_v36  ;;  %v4816_v5 = vsel %vm349_vm8, 0.0, %v4499_v50 }
 0x1a2   : > { %v3229_v8 = vpop.f32.mrb[4].mxu0 }
 0x1a3   : > { %v551_v12 = vpop.f32.mrb[5].mxu0  ;;  %v4823_v44 = vadd.f32 %v3229_v8, %v4816_v5 }
 0x1a4   : > { %v4809_v19 = vadd.f32 %v551_v12, %v4804_v54 }
 0x1a6   : > { %v3232_v13 = vpop.f32.mrb[6].mxu0 }
 0x1a7   : > { %v561_v15 = vpop.f32.mrb[7].mxu0  ;;  %v4826_v12 = vadd.f32 %v3232_v13, %v4819_v2 }
 0x1a8   : > { %v4814_v42 = vadd.f32 %v561_v15, %v4806_v18 }
 0x1af   : > { %4185 = vrot.lane.b32.xlu1 %v4622_v23, %s4498_s15 }
 0x1b3   : > { %4180 = vrot.lane.b32.xlu0 %v4619_v22, %s4498_s15 }
 0x1d2   : > { %574 = vmax.xlane.f32.xlu0 %v4799_v43 }
 0x1d3   : > { %576 = vmax.xlane.f32.xlu1 %v4802_v48 }
 0x1d6   : > { %578 = vmax.xlane.f32.xlu0 %v4809_v19 }
 0x1d7   : > { %582 = vmax.xlane.f32.xlu1 %v4814_v42 }
 0x1da   : > { %580 = vmax.xlane.f32.xlu0 %v4823_v44 }
 0x1de   : > { %584 = vmax.xlane.f32.xlu0 %v4826_v12 }
 0x1e8   : > { %795 = vrot.lane.b32.xlu1 %v4637_v24, %s4500_s22 }
 0x1ec   : > { %799 = vrot.lane.b32.xlu1 %v4727_v59, %s4500_s22 }
 0x1f0   : > { %801 = vrot.lane.b32.xlu1 %v4734_v60, %s4500_s22 }
 0x1f4   : > { %797 = vrot.lane.b32.xlu0 %v4724_v58, %s4500_s22  ;;  %805 = vrot.lane.b32.xlu1 %v4744_v62, %s4500_s22 }
 0x1f8   : > { %803 = vrot.lane.b32.xlu0 %v4737_v61, %s4500_s22  ;;  %809 = vrot.lane.b32.xlu1 %v4754_v0, %s4500_s22 }
 0x1fc   : > { %807 = vrot.lane.b32.xlu0 %v4747_v63, %s4500_s22  ;;  %4195 = vrot.lane.b32.xlu1 %v4582_v10, %s4501_s17 }
 0x200   : > { %4190 = vrot.lane.b32.xlu0 %v4557_v3, %s4501_s17 }
 0x204   : > { %4200 = vrot.lane.b32.xlu0 %v4570_v7, %s4501_s17 }
 0x208   : > { %4205 = vrot.lane.b32.xlu0 %v4586_v11, %s4501_s17 }
 0x22a   : > { %v573_v47 = vpop.xlane.xlu0 %572 }
 0x22b   : > { %v587_v50 = vsub.f32 %v537_v55, %v573_v47  ;;  %v571_v8 = vpop.xlane.xlu1 %570 }
 0x22c   : > { %v586_v13 = vsub.f32 %v532_v1, %v571_v8 }
 0x22d   : > { %v596_v15 = vmul.f32 1.442695, %v587_v50 }
 0x22e   : > { %v594_v20 = vmul.f32 1.442695, %v586_v13  ;;  %v4181_v25 = vpop.permute.xlu0 %4180 }
 0x22f   : > { %v4183_v26 = vunpack.i.h.bf16 %v4181_v25  ;;  %v4182_v27 = vunpack.i.l.bf16 %v4181_v25  ;;  %v4186_v30 = vpop.permute.xlu1 %4185 }
 0x230   : > { %4329 = vpow2.f32 %v594_v20  ;;  %v4188_v31 = vunpack.i.h.bf16 %v4186_v30  ;;  %v4187_v32 = vunpack.i.l.bf16 %v4186_v30 }
 0x231   : > { %4331 = vpow2.f32 %v596_v15  ;;  %v4846_v40 = vpack.c.bf16 %v4183_v26, %v4182_v27 }
 0x232   : > { %v4848_v46 = vpack.c.bf16 %v4188_v31, %v4187_v32 }
 0x233   : > { %3726 = vmatprep.subr.bf16.mxu1 %v4846_v40 }
 0x234   : > { %3728 = vmatpush3.bf16.msra.mxu1 %v4846_v40 }
 0x235   : > { %3730 = vmatprep.subr.bf16.mxu1 %v4848_v46 }
 0x238   : > { %3732 = vmatpush3.bf16.msra.mxu1 %v4848_v46 }
 0x239   : > { %3735 = vmatprep.subr.msk.bf16.mxu1 %vm4655_vm1, %v4659_v29 }
 0x23a   : > { %v4857_v55 = vpop.eup %4329 }
 0x23b   : > { %v4859_v1 = vpop.eup %4331  ;;  %3265 = vmatprep.mubr.f32.mxu1 %v4857_v55 }
 0x23c   : > { %3266 = vmatmul.mubr.f32.vlgmr.msra.gmra.mrb[0].mxu1 %v4859_v1 }
 0x241   : > { %3738 = vmatpush3.bf16.xpose.msk.msra.mxu1 %vm4655_vm1, %v4659_v29 }
 0x242   : > { %3741 = vmatprep.subr.msk.bf16.mxu1 %vm4655_vm1, %v4667_v34 }
 0x249   : > { %3744 = vmatpush3.bf16.xpose.msk.msra.mxu1 %vm4655_vm1, %v4667_v34 }
 0x24a   : > { %3747 = vmatprep.subr.msk.bf16.mxu1 %vm4655_vm1, %v4672_v37 }
 0x251   : > { %3750 = vmatpush3.bf16.xpose.msk.msra.mxu1 %vm4655_vm1, %v4672_v37 }
 0x252   : > { %3753 = vmatprep.subr.msk.bf16.mxu1 %vm4655_vm1, %v4680_v41 }
 0x259   : > { %3756 = vmatpush3.bf16.xpose.msk.msra.mxu1 %vm4655_vm1, %v4680_v41 }
 0x25a   : > { %3759 = vmatprep.subr.msk.bf16.mxu1 %vm4655_vm1, %v4688_v45 }
 0x25f   : > { %v575_v29 = vpop.xlane.xlu0 %574 }
 0x260   : > { %v588_v34 = vsub.f32 %v4799_v43, %v575_v29  ;;  %v577_v56 = vpop.xlane.xlu1 %576 }
 0x261   : > { %v589_v47 = vsub.f32 %v4802_v48, %v577_v56  ;;  %3762 = vmatpush3.bf16.xpose.msk.msra.mxu1 %vm4655_vm1, %v4688_v45 }
 0x262   : > { %v598_v37 = vmul.f32 1.442695, %v588_v34  ;;  %3765 = vmatprep.subr.msk.bf16.mxu1 %vm4655_vm1, %v4696_v49 }
 0x263   : > { %v600_v41 = vmul.f32 1.442695, %v589_v47  ;;  %v579_v50 = vpop.xlane.xlu0 %578 }
 0x264   : > { %4333 = vpow2.f32 %v598_v37  ;;  %v590_v8 = vsub.f32 %v4809_v19, %v579_v50  ;;  %v583_v13 = vpop.xlane.xlu1 %582 }
 0x265   : > { %4335 = vpow2.f32 %v600_v41  ;;  %v592_v43 = vsub.f32 %v4814_v42, %v583_v13 }
 0x266   : > { %v602_v15 = vmul.f32 1.442695, %v590_v8 }
 0x267   : > { %v581_v48 = vpop.xlane.xlu0 %580  ;;  %v606_v45 = vmul.f32 1.442695, %v592_v43 }
 0x268   : > { %4337 = vpow2.f32 %v602_v15  ;;  %v591_v20 = vsub.f32 %v4823_v44, %v581_v48  ;;  %v796_v31 = vpop.permute.xlu1 %795 }
 0x269   : > { %3768 = vmatpush3.bf16.xpose.msk.msra.mxu1 %vm4655_vm1, %v4696_v49 }
 0x26a   : > { %v604_v25 = vmul.f32 1.442695, %v591_v20  ;;  %3771 = vmatprep.subr.msk.bf16.mxu1 %vm4655_vm1, %v4704_v53 }
 0x26b   : > { %v585_v19 = vpop.xlane.xlu0 %584 }
 0x26c   : > { %4339 = vpow2.f32 %v604_v25  ;;  %v593_v26 = vsub.f32 %v4826_v12, %v585_v19  ;;  %v800_v32 = vpop.permute.xlu1 %799 }
 0x26d   : > { %4341 = vpow2.f32 %v606_v45 }
 0x26e   : > { %v4905_v42 = vpop.eup %4333  ;;  %v608_v27 = vmul.f32 1.442695, %v593_v26 }
 0x26f   : > { %v4907_v30 = vpop.eup %4335  ;;  %3268 = vmatprep.mubr.f32.mxu1 %v4905_v42  ;;  %v798_v29 = vpop.permute.xlu0 %797 }
 0x270   : > { %4343 = vpow2.f32 %v608_v27  ;;  %3269 = vmatmul.mubr.f32.gmra.mrb[2].mxu1 %v4907_v30  ;;  %v802_v34 = vpop.permute.xlu1 %801 }
 0x271   : > { %3774 = vmatpush3.bf16.xpose.msk.msra.mxu1 %vm4655_vm1, %v4704_v53 }
 0x272   : > { %v4914_v49 = vpop.eup %4337  ;;  %3777 = vmatprep.subr.msk.bf16.mxu1 %vm4655_vm1, %v4712_v57 }
 0x273   : > { %3271 = vmatprep.mubr.f32.mxu1 %v4914_v49 }
 0x274   : > { %v806_v56 = vpop.permute.xlu1 %805 }
 0x276   : > { %v4920_v44 = vpop.eup %4339 }
 0x277   : > { %v4922_v12 = vpop.eup %4341  ;;  %3272 = vmatmul.mubr.f32.gmra.mrb[4].mxu1 %v4920_v44 }
 0x278   : > { %3274 = vmatprep.mubr.f32.mxu1 %v4922_v12 }
 0x279   : > { %3780 = vmatpush3.bf16.xpose.msk.msra.mxu1 %vm4655_vm1, %v4712_v57  ;;  %v804_v57 = vpop.permute.xlu0 %803 }
 0x27a   : > { %v4929_v53 = vpop.eup %4343  ;;  %3782 = vmatprep.subr.bf16.mxu1 %v4758_v6 }
 0x27b   : > { %3275 = vmatmul.mubr.f32.gmra.mrb[6].mxu1 %v4929_v53 }
 0x27c   : > { %3309 = vmatprep.mubr.msk.f32.mxu1 %vm408_vm0, %v796_v31  ;;  %v5032_v31 = vld [vmem:[%s5802_s3 + $0x10] sm:$0xff] }
 0x27d   : > { %v808_v47 = vpop.permute.xlu0 %807 }
 0x280   : > { %3310 = vmatmul.mubr.msk.f32.vlgmr.msra.gmra.mrb[8].mxu1 %vm408_vm0, %v798_v29 }
 0x281   : > { %3784 = vmatpush3.bf16.msra.mxu1 %v4758_v6  ;;  %3312 = vmatprep.mubr.msk.f32.mxu1 %vm408_vm0, %v800_v32  ;;  %v810_v6 = vpop.permute.xlu1 %809  ;;  %v5037_v32 = vld [vmem:[%s5802_s3 + $0x18] sm:$0xff] }
 0x282   : > { %3786 = vmatprep.subr.bf16.mxu1 %v4761_v14  ;;  %v5043_v29 = vpack.i.bf16 %v5037_v32, %v5032_v31 }
 0x284   : > { %3313 = vmatmul.mubr.msk.f32.gmra.mrb[10].mxu1 %vm408_vm0, %v802_v34  ;;  %5812 = vst [vmem:[#allocation2_spill] sm:$0xff] %v5043_v29 }
 0x285   : > { %3788 = vmatpush3.bf16.msra.mxu1 %v4761_v14  ;;  %3315 = vmatprep.mubr.msk.f32.mxu1 %vm408_vm0, %v804_v57 }
 0x286   : > { %3790 = vmatprep.subr.bf16.mxu1 %v4765_v21 }
 0x288   : > { %3316 = vmatmul.mubr.msk.f32.gmra.mrb[12].mxu1 %vm408_vm0, %v806_v56 }
 0x289   : > { %3792 = vmatpush3.bf16.msra.mxu1 %v4765_v21  ;;  %3318 = vmatprep.mubr.msk.f32.mxu1 %vm408_vm0, %v808_v47 }
 0x28a   : > { %3794 = vmatprep.subr.bf16.mxu1 %v4769_v33 }
 0x28c   : > { %3319 = vmatmul.mubr.msk.f32.gmra.mrb[14].mxu1 %vm408_vm0, %v810_v6  ;;  %v4196_v6 = vpop.permute.xlu1 %4195 }
 0x28d   : > { %3796 = vmatpush3.bf16.msra.mxu1 %v4769_v33  ;;  %v4191_v33 = vpop.permute.xlu0 %4190 }
 0x28e   : > { %3798 = vmatprep.subr.bf16.mxu1 %v4772_v35  ;;  %v4192_v7 = vunpack.i.l.bf16 %v4191_v33 }
 0x291   : > { %3800 = vmatpush3.bf16.msra.mxu1 %v4772_v35  ;;  %v4193_v35 = vunpack.i.h.bf16 %v4191_v33  ;;  %v4201_v47 = vpop.permute.xlu0 %4200 }
 0x292   : > { %3802 = vmatprep.subr.bf16.mxu1 %v4776_v39 }
 0x293   : > { %v4976_v37 = vpack.c.bf16 %v4193_v35, %v4192_v7  ;;  %v5069_v35 = vld [vmem:[%s5802_s3 + $0x20] sm:$0xff]  ;;  %v5074_v7 = vld [vmem:[%s5802_s3 + $0x28] sm:$0xff] }
 0x295   : > { %3804 = vmatpush3.bf16.msra.mxu1 %v4776_v39  ;;  %v4206_v33 = vpop.permute.xlu0 %4205 }
 0x296   : > { %3806 = vmatprep.subr.bf16.mxu1 %v4846_v40 }
 0x299   : > { %3808 = vmatpush3.bf16.msra.mxu1 %v4846_v40 }
 0x29a   : > { %3810 = vmatprep.subr.bf16.mxu1 %v4848_v46 }
 0x29d   : > { %3812 = vmatpush3.bf16.msra.mxu1 %v4848_v46 }
 0x29e   : > { %3863 = vmatprep.subr.msk.bf16.mxu1 %vm4655_vm1, %v4976_v37 }
 0x30f   : > { %v4964_v3 = vpop.f32.mrb[0].mxu1 }
 0x310   : > { %v4966_v14 = vpop.f32.mrb[1].mxu1 }
 0x343   : > { %v4968_v10 = vpop.f32.mrb[2].mxu1 }
 0x344   : > { %v4970_v21 = vpop.f32.mrb[3].mxu1 }
 0x34a   : > { %v4972_v39 = vpop.f32.mrb[4].mxu1 }
 0x34b   : > { %v4974_v40 = vpop.f32.mrb[5].mxu1 }
 0x34e   : > { %v4981_v11 = vpop.f32.mrb[6].mxu1 }
 0x34f   : > { %v4983_v46 = vpop.f32.mrb[7].mxu1 }
 0x353   : > { %v3311_v41 = vpop.f32.mrb[8].mxu1 }
 0x354   : > { %v899_v50 = vadd.f32 %v3311_v41, %v4784_v51  ;;  %v893_v8 = vpop.f32.mrb[9].mxu1 }
 0x355   : > { %v894_v13 = vadd.f32 %v893_v8, %v4786_v52 }
 0x356   : > { %934 = vmax.xlane.f32.xlu1 %v899_v50 }
 0x357   : > { %932 = vmax.xlane.f32.xlu0 %v894_v13  ;;  %v3314_v43 = vpop.f32.mrb[10].mxu1 }
 0x358   : > { %v903_v15 = vpop.f32.mrb[11].mxu1  ;;  %v4995_v26 = vadd.f32 %v3314_v43, %v4796_v38 }
 0x359   : > { %v4992_v19 = vadd.f32 %v903_v15, %v4794_v36 }
 0x35b   : > { %v3317_v48 = vpop.f32.mrb[12].mxu1 }
 0x35c   : > { %v913_v20 = vpop.f32.mrb[13].mxu1  ;;  %v5000_v27 = vadd.f32 %v3317_v48, %v4816_v5 }
 0x35d   : > { %v5046_v34 = vadd.f32 %v913_v20, %v4804_v54  ;;  %v5085_v20 = vld [vmem:[%s5802_s3 + $0x30] sm:$0xff] }
 0x35f   : > { %v3320_v45 = vpop.f32.mrb[14].mxu1 }
 0x360   : > { %v923_v25 = vpop.f32.mrb[15].mxu1  ;;  %v5051_v57 = vadd.f32 %v3320_v45, %v4819_v2  ;;  %v5090_v45 = vld [vmem:[%s5802_s3 + $0x38] sm:$0xff] }
 0x361   : > { %v5056_v56 = vadd.f32 %v923_v25, %v4806_v18  ;;  %v4198_v25 = vunpack.i.h.bf16 %v4196_v6 }
 0x367   : > { %4215 = vrot.lane.b32.xlu1 %v4604_v17, %s4501_s17  ;;  %v5016_v17 = vld [vmem:[%s5802_s3] sm:$0xff] }
 0x36d   : > { %4210 = vrot.lane.b32.xlu0 %v4601_v16, %s4501_s17 }
 0x38b   : > { %936 = vmax.xlane.f32.xlu1 %v4992_v19 }
 0x38c   : > { %938 = vmax.xlane.f32.xlu0 %v4995_v26 }
 0x390   : > { %942 = vmax.xlane.f32.xlu0 %v5000_v27 }
 0x39c   : > { %4225 = vrot.lane.b32.xlu1 %v4622_v23, %s4501_s17  ;;  %v5021_v23 = vld [vmem:[%s5802_s3 + $0x8] sm:$0xff] }
 0x3a6   : > { %4220 = vrot.lane.b32.xlu0 %v4619_v22, %s4501_s17  ;;  %v5027_v22 = vpack.i.bf16 %v5021_v23, %v5016_v17 }
 0x3aa   : > { %1423 = vrot.lane.b32.xlu0 %v4637_v24, %s4502_s18 }
 0x3ae   : > { %1427 = vrot.lane.b32.xlu0 %v4727_v59, %s4502_s18 }
 0x3b2   : > { %1431 = vrot.lane.b32.xlu0 %v4737_v61, %s4502_s18 }
 0x3b6   : > { %1435 = vrot.lane.b32.xlu0 %v4747_v63, %s4502_s18 }
 0x3ba   : > { %4230 = vrot.lane.b32.xlu0 %v5027_v22, %s4500_s22 }
 0x3be   : > { %4235 = vrot.lane.b32.xlu0 %v5043_v29, %s4500_s22 }
 0x3c0   : > { %940 = vmax.xlane.f32.xlu1 %v5046_v34 }
 0x3c4   : > { %946 = vmax.xlane.f32.xlu1 %v5051_v57 }
 0x3c8   : > { %944 = vmax.xlane.f32.xlu1 %v5056_v56 }
 0x3d9   : > { %1425 = vrot.lane.b32.xlu1 %v4724_v58, %s4502_s18 }
 0x3dd   : > { %1429 = vrot.lane.b32.xlu1 %v4734_v60, %s4502_s18  ;;  %612 = vadd.xlane.f32.xlu0 %v4859_v1  ;;  %v5080_v1 = vpack.i.bf16 %v5074_v7, %v5069_v35 }
 0x3df   : > { %5813 = vst [vmem:[#allocation3_spill] sm:$0xff] %v5080_v1 }
 0x3e1   : > { %1433 = vrot.lane.b32.xlu1 %v4744_v62, %s4502_s18 }
 0x3e3   : > { %v935_v41 = vpop.xlane.xlu1 %934 }
 0x3e4   : > { %v949_v8 = vsub.f32 %v899_v50, %v935_v41  ;;  %v933_v43 = vpop.xlane.xlu0 %932  ;;  %v4197_v41 = vunpack.i.l.bf16 %v4196_v6  ;;  %v4203_v6 = vunpack.i.h.bf16 %v4201_v47 }
 0x3e5   : > { %v948_v15 = vsub.f32 %v894_v13, %v933_v43  ;;  %1437 = vrot.lane.b32.xlu1 %v4754_v0, %s4502_s18  ;;  %v5096_v13 = vpack.i.bf16 %v5090_v45, %v5085_v20 }
 0x3e6   : > { %v958_v48 = vmul.f32 1.442695, %v949_v8 }
 0x3e7   : > { %v956_v50 = vmul.f32 1.442695, %v948_v15  ;;  %5814 = vst [vmem:[#allocation4_spill] sm:$0xff] %v5096_v13  ;;  %v5105_v15 = vpack.c.bf16 %v4198_v25, %v4197_v41  ;;  %v4207_v25 = vunpack.i.l.bf16 %v4206_v33 }
 0x3e8   : > { %v4211_v41 = vpop.permute.xlu0 %4210 }
 0x3e9   : > { %4345 = vpow2.f32 %v956_v50  ;;  %4240 = vrot.lane.b32.xlu1 %v5080_v1, %s4500_s22  ;;  %v4208_v50 = vunpack.i.h.bf16 %v4206_v33 }
 0x3ea   : > { %4347 = vpow2.f32 %v958_v48  ;;  %v4202_v48 = vunpack.i.l.bf16 %v4201_v47 }
 0x3eb   : > { %v5125_v1 = vpack.c.bf16 %v4208_v50, %v4207_v25 }
 0x3ed   : > { %4245 = vrot.lane.b32.xlu1 %v5096_v13, %s4500_s22  ;;  %s4504_s22 = smov 16  }
 0x3f3   : > { %v5100_v8 = vpop.eup %4345  ;;  %2020 = vrot.lane.b32.xlu0 %v4724_v58, %s4503_s14  ;;  %v5117_v58 = vpack.c.bf16 %v4203_v6, %v4202_v48  ;;  %v4216_v6 = vpop.permute.xlu1 %4215 }
 0x3f4   : > { %v4348_v43 = vpop.eup %4347  ;;  %3353 = vmatprep.mubr.f32.mxu1 %v5100_v8  ;;  %v4218_v33 = vunpack.i.h.bf16 %v4216_v6  ;;  %v4217_v48 = vunpack.i.l.bf16 %v4216_v6 }
 0x3f5   : > { %3354 = vmatmul.mubr.f32.vlgmr.msra.gmra.mrb[16].mxu1 %v4348_v43 }
 0x3f6   : > { %3866 = vmatpush3.bf16.xpose.msk.msra.mxu1 %vm4655_vm1, %v4976_v37  ;;  %v5142_v50 = vpack.c.bf16 %v4218_v33, %v4217_v48 }
 0x3f7   : > { %3869 = vmatprep.subr.msk.bf16.mxu1 %vm4655_vm1, %v5105_v15  ;;  %2026 = vrot.lane.b32.xlu0 %v4737_v61, %s4503_s14  ;;  %v4213_v61 = vunpack.i.h.bf16 %v4211_v41 }
 0x3fb   : > { %2030 = vrot.lane.b32.xlu0 %v4747_v63, %s4503_s14  ;;  %v4212_v63 = vunpack.i.l.bf16 %v4211_v41 }
 0x3fd   : > { %v5133_v47 = vpack.c.bf16 %v4213_v61, %v4212_v63 }
 0x3fe   : > { %3872 = vmatpush3.bf16.xpose.msk.msra.mxu1 %vm4655_vm1, %v5105_v15 }
 0x3ff   : > { %3875 = vmatprep.subr.msk.bf16.mxu1 %vm4655_vm1, %v5117_v58 }
 0x406   : > { %3878 = vmatpush3.bf16.xpose.msk.msra.mxu1 %vm4655_vm1, %v5117_v58 }
 0x407   : > { %3881 = vmatprep.subr.msk.bf16.mxu1 %vm4655_vm1, %v5125_v1 }
 0x40e   : > { %3884 = vmatpush3.bf16.xpose.msk.msra.mxu1 %vm4655_vm1, %v5125_v1 }
 0x40f   : > { %3887 = vmatprep.subr.msk.bf16.mxu1 %vm4655_vm1, %v5133_v47 }
 0x411   : > { %610 = vadd.xlane.f32.xlu1 %v4857_v55 }
 0x416   : > { %3890 = vmatpush3.bf16.xpose.msk.msra.mxu1 %vm4655_vm1, %v5133_v47 }
 0x417   : > { %3893 = vmatprep.subr.msk.bf16.mxu1 %vm4655_vm1, %v5142_v50 }
 0x418   : > { %v937_v25 = vpop.xlane.xlu1 %936 }
 0x419   : > { %v950_v41 = vsub.f32 %v4992_v19, %v937_v25  ;;  %v939_v61 = vpop.xlane.xlu0 %938 }
 0x41a   : > { %v951_v63 = vsub.f32 %v4995_v26, %v939_v61  ;;  %614 = vadd.xlane.f32.xlu0 %v4905_v42 }
 0x41b   : > { %v960_v6 = vmul.f32 1.442695, %v950_v41 }
 0x41c   : > { %v962_v55 = vmul.f32 1.442695, %v951_v63  ;;  %v4226_v48 = vpop.permute.xlu1 %4225 }
 0x41d   : > { %4349 = vpow2.f32 %v960_v6  ;;  %v943_v33 = vpop.xlane.xlu0 %942  ;;  %v4228_v42 = vunpack.i.h.bf16 %v4226_v48  ;;  %v4227_v26 = vunpack.i.l.bf16 %v4226_v48  ;;  %v4474_v48 = vld [vmem:[%s5800_s1 + $0x20] sm:$0xff] }
 0x41e   : > { %4351 = vpow2.f32 %v962_v55  ;;  %3896 = vmatpush3.bf16.xpose.msk.msra.mxu1 %vm4655_vm1, %v5142_v50  ;;  %618 = vadd.xlane.f32.xlu0 %v4914_v49 }
 0x41f   : > { %v5168_v61 = vpack.c.bf16 %v4228_v42, %v4227_v26 }
 0x421   : > { %v4221_v13 = vpop.permute.xlu0 %4220 }
 0x422   : > { %v4223_v29 = vunpack.i.h.bf16 %v4221_v13  ;;  %v4222_v19 = vunpack.i.l.bf16 %v4221_v13  ;;  %2018 = vrot.lane.b32.xlu1 %v4637_v24, %s4503_s14  ;;  %620 = vadd.xlane.f32.xlu0 %v4920_v44 }
 0x424   : > { %v5160_v25 = vpack.c.bf16 %v4223_v29, %v4222_v19  ;;  %v4475_v19 = vld [vmem:[%s5800_s1 + $0x28] sm:$0xff] }
 0x425   : > { %v5162_v41 = vpop.permute.xlu0 %1423  ;;  %v4259_v42 = vpack.i.bf16 %v4475_v19, %v4474_v48 }
 0x426   : > { %2022 = vrot.lane.b32.xlu1 %v4727_v59, %s4503_s14  ;;  %974 = vadd.xlane.f32.xlu0 %v4348_v43 }
 0x427   : > { %v5166_v49 = vpop.eup %4349  ;;  %3899 = vmatprep.subr.msk.bf16.mxu1 %vm4655_vm1, %v5160_v25 }
 0x428   : > { %v5173_v24 = vpop.eup %4351  ;;  %3902 = vmatpush3.bf16.xpose.msk.msra.mxu1 %vm4655_vm1, %v5160_v25  ;;  %3356 = vmatprep.mubr.f32.mxu1 %v5166_v49 }
 0x429   : > { %3905 = vmatprep.subr.msk.bf16.mxu1 %vm4655_vm1, %v5168_v61  ;;  %3357 = vmatmul.mubr.f32.gmra.mrb[18].mxu1 %v5173_v24  ;;  %v5183_v59 = vpop.permute.xlu0 %1427 }
 0x42a   : > { %2024 = vrot.lane.b32.xlu1 %v4734_v60, %s4503_s14  ;;  %622 = vadd.xlane.f32.xlu0 %v4922_v12 }
 0x42d   : > { %v5188_v44 = vpop.permute.xlu0 %1431 }
 0x42e   : > { %2028 = vrot.lane.b32.xlu1 %v4744_v62, %s4503_s14  ;;  %624 = vadd.xlane.f32.xlu0 %v4929_v53 }
 0x430   : > { %3908 = vmatpush3.bf16.xpose.msk.msra.mxu1 %vm4655_vm1, %v5168_v61 }
 0x431   : > { %3967 = vmatprep.subr.msk.bf16.mxu1 %vm4655_vm1, %v4976_v37  ;;  %v5199_v29 = vpop.permute.xlu0 %1435 }
 0x432   : > { %2032 = vrot.lane.b32.xlu1 %v4754_v0, %s4503_s14  ;;  %v4473_v0 = vld [vmem:[%s5800_s1 + $0x10] sm:$0xff] }
 0x433   : > { %v4254_v55 = vpack.i.bf16 %v4562_v4, %v4473_v0  ;;  %v4476_v4 = vld [vmem:[%s5800_s1 + $0x30] sm:$0xff] }
 0x434   : > { %v4264_v26 = vpack.i.bf16 %v4578_v9, %v4476_v4  ;;  %v4478_v9 = vld [vmem:[%s5800_s1 + $0x58] sm:$0xff] }
 0x435   : > { %v4231_v60 = vpop.permute.xlu0 %4230 }
 0x436   : > { %v4233_v12 = vunpack.i.h.bf16 %v4231_v60  ;;  %v4232_v13 = vunpack.i.l.bf16 %v4231_v60  ;;  %v953_v60 = vsub.f32 %v5000_v27, %v943_v33 }
 0x438   : > { %v3813_v43 = vpack.c.bf16 %v4233_v12, %v4232_v13 }
 0x439   : > { %v4236_v62 = vpop.permute.xlu0 %4235 }
 0x43a   : > { %v4238_v63 = vunpack.i.h.bf16 %v4236_v62  ;;  %v4237_v53 = vunpack.i.l.bf16 %v4236_v62  ;;  %3815 = vmatprep.subr.msk.bf16.mxu0 %vm4655_vm1, %v3813_v43 }
 0x43b   : > { %3818 = vmatpush3.bf16.xpose.msk.msra.mxu0 %vm4655_vm1, %v3813_v43  ;;  %v966_v43 = vmul.f32 1.442695, %v953_v60 }
 0x43c   : > { %v3819_v6 = vpack.c.bf16 %v4238_v63, %v4237_v53  ;;  %v4477_v63 = vld [vmem:[%s5800_s1 + $0x50] sm:$0xff] }
 0x43d   : > { %v4274_v53 = vpack.i.bf16 %v4478_v9, %v4477_v63 }
 0x43e   : > { %3821 = vmatprep.subr.msk.bf16.mxu0 %vm4655_vm1, %v3819_v6 }
 0x443   : > { %3824 = vmatpush3.bf16.xpose.msk.msra.mxu0 %vm4655_vm1, %v3819_v6 }
 0x444   : > { %4255 = vrot.lane.b32.xlu0 %v4254_v55, %s4504_s22 }
 0x448   : > { %4260 = vrot.lane.b32.xlu0 %v4259_v42, %s4504_s22 }
 0x44c   : > { %4265 = vrot.lane.b32.xlu0 %v4264_v26, %s4504_s22 }
 0x44d   : > { %v941_v12 = vpop.xlane.xlu1 %940 }
 0x44e   : > { %v952_v13 = vsub.f32 %v5046_v34, %v941_v12 }
 0x450   : > { %v964_v62 = vmul.f32 1.442695, %v952_v13  ;;  %4270 = vrot.lane.b32.xlu0 %v4601_v16, %s4504_s22 }
 0x451   : > { %v947_v27 = vpop.xlane.xlu1 %946 }
 0x452   : > { %4353 = vpow2.f32 %v964_v62  ;;  %v955_v33 = vsub.f32 %v5051_v57, %v947_v27 }
 0x453   : > { %4355 = vpow2.f32 %v966_v43 }
 0x454   : > { %4275 = vrot.lane.b32.xlu0 %v4274_v53, %s4504_s22  ;;  %v970_v16 = vmul.f32 1.442695, %v955_v33 }
 0x455   : > { %v945_v34 = vpop.xlane.xlu1 %944 }
 0x456   : > { %v954_v6 = vsub.f32 %v5056_v56, %v945_v34  ;;  %616 = vadd.xlane.f32.xlu1 %v4907_v30  ;;  %v4479_v30 = vld [vmem:[%s5800_s1] sm:$0xff]  ;;  %v4480_v56 = vld [vmem:[%s5800_s1 + $0x8] sm:$0xff] }
 0x458   : > { %v968_v0 = vmul.f32 1.442695, %v954_v6 }
 0x459   : > { %v1426_v55 = vpop.permute.xlu1 %1425 }
 0x45a   : > { %4357 = vpow2.f32 %v968_v0  ;;  %972 = vadd.xlane.f32.xlu1 %v5100_v8  ;;  %v4249_v8 = vpack.i.bf16 %v4480_v56, %v4479_v30 }
 0x45b   : > { %4359 = vpow2.f32 %v970_v16 }
 0x45c   : > { %v4354_v48 = vpop.eup %4353 }
 0x45d   : > { %v4356_v19 = vpop.eup %4355  ;;  %3359 = vmatprep.mubr.f32.mxu1 %v4354_v48  ;;  %v1430_v42 = vpop.permute.xlu1 %1429 }
 0x45e   : > { %3360 = vmatmul.mubr.f32.gmra.mrb[20].mxu1 %v4356_v19 }
 0x461   : > { %v1434_v57 = vpop.permute.xlu1 %1433 }
 0x464   : > { %v4358_v4 = vpop.eup %4357 }
 0x465   : > { %v4360_v26 = vpop.eup %4359  ;;  %3362 = vmatprep.mubr.f32.mxu1 %v4358_v4  ;;  %v1438_v60 = vpop.permute.xlu1 %1437 }
 0x466   : > { %3363 = vmatmul.mubr.f32.gmra.mrb[22].mxu1 %v4360_v26 }
 0x467   : > { %3453 = vmatprep.mubr.msk.f32.mxu1 %vm408_vm0, %v5162_v41 }
 0x469   : > { %v4241_v12 = vpop.permute.xlu1 %4240 }
 0x46a   : > { %3454 = vmatmul.mubr.msk.f32.vlgmr.msra.gmra.mrb[24].mxu1 %vm408_vm0, %v1426_v55  ;;  %v4243_v13 = vunpack.i.h.bf16 %v4241_v12  ;;  %v4242_v43 = vunpack.i.l.bf16 %v4241_v12 }
 0x46b   : > { %3970 = vmatpush3.bf16.xpose.msk.msra.mxu1 %vm4655_vm1, %v4976_v37  ;;  %4250 = vrot.lane.b32.xlu1 %v4249_v8, %s4504_s22 }
 0x46c   : > { %3973 = vmatprep.subr.msk.bf16.mxu1 %vm4655_vm1, %v5105_v15  ;;  %3456 = vmatprep.mubr.msk.f32.mxu1 %vm408_vm0, %v5183_v59  ;;  %v3825_v41 = vpack.c.bf16 %v4243_v13, %v4242_v43 }
 0x46d   : > { %v4246_v62 = vpop.permute.xlu1 %4245 }
 0x46e   : > { %3457 = vmatmul.mubr.msk.f32.gmra.mrb[26].mxu1 %vm408_vm0, %v1430_v42  ;;  %v4248_v63 = vunpack.i.h.bf16 %v4246_v62  ;;  %v4247_v9 = vunpack.i.l.bf16 %v4246_v62  ;;  %3827 = vmatprep.subr.msk.bf16.mxu0 %vm4655_vm1, %v3825_v41 }
 0x46f   : > { %3459 = vmatprep.mubr.msk.f32.mxu1 %vm408_vm0, %v5188_v44  ;;  %3830 = vmatpush3.bf16.xpose.msk.msra.mxu0 %vm4655_vm1, %v3825_v41 }
 0x470   : > { %v3831_v37 = vpack.c.bf16 %v4248_v63, %v4247_v9  ;;  %v3843_v63 = vpack.c.bf16 %v5037_v32, %v5032_v31  ;;  %v3855_v32 = vpack.c.bf16 %v5090_v45, %v5085_v20 }
 0x472   : > { %3460 = vmatmul.mubr.msk.f32.gmra.mrb[28].mxu1 %vm408_vm0, %v1434_v57  ;;  %3833 = vmatprep.subr.msk.bf16.mxu0 %vm4655_vm1, %v3831_v37 }
 0x473   : > { %3976 = vmatpush3.bf16.xpose.msk.msra.mxu1 %vm4655_vm1, %v5105_v15  ;;  %976 = vadd.xlane.f32.xlu0 %v5166_v49  ;;  %v5302_v15 = vpop.xlane.xlu0 %612 }
 0x474   : > { %3979 = vmatprep.subr.msk.bf16.mxu1 %vm4655_vm1, %v5117_v58  ;;  %3462 = vmatprep.mubr.msk.f32.mxu1 %vm408_vm0, %v5199_v29 }
 0x476   : > { %3463 = vmatmul.mubr.msk.f32.gmra.mrb[30].mxu1 %vm408_vm0, %v1438_v60 }
 0x477   : > { %982 = vadd.xlane.f32.xlu0 %v4356_v19  ;;  %3836 = vmatpush3.bf16.xpose.msk.msra.mxu0 %vm4655_vm1, %v3831_v37  ;;  %v3849_v37 = vpack.c.bf16 %v5074_v7, %v5069_v35 }
 0x47b   : > { %3982 = vmatpush3.bf16.xpose.msk.msra.mxu1 %vm4655_vm1, %v5117_v58  ;;  %980 = vadd.xlane.f32.xlu0 %v4354_v48 }
 0x47c   : > { %3985 = vmatprep.subr.msk.bf16.mxu1 %vm4655_vm1, %v5125_v1 }
 0x47f   : > { %986 = vadd.xlane.f32.xlu0 %v4360_v26 }
 0x483   : > { %3988 = vmatpush3.bf16.xpose.msk.msra.mxu1 %vm4655_vm1, %v5125_v1  ;;  %v2021_v1 = vpop.permute.xlu0 %2020 }
 0x484   : > { %3991 = vmatprep.subr.msk.bf16.mxu1 %vm4655_vm1, %v5133_v47 }
 0x487   : > { %v2027_v58 = vpop.permute.xlu0 %2026 }
 0x48b   : > { %3994 = vmatpush3.bf16.xpose.msk.msra.mxu1 %vm4655_vm1, %v5133_v47  ;;  %v2031_v49 = vpop.permute.xlu0 %2030 }
 0x48c   : > { %3997 = vmatprep.subr.msk.bf16.mxu1 %vm4655_vm1, %v5142_v50 }
 0x48f   : > { %978 = vadd.xlane.f32.xlu1 %v5173_v24 }
 0x493   : > { %4000 = vmatpush3.bf16.xpose.msk.msra.mxu1 %vm4655_vm1, %v5142_v50  ;;  %984 = vadd.xlane.f32.xlu1 %v4358_v4  ;;  %v3837_v50 = vpack.c.bf16 %v5021_v23, %v5016_v17 }
 0x494   : > { %4003 = vmatprep.subr.msk.bf16.mxu1 %vm4655_vm1, %v5160_v25 }
 0x495   : > { %3839 = vmatprep.subr.msk.bf16.mxu0 %vm4655_vm1, %v3837_v50 }
 0x49b   : > { %4006 = vmatpush3.bf16.xpose.msk.msra.mxu1 %vm4655_vm1, %v5160_v25 }
 0x49c   : > { %4009 = vmatprep.subr.msk.bf16.mxu1 %vm4655_vm1, %v5168_v61 }
 0x49e   : > { %v611_v47 = vpop.xlane.xlu1 %610 }
 0x49f   : > { %4361 = vrcp.f32 %v611_v47 }
 0x4a2   : > { %v2019_v24 = vpop.permute.xlu1 %2018 }
 0x4a3   : > { %4012 = vmatpush3.bf16.xpose.msk.msra.mxu1 %vm4655_vm1, %v5168_v61  ;;  %3569 = vmatprep.mubr.msk.f32.mxu1 %vm408_vm0, %v2019_v24 }
 0x4a6   : > { %v2023_v25 = vpop.permute.xlu1 %2022 }
 0x4a7   : > { %v615_v59 = vpop.xlane.xlu0 %614 }
 0x4a8   : > { %4363 = vrcp.f32 %v615_v59 }
 0x4a9   : > { %v4362_v44 = vpop.eup %4361 }
 0x4aa   : > { %v2025_v29 = vpop.permute.xlu1 %2024  ;;  %3570 = vmatmul.mubr.msk.f32.vlgmr.msra.gmra.mrb[32].mxu1 %vm408_vm0, %v2021_v1  ;;  %v5326_v53 = vmul.f32 %v4362_v44, %v4966_v14 }
 0x4ab   : > { %v619_v17 = vpop.xlane.xlu0 %618  ;;  %3572 = vmatprep.mubr.msk.f32.mxu1 %vm408_vm0, %v2023_v25 }
 0x4ac   : > { %4365 = vrcp.f32 %v619_v17 }
 0x4ae   : > { %3573 = vmatmul.mubr.msk.f32.gmra.mrb[34].mxu1 %vm408_vm0, %v2025_v29  ;;  %v2029_v61 = vpop.permute.xlu1 %2028 }
 0x4af   : > { %v621_v23 = vpop.xlane.xlu0 %620  ;;  %3575 = vmatprep.mubr.msk.f32.mxu1 %vm408_vm0, %v2027_v58 }
 0x4b0   : > { %4367 = vrcp.f32 %v621_v23 }
 0x4b2   : > { %v4364_v27 = vpop.eup %4363  ;;  %3576 = vmatmul.mubr.msk.f32.gmra.mrb[36].mxu1 %vm408_vm0, %v2029_v61  ;;  %v2033_v34 = vpop.permute.xlu1 %2032 }
 0x4b3   : > { %v975_v33 = vpop.xlane.xlu0 %974  ;;  %3578 = vmatprep.mubr.msk.f32.mxu1 %vm408_vm0, %v2031_v49  ;;  %v5334_v14 = vmul.f32 %v4364_v27, %v4970_v21 }
 0x4b6   : > { %v4366_v6 = vpop.eup %4365  ;;  %3579 = vmatmul.mubr.msk.f32.gmra.mrb[38].mxu1 %vm408_vm0, %v2033_v34 }
 0x4b7   : > { %v623_v16 = vpop.xlane.xlu0 %622  ;;  %v5338_v0 = vmul.f32 %v4366_v6, %v4974_v40 }
 0x4b8   : > { %4369 = vrcp.f32 %v623_v16 }
 0x4ba   : > { %v4368_v55 = vpop.eup %4367 }
 0x4bb   : > { %v625_v48 = vpop.xlane.xlu0 %624  ;;  %v5341_v19 = vmul.f32 %v4368_v55, %v4972_v39 }
 0x4bc   : > { %4371 = vrcp.f32 %v625_v48 }
 0x4bf   : > { %v5349_v30 = vpop.permute.xlu0 %4255 }
 0x4c2   : > { %v4370_v42 = vpop.eup %4369 }
 0x4c3   : > { %v5344_v57 = vmul.f32 %v4370_v42, %v4983_v46  ;;  %v5351_v8 = vpop.permute.xlu0 %4260 }
 0x4c6   : > { %v4372_v21 = vpop.eup %4371 }
 0x4c7   : > { %v5347_v4 = vmul.f32 %v4372_v21, %v4981_v11  ;;  %v5353_v12 = vpop.permute.xlu0 %4265  ;;  %v4258_v21 = vunpack.i.h.bf16 %v5349_v30 }
 0x4c8   : > { %v3355_v26 = vpop.f32.mrb[16].mxu1 }
 0x4c9   : > { %v1054_v60 = vpop.f32.mrb[17].mxu1 }
 0x4cb   : > { %v5358_v62 = vpop.permute.xlu0 %4270 }
 0x4e3   : > { %v617_v40 = vpop.xlane.xlu1 %616 }
 0x4e4   : > { %4373 = vrcp.f32 %v617_v40 }
 0x4e7   : > { %v973_v56 = vpop.xlane.xlu1 %972 }
 0x4e8   : > { %4375 = vrcp.f32 %v973_v56 }
 0x4e9   : > { %4377 = vrcp.f32 %v975_v33 }
 0x4eb   : > { %v4251_v58 = vpop.permute.xlu1 %4250 }
 0x4ec   : > { %v4253_v47 = vunpack.i.h.bf16 %v4251_v58  ;;  %v4252_v49 = vunpack.i.l.bf16 %v4251_v58  ;;  %v4272_v58 = vunpack.i.l.bf16 %v5358_v62 }
 0x4ee   : > { %v4374_v39 = vpop.eup %4373 }
 0x4ef   : > { %v5356_v46 = vmul.f32 %v4374_v39, %v4968_v10  ;;  %v5368_v10 = vpop.permute.xlu0 %4275 }
 0x4f2   : > { %v4376_v13 = vpop.eup %4375 }
 0x4f3   : > { %v4378_v11 = vpop.eup %4377  ;;  %v1101_v43 = vmul.f32 %v4376_v13, %v1054_v60 }
 0x4f4   : > { %v1102_v41 = vmul.f32 %v4378_v11, %v3355_v26  ;;  %v4257_v26 = vunpack.i.l.bf16 %v5349_v30 }
 0x4f5   : > { %3381 = vmatprep.mubr.msk.f32.mxu0 %vm408_vm0, %v1101_v43  ;;  %v4263_v43 = vunpack.i.h.bf16 %v5351_v8 }
 0x4f6   : > { %3382 = vmatmul.mubr.msk.f32.vlgmr.msra.gmra.mrb[8].mxu0 %vm408_vm0, %v1102_v41  ;;  %v5405_v30 = vpack.c.bf16 %v4258_v21, %v4257_v26  ;;  %v4262_v41 = vunpack.i.l.bf16 %v5351_v8  ;;  %v4267_v8 = vunpack.i.l.bf16 %v5353_v12 }
 0x4f7   : > { %3842 = vmatpush3.bf16.xpose.msk.msra.mxu0 %vm4655_vm1, %v3837_v50  ;;  %v5382_v50 = vpack.c.bf16 %v4253_v47, %v4252_v49  ;;  %v4278_v49 = vunpack.i.h.bf16 %v5368_v10 }
 0x4f8   : > { %3845 = vmatprep.subr.msk.bf16.mxu0 %vm4655_vm1, %v3843_v63 }
 0x4fc   : > { %v3358_v9 = vpop.f32.mrb[18].mxu1 }
 0x4fd   : > { %v1064_v1 = vpop.f32.mrb[19].mxu1 }
 0x4ff   : > { %3848 = vmatpush3.bf16.xpose.msk.msra.mxu0 %vm4655_vm1, %v3843_v63 }
 0x500   : > { %v977_v31 = vpop.xlane.xlu0 %976  ;;  %3851 = vmatprep.subr.msk.bf16.mxu0 %vm4655_vm1, %v3849_v37 }
 0x501   : > { %4379 = vrcp.f32 %v977_v31 }
 0x504   : > { %v983_v45 = vpop.xlane.xlu0 %982 }
 0x507   : > { %3854 = vmatpush3.bf16.xpose.msk.msra.mxu0 %vm4655_vm1, %v3849_v37 }
 0x508   : > { %3857 = vmatprep.subr.msk.bf16.mxu0 %vm4655_vm1, %v3855_v32  ;;  %v981_v24 = vpop.xlane.xlu0 %980 }
 0x50b   : > { %v4380_v35 = vpop.eup %4379 }
 0x50c   : > { %v1103_v7 = vmul.f32 %v4380_v35, %v1064_v1  ;;  %v987_v29 = vpop.xlane.xlu0 %986  ;;  %v4481_v35 = vld [vmem:[%s5800_s1 + $0x60] sm:$0xff] }
 0x50e   : > { %3384 = vmatprep.mubr.msk.f32.mxu0 %vm408_vm0, %v1103_v7 }
 0x50f   : > { %3860 = vmatpush3.bf16.xpose.msk.msra.mxu0 %vm4655_vm1, %v3855_v32 }
 0x510   : > { %3910 = vmatprep.subr.bf16.mxu0 %v5382_v50 }
 0x51c   : > { %v979_v20 = vpop.xlane.xlu1 %978 }
 0x51d   : > { %4381 = vrcp.f32 %v979_v20 }
 0x51e   : > { %4383 = vrcp.f32 %v981_v24 }
 0x51f   : > { %4385 = vrcp.f32 %v983_v45 }
 0x520   : > { %v985_v44 = vpop.xlane.xlu1 %984 }
 0x521   : > { %4387 = vrcp.f32 %v985_v44 }
 0x522   : > { %4389 = vrcp.f32 %v987_v29 }
 0x523   : > { %4391 = vrcp.f32 %v5302_v15 }
 0x527   : > { %v4382_v25 = vpop.eup %4381 }
 0x528   : > { %v1104_v59 = vmul.f32 %v4382_v25, %v3358_v9  ;;  %v4384_v23 = vpop.eup %4383 }
 0x529   : > { %v4386_v27 = vpop.eup %4385 }
 0x52a   : > { %3385 = vmatmul.mubr.msk.f32.gmra.mrb[10].mxu0 %vm408_vm0, %v1104_v59 }
 0x52b   : > { %v4388_v16 = vpop.eup %4387 }
 0x52c   : > { %v4390_v48 = vpop.eup %4389 }
 0x52d   : > { %v4392_v40 = vpop.eup %4391 }
 0x52e   : > { %v788_v11 = vmul.f32 %v4392_v40, %v4964_v3  ;;  %v5418_v3 = vpack.c.bf16 %v4263_v43, %v4262_v41 }
 0x531   : > { %v3361_v17 = vpop.f32.mrb[20].mxu1 }
 0x532   : > { %v1074_v61 = vpop.f32.mrb[21].mxu1  ;;  %v1106_v34 = vmul.f32 %v4386_v27, %v3361_v17  ;;  %v5815_v17 = vld [vmem:[#allocation2_spill] sm:$0xff] }
 0x533   : > { %v1105_v33 = vmul.f32 %v4384_v23, %v1074_v61 }
 0x535   : > { %3387 = vmatprep.mubr.msk.f32.mxu0 %vm408_vm0, %v1105_v33 }
 0x536   : > { %3388 = vmatmul.mubr.msk.f32.gmra.mrb[12].mxu0 %vm408_vm0, %v1106_v34 }
 0x539   : > { %v3364_v6 = vpop.f32.mrb[22].mxu1 }
 0x53a   : > { %v1084_v55 = vpop.f32.mrb[23].mxu1  ;;  %v1108_v60 = vmul.f32 %v4390_v48, %v3364_v6 }
 0x53b   : > { %v1107_v42 = vmul.f32 %v4388_v16, %v1084_v55 }
 0x53d   : > { %3390 = vmatprep.mubr.msk.f32.mxu0 %vm408_vm0, %v1107_v42  ;;  %v3455_v15 = vpop.f32.mrb[24].mxu1 }
 0x53e   : > { %v5396_v56 = vadd.f32 %v3455_v15, %v4784_v51  ;;  %3391 = vmatmul.mubr.msk.f32.gmra.mrb[14].mxu0 %vm408_vm0, %v1108_v60  ;;  %v1585_v39 = vpop.f32.mrb[25].mxu1 }
 0x53f   : > { %v5400_v13 = vadd.f32 %v1585_v39, %v4786_v52  ;;  %3409 = vmatprep.mubr.msk.f32.mxu0 %vm408_vm0, %v5326_v53  ;;  %v4268_v53 = vunpack.i.h.bf16 %v5353_v12  ;;  %v4273_v12 = vunpack.i.h.bf16 %v5358_v62  ;;  %v4277_v62 = vunpack.i.l.bf16 %v5368_v10  ;;  %v4483_v10 = vld [vmem:[%s5800_s1 + $0x70] sm:$0xff] }
 0x540   : > { %1626 = vmax.xlane.f32.xlu1 %v5396_v56 }
 0x541   : > { %v3458_v63 = vpop.f32.mrb[26].mxu1  ;;  %1624 = vmax.xlane.f32.xlu0 %v5400_v13  ;;  %v5432_v32 = vpack.c.bf16 %v4268_v53, %v4267_v8 }
 0x542   : > { %3410 = vmatmul.mubr.msk.f32.vlgmr.msra.gmra.mrb[8].mxu0 %vm408_vm0, %v788_v11  ;;  %v1595_v9 = vpop.f32.mrb[27].mxu1  ;;  %v1601_v45 = vadd.f32 %v3458_v63, %v4796_v38 }
 0x543   : > { %v5413_v37 = vadd.f32 %v1595_v9, %v4794_v36  ;;  %3412 = vmatprep.mubr.msk.f32.mxu0 %vm408_vm0, %v5334_v14  ;;  %3912 = vmatpush3.bf16.msra.mxu0 %v5382_v50 }
 0x544   : > { %3914 = vmatprep.subr.bf16.mxu0 %v5405_v30 }
 0x545   : > { %v3461_v1 = vpop.f32.mrb[28].mxu1  ;;  %1628 = vmax.xlane.f32.xlu0 %v5413_v37 }
 0x546   : > { %v5425_v31 = vadd.f32 %v3461_v1, %v4816_v5  ;;  %3413 = vmatmul.mubr.msk.f32.gmra.mrb[10].mxu0 %vm408_vm0, %v5356_v46  ;;  %v1605_v14 = vpop.f32.mrb[29].mxu1 }
 0x547   : > { %3415 = vmatprep.mubr.msk.f32.mxu0 %vm408_vm0, %v5338_v0  ;;  %3916 = vmatpush3.bf16.msra.mxu0 %v5405_v30  ;;  %v5443_v0 = vpack.c.bf16 %v4273_v12, %v4272_v58  ;;  %v1606_v24 = vadd.f32 %v1605_v14, %v4804_v54  ;;  %v5816_v14 = vld [vmem:[#allocation4_spill] sm:$0xff]  ;;  %v5817_v12 = vld [vmem:[#allocation3_spill] sm:$0xff] }
 0x548   : > { %3918 = vmatprep.subr.bf16.mxu0 %v5418_v3 }
 0x549   : > { %1634 = vmax.xlane.f32.xlu0 %v5425_v31  ;;  %v3464_v47 = vpop.f32.mrb[30].mxu1 }
 0x54a   : > { %3416 = vmatmul.mubr.msk.f32.gmra.mrb[12].mxu0 %vm408_vm0, %v5341_v19  ;;  %v1615_v46 = vpop.f32.mrb[31].mxu1  ;;  %v4482_v19 = vld [vmem:[%s5800_s1 + $0x68] sm:$0xff]  ;;  %v5474_v25 = vadd.f32 %v3464_v47, %v4819_v2 }
 0x54b   : > { %3418 = vmatprep.mubr.msk.f32.mxu0 %vm408_vm0, %v5344_v57  ;;  %3920 = vmatpush3.bf16.msra.mxu0 %v5418_v3  ;;  %v4279_v7 = vpack.i.bf16 %v4482_v19, %v4481_v35  ;;  %v5457_v57 = vpack.c.bf16 %v4278_v49, %v4277_v62  ;;  %v5477_v59 = vadd.f32 %v1615_v46, %v4806_v18 }
 0x54c   : > { %3922 = vmatprep.subr.bf16.mxu0 %v5432_v32 }
 0x54e   : > { %3419 = vmatmul.mubr.msk.f32.gmra.mrb[14].mxu0 %vm408_vm0, %v5347_v4  ;;  %v4484_v4 = vld [vmem:[%s5800_s1 + $0x78] sm:$0xff] }
 0x54f   : > { %3924 = vmatpush3.bf16.msra.mxu0 %v5432_v32  ;;  %v4284_v20 = vpack.i.bf16 %v4484_v4, %v4483_v10 }
 0x550   : > { %3926 = vmatprep.subr.bf16.mxu0 %v5443_v0 }
 0x551   : > { %4280 = vrot.lane.b32.xlu1 %v4279_v7, %s4504_s22 }
 0x553   : > { %3928 = vmatpush3.bf16.msra.mxu0 %v5443_v0 }
 0x554   : > { %3930 = vmatprep.subr.bf16.mxu0 %v5457_v57 }
 0x557   : > { %3932 = vmatpush3.bf16.msra.mxu0 %v5457_v57 }
 0x55f   : > { %4285 = vrot.lane.b32.xlu0 %v4284_v20, %s4504_s22 }
 0x575   : > { %1630 = vmax.xlane.f32.xlu1 %v1601_v45 }
 0x579   : > { %1632 = vmax.xlane.f32.xlu1 %v1606_v24 }
 0x57d   : > { %1638 = vmax.xlane.f32.xlu1 %v5474_v25  ;;  %v5480_v44 = vpop.f32.mrb[32].mxu1 }
 0x57e   : > { %1636 = vmax.xlane.f32.xlu0 %v5477_v59  ;;  %v5483_v29 = vpop.f32.mrb[33].mxu1 }
 0x581   : > { %v5489_v23 = vpop.f32.mrb[34].mxu1 }
 0x582   : > { %v5491_v61 = vpop.f32.mrb[35].mxu1 }
 0x585   : > { %v5493_v27 = vpop.f32.mrb[36].mxu1 }
 0x586   : > { %v5495_v33 = vpop.f32.mrb[37].mxu1 }
 0x589   : > { %v5497_v34 = vpop.f32.mrb[38].mxu1 }
 0x58a   : > { %v5499_v6 = vpop.f32.mrb[39].mxu1 }
 0x58e   : > { %4290 = vrot.lane.b32.xlu1 %v5027_v22, %s4502_s18 }
 0x594   : > { %4295 = vrot.lane.b32.xlu0 %v5815_v17, %s4502_s18 }
 0x5cd   : > { %v1627_v16 = vpop.xlane.xlu1 %1626 }
 0x5ce   : > { %v1641_v55 = vsub.f32 %v5396_v56, %v1627_v16  ;;  %v1625_v48 = vpop.xlane.xlu0 %1624 }
 0x5cf   : > { %v1640_v42 = vsub.f32 %v5400_v13, %v1625_v48 }
 0x5d0   : > { %v1650_v21 = vmul.f32 1.442695, %v1641_v55 }
 0x5d1   : > { %v1648_v26 = vmul.f32 1.442695, %v1640_v42  ;;  %v4281_v60 = vpop.permute.xlu1 %4280 }
 0x5d2   : > { %4393 = vpow2.f32 %v1650_v21  ;;  %v4283_v40 = vunpack.i.h.bf16 %v4281_v60  ;;  %v4282_v15 = vunpack.i.l.bf16 %v4281_v60  ;;  %v1629_v39 = vpop.xlane.xlu0 %1628 }
 0x5d3   : > { %4395 = vpow2.f32 %v1648_v26  ;;  %v1642_v11 = vsub.f32 %v5413_v37, %v1629_v39  ;;  %v2122_v39 = vadd.f32 %v5480_v44, %v4784_v51  ;;  %v5534_v51 = vadd.f32 %v5493_v27, %v4816_v5 }
 0x5d4   : > { %v5504_v43 = vpack.c.bf16 %v4283_v40, %v4282_v15  ;;  %v2117_v44 = vadd.f32 %v5483_v29, %v4786_v52  ;;  %v2127_v5 = vadd.f32 %v5491_v61, %v4794_v36 }
 0x5d5   : > { %v1652_v41 = vmul.f32 1.442695, %v1642_v11  ;;  %v5529_v11 = vadd.f32 %v5489_v23, %v4796_v38  ;;  %v5541_v38 = vadd.f32 %v5497_v34, %v4819_v2  ;;  %v5550_v23 = vadd.f32 %v5495_v33, %v4804_v54 }
 0x5d6   : > { %3934 = vmatprep.subr.bf16.mxu0 %v5504_v43  ;;  %v1635_v63 = vpop.xlane.xlu0 %1634  ;;  %v5555_v2 = vadd.f32 %v5499_v6, %v4806_v18 }
 0x5d7   : > { %3936 = vmatpush3.bf16.msra.mxu0 %v5504_v43  ;;  %4397 = vpow2.f32 %v1652_v41  ;;  %v1645_v58 = vsub.f32 %v5425_v31, %v1635_v63 }
 0x5d9   : > { %v1658_v62 = vmul.f32 1.442695, %v1645_v58 }
 0x5da   : > { %v4286_v56 = vpop.permute.xlu0 %4285 }
 0x5db   : > { %v4288_v13 = vunpack.i.h.bf16 %v4286_v56  ;;  %v4287_v9 = vunpack.i.l.bf16 %v4286_v56 }
 0x5dc   : > { %v4394_v53 = vpop.eup %4393 }
 0x5dd   : > { %v4396_v8 = vpop.eup %4395  ;;  %v5508_v1 = vpack.c.bf16 %v4288_v13, %v4287_v9  ;;  %1666 = vadd.xlane.f32.xlu0 %v4394_v53 }
 0x5de   : > { %1664 = vadd.xlane.f32.xlu1 %v4396_v8  ;;  %3497 = vmatprep.mubr.f32.mxu0 %v4396_v8 }
 0x5df   : > { %3938 = vmatprep.subr.bf16.mxu0 %v5508_v1 }
 0x5e0   : > { %3940 = vmatpush3.bf16.msra.mxu0 %v5508_v1 }
 0x5e1   : > { %v4398_v37 = vpop.eup %4397 }
 0x5e3   : > { %3498 = vmatmul.mubr.f32.vlgmr.msra.gmra.mrb[16].mxu0 %v4394_v53 }
 0x5e4   : > { %3500 = vmatprep.mubr.f32.mxu0 %v4398_v37 }
 0x5ef   : > { %4305 = vrot.lane.b32.xlu1 %v5816_v14, %s4502_s18 }
 0x5f3   : > { %4300 = vrot.lane.b32.xlu0 %v5817_v12, %s4502_s18 }
 0x602   : > { %v1631_v47 = vpop.xlane.xlu1 %1630 }
 0x603   : > { %v1643_v46 = vsub.f32 %v1601_v45, %v1631_v47 }
 0x605   : > { %v1654_v49 = vmul.f32 1.442695, %v1643_v46 }
 0x606   : > { %v1633_v35 = vpop.xlane.xlu1 %1632 }
 0x607   : > { %4399 = vpow2.f32 %v1654_v49  ;;  %v1644_v19 = vsub.f32 %v1606_v24, %v1633_v35 }
 0x608   : > { %4401 = vpow2.f32 %v1658_v62 }
 0x609   : > { %v1656_v7 = vmul.f32 1.442695, %v1644_v19 }
 0x60a   : > { %v1639_v10 = vpop.xlane.xlu1 %1638 }
 0x60b   : > { %4403 = vpow2.f32 %v1656_v7  ;;  %v1647_v4 = vsub.f32 %v5474_v25, %v1639_v10  ;;  %v1637_v20 = vpop.xlane.xlu0 %1636 }
 0x60c   : > { %v1646_v16 = vsub.f32 %v5477_v59, %v1637_v20 }
 0x60d   : > { %v1662_v55 = vmul.f32 1.442695, %v1647_v4 }
 0x60e   : > { %v1660_v48 = vmul.f32 1.442695, %v1646_v16  ;;  %v4291_v42 = vpop.permute.xlu1 %4290 }
 0x60f   : > { %v4293_v31 = vunpack.i.h.bf16 %v4291_v42  ;;  %v4292_v21 = vunpack.i.l.bf16 %v4291_v42  ;;  %v4296_v45 = vpop.permute.xlu0 %4295 }
 0x610   : > { %4405 = vpow2.f32 %v1660_v48  ;;  %v4298_v26 = vunpack.i.h.bf16 %v4296_v45  ;;  %v4297_v60 = vunpack.i.l.bf16 %v4296_v45 }
 0x611   : > { %v4400_v40 = vpop.eup %4399  ;;  %4407 = vpow2.f32 %v1662_v55  ;;  %v3941_v24 = vpack.c.bf16 %v4293_v31, %v4292_v21 }
 0x612   : > { %1668 = vadd.xlane.f32.xlu0 %v4398_v37  ;;  %3501 = vmatmul.mubr.f32.gmra.mrb[18].mxu0 %v4400_v40  ;;  %v3947_v15 = vpack.c.bf16 %v4298_v26, %v4297_v60  ;;  %v4402_v25 = vpop.eup %4401 }
 0x613   : > { %1670 = vadd.xlane.f32.xlu1 %v4400_v40  ;;  %3943 = vmatprep.subr.msk.bf16.mxu0 %vm4655_vm1, %v3941_v24 }
 0x614   : > { %3946 = vmatpush3.bf16.xpose.msk.msra.mxu0 %vm4655_vm1, %v3941_v24 }
 0x615   : > { %v4404_v59 = vpop.eup %4403  ;;  %3949 = vmatprep.subr.msk.bf16.mxu0 %vm4655_vm1, %v3947_v15 }
 0x616   : > { %1674 = vadd.xlane.f32.xlu0 %v4402_v25  ;;  %3503 = vmatprep.mubr.f32.mxu0 %v4404_v59 }
 0x617   : > { %2157 = vmax.xlane.f32.xlu1 %v2122_v39  ;;  %3504 = vmatmul.mubr.f32.gmra.mrb[20].mxu0 %v4402_v25 }
 0x61a   : > { %v4406_v41 = vpop.eup %4405  ;;  %1672 = vadd.xlane.f32.xlu0 %v4404_v59 }
 0x61b   : > { %v4408_v63 = vpop.eup %4407  ;;  %2161 = vmax.xlane.f32.xlu1 %v5529_v11  ;;  %3506 = vmatprep.mubr.f32.mxu0 %v4406_v41 }
 0x61c   : > { %3507 = vmatmul.mubr.f32.gmra.mrb[22].mxu0 %v4408_v63 }
 0x61d   : > { %3952 = vmatpush3.bf16.xpose.msk.msra.mxu0 %vm4655_vm1, %v3947_v15 }
 0x61e   : > { %1678 = vadd.xlane.f32.xlu0 %v4408_v63 }
 0x61f   : > { %2165 = vmax.xlane.f32.xlu1 %v5534_v51 }
 0x622   : > { %1676 = vadd.xlane.f32.xlu0 %v4406_v41 }
 0x623   : > { %2169 = vmax.xlane.f32.xlu1 %v5541_v38 }
 0x626   : > { %2155 = vmax.xlane.f32.xlu0 %v2117_v44 }
 0x62a   : > { %2159 = vmax.xlane.f32.xlu0 %v2127_v5 }
 0x62e   : > { %2163 = vmax.xlane.f32.xlu0 %v5550_v23 }
 0x632   : > { %2167 = vmax.xlane.f32.xlu0 %v5555_v2 }
 0x634   : > { %4315 = vrot.lane.b32.xlu1 %v5815_v17, %s4503_s14 }
 0x648   : > { %4310 = vrot.lane.b32.xlu0 %v5027_v22, %s4503_s14 }
 0x66a   : > { %v1667_v52 = vpop.xlane.xlu0 %1666 }
 0x66b   : > { %v1665_v36 = vpop.xlane.xlu1 %1664 }
 0x66e   : > { %v4301_v29 = vpop.permute.xlu0 %4300 }
 0x66f   : > { %v4303_v61 = vunpack.i.h.bf16 %v4301_v29  ;;  %v4302_v54 = vunpack.i.l.bf16 %v4301_v29  ;;  %v4306_v27 = vpop.permute.xlu1 %4305 }
 0x670   : > { %v4308_v33 = vunpack.i.h.bf16 %v4306_v27  ;;  %v4307_v34 = vunpack.i.l.bf16 %v4306_v27 }
 0x671   : > { %v3953_v56 = vpack.c.bf16 %v4303_v61, %v4302_v54 }
 0x672   : > { %v3959_v13 = vpack.c.bf16 %v4308_v33, %v4307_v34 }
 0x673   : > { %3955 = vmatprep.subr.msk.bf16.mxu0 %vm4655_vm1, %v3953_v56 }
 0x674   : > { %3958 = vmatpush3.bf16.xpose.msk.msra.mxu0 %vm4655_vm1, %v3953_v56 }
 0x675   : > { %3961 = vmatprep.subr.msk.bf16.mxu0 %vm4655_vm1, %v3959_v13 }
 0x67c   : > { %3964 = vmatpush3.bf16.xpose.msk.msra.mxu0 %vm4655_vm1, %v3959_v13 }
 0x67d   : > { %4014 = vmatprep.subr.bf16.mxu0 %v5382_v50 }
 0x69f   : > { %v5571_v18 = vpop.xlane.xlu0 %1668 }
 0x6a0   : > { %v5573_v22 = vpop.xlane.xlu1 %1670 }
 0x6a3   : > { %v5575_v17 = vpop.xlane.xlu0 %1674 }
 0x6a4   : > { %v2158_v6 = vpop.xlane.xlu1 %2157 }
 0x6a5   : > { %v2172_v9 = vsub.f32 %v2122_v39, %v2158_v6 }
 0x6a7   : > { %v2181_v53 = vmul.f32 1.442695, %v2172_v9  ;;  %v5577_v8 = vpop.xlane.xlu0 %1672 }
 0x6a8   : > { %v2162_v37 = vpop.xlane.xlu1 %2161 }
 0x6a9   : > { %4409 = vpow2.f32 %v2181_v53  ;;  %v2174_v46 = vsub.f32 %v5529_v11, %v2162_v37 }
 0x6aa   : > { %4411 = vrcp.f32 %v1667_v52 }
 0x6ab   : > { %v5579_v14 = vpop.xlane.xlu0 %1678  ;;  %4413 = vrcp.f32 %v1665_v36  ;;  %v2185_v20 = vmul.f32 1.442695, %v2174_v46 }
 0x6ac   : > { %v2166_v12 = vpop.xlane.xlu1 %2165 }
 0x6ad   : > { %v2176_v16 = vsub.f32 %v5534_v51, %v2166_v12 }
 0x6af   : > { %v5581_v58 = vpop.xlane.xlu0 %1676  ;;  %v2189_v60 = vmul.f32 1.442695, %v2176_v16 }
 0x6b0   : > { %v2170_v35 = vpop.xlane.xlu1 %2169 }
 0x6b1   : > { %v2178_v31 = vsub.f32 %v5541_v38, %v2170_v35 }
 0x6b3   : > { %v5583_v47 = vpop.eup %4409  ;;  %v2156_v49 = vpop.xlane.xlu0 %2155  ;;  %v2193_v24 = vmul.f32 1.442695, %v2178_v31 }
 0x6b4   : > { %v2171_v62 = vsub.f32 %v2117_v44, %v2156_v49  ;;  %2197 = vadd.xlane.f32.xlu1 %v5583_v47  ;;  %v4412_v19 = vpop.eup %4411 }
 0x6b5   : > { %v4414_v4 = vpop.eup %4413 }
 0x6b6   : > { %v2179_v7 = vmul.f32 1.442695, %v2171_v62  ;;  %v3499_v10 = vpop.f32.mrb[16].mxu0 }
 0x6b7   : > { %v1842_v55 = vmul.f32 %v4412_v19, %v3499_v10  ;;  %v2160_v48 = vpop.xlane.xlu0 %2159  ;;  %v1794_v42 = vpop.f32.mrb[17].mxu0 }
 0x6b8   : > { %4415 = vpow2.f32 %v2179_v7  ;;  %v2173_v21 = vsub.f32 %v2127_v5, %v2160_v48  ;;  %v1841_v45 = vmul.f32 %v4414_v4, %v1794_v42 }
 0x6b9   : > { %4417 = vpow2.f32 %v2185_v20 }
 0x6ba   : > { %v2183_v26 = vmul.f32 1.442695, %v2173_v21  ;;  %3525 = vmatprep.mubr.msk.f32.mxu0 %vm408_vm0, %v1841_v45 }
 0x6bb   : > { %v2164_v40 = vpop.xlane.xlu0 %2163  ;;  %3526 = vmatmul.mubr.msk.f32.vlgmr.msra.gmra.mrb[8].mxu0 %vm408_vm0, %v1842_v55 }
 0x6bc   : > { %4419 = vpow2.f32 %v2183_v26  ;;  %v2175_v15 = vsub.f32 %v5550_v23, %v2164_v40  ;;  %4016 = vmatpush3.bf16.msra.mxu0 %v5382_v50 }
 0x6bd   : > { %4018 = vmatprep.subr.bf16.mxu0 %v5405_v30  ;;  %4421 = vpow2.f32 %v2189_v60 }
 0x6be   : > { %v2187_v25 = vmul.f32 1.442695, %v2175_v15  ;;  %4423 = vpow2.f32 %v2193_v24 }
 0x6bf   : > { %v2168_v59 = vpop.xlane.xlu0 %2167 }
 0x6c0   : > { %v2177_v39 = vsub.f32 %v5555_v2, %v2168_v59  ;;  %4020 = vmatpush3.bf16.msra.mxu0 %v5405_v30  ;;  %4425 = vpow2.f32 %v2187_v25 }
 0x6c1   : > { %4022 = vmatprep.subr.bf16.mxu0 %v5418_v3 }
 0x6c2   : > { %v5597_v11 = vpop.eup %4415  ;;  %v2191_v41 = vmul.f32 1.442695, %v2177_v39 }
 0x6c3   : > { %2195 = vadd.xlane.f32.xlu1 %v5597_v11  ;;  %v5601_v50 = vpop.eup %4417 }
 0x6c4   : > { %4427 = vpow2.f32 %v2191_v41  ;;  %4024 = vmatpush3.bf16.msra.mxu0 %v5418_v3 }
 0x6c5   : > { %4026 = vmatprep.subr.bf16.mxu0 %v5432_v32  ;;  %4429 = vrcp.f32 %v5571_v18 }
 0x6c6   : > { %v5604_v63 = vpop.eup %4419  ;;  %4431 = vrcp.f32 %v5573_v22 }
 0x6c7   : > { %2201 = vadd.xlane.f32.xlu1 %v5601_v50  ;;  %2199 = vadd.xlane.f32.xlu0 %v5604_v63  ;;  %v5609_v30 = vpop.eup %4421  ;;  %4433 = vrcp.f32 %v5577_v8 }
 0x6c8   : > { %4028 = vmatpush3.bf16.msra.mxu0 %v5432_v32  ;;  %v5612_v51 = vpop.eup %4423  ;;  %v4311_v32 = vpop.permute.xlu0 %4310  ;;  %4435 = vrcp.f32 %v5575_v17 }
 0x6c9   : > { %4030 = vmatprep.subr.bf16.mxu0 %v5443_v0  ;;  %v4313_v44 = vunpack.i.h.bf16 %v4311_v32  ;;  %v4312_v5 = vunpack.i.l.bf16 %v4311_v32  ;;  %4437 = vrcp.f32 %v5581_v58 }
 0x6ca   : > { %v4426_v3 = vpop.eup %4425  ;;  %4439 = vrcp.f32 %v5579_v14  ;;  %v4316_v14 = vpop.permute.xlu1 %4315 }
 0x6cb   : > { %2209 = vadd.xlane.f32.xlu1 %v5612_v51  ;;  %2205 = vadd.xlane.f32.xlu0 %v5609_v30  ;;  %v4045_v23 = vpack.c.bf16 %v4313_v44, %v4312_v5  ;;  %v4318_v58 = vunpack.i.h.bf16 %v4316_v14  ;;  %v4317_v46 = vunpack.i.l.bf16 %v4316_v14 }
 0x6cc   : > { %4032 = vmatpush3.bf16.msra.mxu0 %v5443_v0  ;;  %v4485_v0 = vld [vmem:[%s5802_s3 + $0x30] sm:$0xff] }
 0x6cd   : > { %4034 = vmatprep.subr.bf16.mxu0 %v5457_v57  ;;  %v4051_v49 = vpack.c.bf16 %v4318_v58, %v4317_v46  ;;  %v2508_v58 = vld [vmem:[%s5683_s30 + $0x38] sm:$0xff] }
 0x6ce   : > { %v4428_v38 = vpop.eup %4427 }
 0x6cf   : > { %2203 = vadd.xlane.f32.xlu0 %v4426_v3  ;;  %2207 = vadd.xlane.f32.xlu1 %v4428_v38  ;;  %v4430_v29 = vpop.eup %4429 }
 0x6d0   : > { %4036 = vmatpush3.bf16.msra.mxu0 %v5457_v57  ;;  %v4486_v57 = vld [vmem:[%s5802_s3 + $0x38] sm:$0xff]  ;;  %v4432_v54 = vpop.eup %4431 }
 0x6d1   : > { %4038 = vmatprep.subr.bf16.mxu0 %v5504_v43  ;;  %v4324_v2 = vpack.i.bf16 %v4486_v57, %v4485_v0  ;;  %v4434_v56 = vpop.eup %4433 }
 0x6d2   : > { %v4436_v18 = vpop.eup %4435 }
 0x6d3   : > { %v4438_v9 = vpop.eup %4437 }
 0x6d4   : > { %4040 = vmatpush3.bf16.msra.mxu0 %v5504_v43  ;;  %v4487_v43 = vld [vmem:[%s5802_s3 + $0x20] sm:$0xff]  ;;  %v4440_v8 = vpop.eup %4439 }
 0x6d5   : > { %4042 = vmatprep.subr.bf16.mxu0 %v5508_v1 }
 0x6d8   : > { %4044 = vmatpush3.bf16.msra.mxu0 %v5508_v1  ;;  %v4488_v1 = vld [vmem:[%s5802_s3 + $0x28] sm:$0xff] }
 0x6d9   : > { %4047 = vmatprep.subr.msk.bf16.mxu0 %vm4655_vm1, %v4045_v23  ;;  %v4319_v52 = vpack.i.bf16 %v4488_v1, %v4487_v43  ;;  %v2502_v1 = vld [vmem:[%s5683_s30 + $0x8] sm:$0xff] }
 0x6e0   : > { %4325 = vrot.lane.b32.xlu1 %v4324_v2, %s4503_s14 }
 0x6e5   : > { %v3502_v36 = vpop.f32.mrb[18].mxu0  ;;  %4320 = vrot.lane.b32.xlu0 %v4319_v52, %s4503_s14  ;;  %v2501_v52 = vld [vmem:[%s5683_s30] sm:$0xff] }
 0x6e6   : > { %v1804_v61 = vpop.f32.mrb[19].mxu0  ;;  %v1844_v33 = vmul.f32 %v4432_v54, %v3502_v36 }
 0x6e7   : > { %v1843_v27 = vmul.f32 %v4430_v29, %v1804_v61 }
 0x6e9   : > { %3528 = vmatprep.mubr.msk.f32.mxu0 %vm408_vm0, %v1843_v27  ;;  %v2504_v27 = vld [vmem:[%s5683_s30 + $0x18] sm:$0xff] }
 0x6ea   : > { %v3505_v34 = vpop.f32.mrb[20].mxu0  ;;  %3529 = vmatmul.mubr.msk.f32.gmra.mrb[10].mxu0 %vm408_vm0, %v1844_v33 }
 0x6eb   : > { %v1814_v13 = vpop.f32.mrb[21].mxu0  ;;  %v1846_v17 = vmul.f32 %v4436_v18, %v3505_v34  ;;  %v2503_v34 = vld [vmem:[%s5683_s30 + $0x10] sm:$0xff] }
 0x6ec   : > { %v1845_v22 = vmul.f32 %v4434_v56, %v1814_v13 }
 0x6ee   : > { %3531 = vmatprep.mubr.msk.f32.mxu0 %vm408_vm0, %v1845_v22 }
 0x6ef   : > { %v3508_v6 = vpop.f32.mrb[22].mxu0  ;;  %3532 = vmatmul.mubr.msk.f32.gmra.mrb[12].mxu0 %vm408_vm0, %v1846_v17 }
 0x6f0   : > { %v1824_v53 = vpop.f32.mrb[23].mxu0  ;;  %v1848_v12 = vmul.f32 %v4440_v8, %v3508_v6  ;;  %v2506_v6 = vld [vmem:[%s5683_s30 + $0x28] sm:$0xff] }
 0x6f1   : > { %v1847_v37 = vmul.f32 %v4438_v9, %v1824_v53  ;;  %v2505_v53 = vld [vmem:[%s5683_s30 + $0x20] sm:$0xff] }
 0x6f3   : > { %3534 = vmatprep.mubr.msk.f32.mxu0 %vm408_vm0, %v1847_v37 }
 0x6f4   : > { %3535 = vmatmul.mubr.msk.f32.gmra.mrb[14].mxu0 %vm408_vm0, %v1848_v12 }
 0x6f5   : > { %3613 = vmatprep.mubr.f32.mxu0 %v5597_v11 }
 0x6f8   : > { %3614 = vmatmul.mubr.f32.vlgmr.msra.gmra.mrb[24].mxu0 %v5583_v47 }
 0x6f9   : > { %3616 = vmatprep.mubr.f32.mxu0 %v5604_v63  ;;  %4050 = vmatpush3.bf16.xpose.msk.msra.mxu0 %vm4655_vm1, %v4045_v23 }
 0x6fa   : > { %4053 = vmatprep.subr.msk.bf16.mxu0 %vm4655_vm1, %v4051_v49 }
 0x6fc   : > { %3617 = vmatmul.mubr.f32.gmra.mrb[26].mxu0 %v5601_v50 }
 0x6fd   : > { %3619 = vmatprep.mubr.f32.mxu0 %v4426_v3 }
 0x700   : > { %3620 = vmatmul.mubr.f32.gmra.mrb[28].mxu0 %v5609_v30 }
 0x701   : > { %3622 = vmatprep.mubr.f32.mxu0 %v4428_v38  ;;  %4056 = vmatpush3.bf16.xpose.msk.msra.mxu0 %vm4655_vm1, %v4051_v49  ;;  %v2507_v49 = vld [vmem:[%s5683_s30 + $0x30] sm:$0xff] }
 0x704   : > { %3623 = vmatmul.mubr.f32.gmra.mrb[30].mxu0 %v5612_v51 }
 0x741   : > { %v2198_v47 = vpop.xlane.xlu1 %2197 }
 0x742   : > { %4441 = vrcp.f32 %v2198_v47 }
 0x74c   : > { %v4442_v60 = vpop.eup %4441 }
 0x750   : > { %v2196_v62 = vpop.xlane.xlu1 %2195 }
 0x751   : > { %4443 = vrcp.f32 %v2196_v62 }
 0x754   : > { %v2202_v35 = vpop.xlane.xlu1 %2201  ;;  %v2200_v19 = vpop.xlane.xlu0 %2199 }
 0x755   : > { %4445 = vrcp.f32 %v2202_v35 }
 0x756   : > { %4447 = vrcp.f32 %v2200_v19 }
 0x758   : > { %v2210_v7 = vpop.xlane.xlu1 %2209  ;;  %v2206_v10 = vpop.xlane.xlu0 %2205 }
 0x759   : > { %4449 = vrcp.f32 %v2206_v10 }
 0x75b   : > { %v4444_v24 = vpop.eup %4443 }
 0x75c   : > { %v2208_v4 = vpop.xlane.xlu1 %2207  ;;  %v2204_v20 = vpop.xlane.xlu0 %2203 }
 0x75d   : > { %4451 = vrcp.f32 %v2204_v20 }
 0x75e   : > { %4453 = vrcp.f32 %v2210_v7 }
 0x75f   : > { %4455 = vrcp.f32 %v2208_v4  ;;  %v4446_v39 = vpop.eup %4445 }
 0x760   : > { %v4321_v16 = vpop.permute.xlu0 %4320  ;;  %v4326_v55 = vpop.permute.xlu1 %4325 }
 0x761   : > { %v4323_v48 = vunpack.i.h.bf16 %v4321_v16  ;;  %v4322_v42 = vunpack.i.l.bf16 %v4321_v16  ;;  %v4328_v31 = vunpack.i.h.bf16 %v4326_v55  ;;  %v4327_v21 = vunpack.i.l.bf16 %v4326_v55  ;;  %v4448_v28 = vpop.eup %4447 }
 0x763   : > { %v4057_v45 = vpack.c.bf16 %v4323_v48, %v4322_v42  ;;  %v4063_v26 = vpack.c.bf16 %v4328_v31, %v4327_v21  ;;  %v4450_v30 = vpop.eup %4449 }
 0x765   : > { %4059 = vmatprep.subr.msk.bf16.mxu0 %vm4655_vm1, %v4057_v45 }
 0x766   : > { %4062 = vmatpush3.bf16.xpose.msk.msra.mxu0 %vm4655_vm1, %v4057_v45 }
 0x767   : > { %4065 = vmatprep.subr.msk.bf16.mxu0 %vm4655_vm1, %v4063_v26  ;;  %v4452_v3 = vpop.eup %4451 }
 0x768   : > { %v4454_v5 = vpop.eup %4453 }
 0x769   : > { %v4456_v0 = vpop.eup %4455 }
 0x76e   : > { %4068 = vmatpush3.bf16.xpose.msk.msra.mxu0 %vm4655_vm1, %v4063_v26 }
 0x7cb   : > { %v3615_v40 = vpop.f32.mrb[24].mxu0 }
 0x7cc   : > { %v2325_v15 = vmul.f32 %v4442_v60, %v3615_v40  ;;  %v2277_v25 = vpop.f32.mrb[25].mxu0 }
 0x7cd   : > { %v2324_v59 = vmul.f32 %v4444_v24, %v2277_v25 }
 0x7cf   : > { %v3618_v11 = vpop.f32.mrb[26].mxu0  ;;  %3641 = vmatprep.mubr.msk.f32.mxu0 %vm408_vm0, %v2324_v59 }
 0x7d0   : > { %v2327_v41 = vmul.f32 %v4446_v39, %v3618_v11  ;;  %v2287_v50 = vpop.f32.mrb[27].mxu0  ;;  %3642 = vmatmul.mubr.msk.f32.vlgmr.msra.gmra.mrb[8].mxu0 %vm408_vm0, %v2325_v15 }
 0x7d1   : > { %v2326_v63 = vmul.f32 %v4448_v28, %v2287_v50 }
 0x7d3   : > { %v3621_v51 = vpop.f32.mrb[28].mxu0  ;;  %3644 = vmatprep.mubr.msk.f32.mxu0 %vm408_vm0, %v2326_v63 }
 0x7d4   : > { %v2329_v38 = vmul.f32 %v4450_v30, %v3621_v51  ;;  %v2297_v32 = vpop.f32.mrb[29].mxu0  ;;  %3645 = vmatmul.mubr.msk.f32.gmra.mrb[10].mxu0 %vm408_vm0, %v2327_v41 }
 0x7d5   : > { %v2328_v44 = vmul.f32 %v4452_v3, %v2297_v32 }
 0x7d7   : > { %v3624_v23 = vpop.f32.mrb[30].mxu0  ;;  %3647 = vmatprep.mubr.msk.f32.mxu0 %vm408_vm0, %v2328_v44 }
 0x7d8   : > { %v2331_v57 = vmul.f32 %v4454_v5, %v3624_v23  ;;  %v2307_v2 = vpop.f32.mrb[31].mxu0  ;;  %3648 = vmatmul.mubr.msk.f32.gmra.mrb[12].mxu0 %vm408_vm0, %v2329_v38 }
 0x7d9   : > { %v2330_v43 = vmul.f32 %v4456_v0, %v2307_v2 }
 0x7db   : > { %3650 = vmatprep.mubr.msk.f32.mxu0 %vm408_vm0, %v2330_v43 }
 0x7dc   : > { %3651 = vmatmul.mubr.msk.f32.gmra.mrb[14].mxu0 %vm408_vm0, %v2331_v57 }
 0x8a3   : > { %v3643_v36 = vpop.f32.mrb[8].mxu0 }
 0x8a4   : > { %v2510_v29 = vadd.f32 %v3643_v36, %v2502_v1  ;;  %v2454_v61 = vpop.f32.mrb[9].mxu0 }
 0x8a5   : > { %v2509_v54 = vadd.f32 %v2501_v52, %v2454_v61 }
 0x8a6   : > { %2519 = vst.msk [vmem:[%s5691_s9 + $0x8] sm:$0xff] %vm2517_vm10, %v2510_v29  ;;  %v2529_v33 = vsel %vm2517_vm10, %v2510_v29, 0.0 }
 0x8a7   : > { %2518 = vst.msk [vmem:[%s5691_s9] sm:$0xff] %vm2517_vm10, %v2509_v54  ;;  %2530 = vadd.xlane.f32.xlu1 %v2529_v33  ;;  %v3646_v56 = vpop.f32.mrb[10].mxu0  ;;  %v2526_v13 = vsel %vm2517_vm10, %v2509_v54, 0.0 }
 0x8a8   : > { %v2512_v18 = vadd.f32 %v3646_v56, %v2504_v27  ;;  %2527 = vadd.xlane.f32.xlu0 %v2526_v13  ;;  %v2464_v22 = vpop.f32.mrb[11].mxu0 }
 0x8a9   : > { %v2511_v17 = vadd.f32 %v2503_v34, %v2464_v22 }
 0x8aa   : > { %2521 = vst.msk [vmem:[%s5691_s9 + $0x18] sm:$0xff] %vm2517_vm10, %v2512_v18  ;;  %v2535_v9 = vsel %vm2517_vm10, %v2512_v18, 0.0 }
 0x8ab   : > { %2520 = vst.msk [vmem:[%s5691_s9 + $0x10] sm:$0xff] %vm2517_vm10, %v2511_v17  ;;  %v3649_v8 = vpop.f32.mrb[12].mxu0  ;;  %v2532_v62 = vsel %vm2517_vm10, %v2511_v17, 0.0 }
 0x8ac   : > { %v2514_v37 = vadd.f32 %v3649_v8, %v2506_v6  ;;  %2536 = vadd.xlane.f32.xlu0 %v2535_v9  ;;  %v2474_v14 = vpop.f32.mrb[13].mxu0 }
 0x8ad   : > { %v2513_v12 = vadd.f32 %v2505_v53, %v2474_v14 }
 0x8ae   : > { %2523 = vst.msk [vmem:[%s5691_s9 + $0x28] sm:$0xff] %vm2517_vm10, %v2514_v37  ;;  %v2541_v46 = vsel %vm2517_vm10, %v2514_v37, 0.0 }
 0x8af   : > { %2522 = vst.msk [vmem:[%s5691_s9 + $0x20] sm:$0xff] %vm2517_vm10, %v2513_v12  ;;  %2542 = vadd.xlane.f32.xlu1 %v2541_v46  ;;  %v3652_v47 = vpop.f32.mrb[14].mxu0  ;;  %v2538_v4 = vsel %vm2517_vm10, %v2513_v12, 0.0 }
 0x8b0   : > { %v2516_v35 = vadd.f32 %v3652_v47, %v2508_v58  ;;  %2533 = vadd.xlane.f32.xlu0 %v2532_v62  ;;  %v2484_v19 = vpop.f32.mrb[15].mxu0 }
 0x8b1   : > { %v2515_v7 = vadd.f32 %v2507_v49, %v2484_v19 }
 0x8b2   : > { %2525 = vst.msk [vmem:[%s5691_s9 + $0x38] sm:$0xff] %vm2517_vm10, %v2516_v35  ;;  %v2547_v10 = vsel %vm2517_vm10, %v2516_v35, 0.0 }
 0x8b3   : > { %2524 = vst.msk [vmem:[%s5691_s9 + $0x30] sm:$0xff] %vm2517_vm10, %v2515_v7  ;;  %2548 = vadd.xlane.f32.xlu1 %v2547_v10  ;;  %v2544_v20 = vsel %vm2517_vm10, %v2515_v7, 0.0 }
 0x8b4   : > { %2539 = vadd.xlane.f32.xlu0 %v2538_v4 }
 0x8b8   : > { %2545 = vadd.xlane.f32.xlu0 %v2544_v20 }
 0x934   : > { %v2531_v16 = vpop.xlane.xlu1 %2530 }
 0x935   : > { %v2552_v55 = vmul.f32 0.015625, %v2531_v16  ;;  %v2528_v48 = vpop.xlane.xlu0 %2527 }
 0x936   : > { %v2551_v42 = vmul.f32 0.015625, %v2528_v48 }
 0x937   : > { %v5723_v31 = vsub.f32 %v2510_v29, %v2552_v55 }
 0x938   : > { %v5725_v21 = vsub.f32 %v2509_v54, %v2551_v42 }
 0x939   : > { %v2537_v45 = vpop.xlane.xlu0 %2536  ;;  %v2568_v26 = vmul.f32 %v5723_v31, %v5723_v31 }
 0x93a   : > { %v2554_v60 = vmul.f32 0.015625, %v2537_v45  ;;  %v2567_v40 = vmul.f32 %v5725_v21, %v5725_v21 }
 0x93b   : > { %v2578_v24 = vsel %vm2517_vm10, %v2568_v26, 0.0 }
 0x93c   : > { %v5732_v15 = vsub.f32 %v2512_v18, %v2554_v60  ;;  %v2543_v25 = vpop.xlane.xlu1 %2542  ;;  %2579 = vadd.xlane.f32.xlu1 %v2578_v24  ;;  %v2575_v59 = vsel %vm2517_vm10, %v2567_v40, 0.0 }
 0x93d   : > { %v2556_v39 = vmul.f32 0.015625, %v2543_v25  ;;  %v2534_v11 = vpop.xlane.xlu0 %2533  ;;  %2576 = vadd.xlane.f32.xlu0 %v2575_v59 }
 0x93e   : > { %v2553_v28 = vmul.f32 0.015625, %v2534_v11  ;;  %v2570_v41 = vmul.f32 %v5732_v15, %v5732_v15 }
 0x93f   : > { %v5737_v50 = vsub.f32 %v2514_v37, %v2556_v39 }
 0x940   : > { %v5739_v63 = vsub.f32 %v2511_v17, %v2553_v28  ;;  %v2549_v30 = vpop.xlane.xlu1 %2548  ;;  %v2584_v51 = vsel %vm2517_vm10, %v2570_v41, 0.0 }
 0x941   : > { %v2558_v3 = vmul.f32 0.015625, %v2549_v30  ;;  %v2540_v38 = vpop.xlane.xlu0 %2539  ;;  %2585 = vadd.xlane.f32.xlu1 %v2584_v51  ;;  %v2572_v32 = vmul.f32 %v5737_v50, %v5737_v50 }
 0x942   : > { %v2555_v44 = vmul.f32 0.015625, %v2540_v38  ;;  %v2569_v5 = vmul.f32 %v5739_v63, %v5739_v63 }
 0x943   : > { %v5746_v23 = vsub.f32 %v2516_v35, %v2558_v3  ;;  %v2590_v0 = vsel %vm2517_vm10, %v2572_v32, 0.0 }
 0x944   : > { %v5749_v57 = vsub.f32 %v2513_v12, %v2555_v44  ;;  %v2581_v2 = vsel %vm2517_vm10, %v2569_v5, 0.0 }
 0x945   : > { %2591 = vadd.xlane.f32.xlu1 %v2590_v0  ;;  %2582 = vadd.xlane.f32.xlu0 %v2581_v2  ;;  %v2546_v43 = vpop.xlane.xlu0 %2545  ;;  %v2574_v1 = vmul.f32 %v5746_v23, %v5746_v23 }
 0x946   : > { %v2557_v52 = vmul.f32 0.015625, %v2546_v43  ;;  %v2571_v36 = vmul.f32 %v5749_v57, %v5749_v57 }
 0x947   : > { %v2596_v29 = vsel %vm2517_vm10, %v2574_v1, 0.0 }
 0x948   : > { %v5757_v61 = vsub.f32 %v2515_v7, %v2557_v52  ;;  %v2587_v54 = vsel %vm2517_vm10, %v2571_v36, 0.0  ;;  %v2930_v7 = vld [vmem:[%s5803_s4] ss:$0 sm:$0xff] }
 0x949   : > { %2597 = vadd.xlane.f32.xlu1 %v2596_v29  ;;  %2588 = vadd.xlane.f32.xlu0 %v2587_v54 }
 0x94a   : > { %v2573_v27 = vmul.f32 %v5757_v61, %v5757_v61 }
 0x94c   : > { %v2593_v33 = vsel %vm2517_vm10, %v2573_v27, 0.0 }
 0x94d   : > { %2594 = vadd.xlane.f32.xlu0 %v2593_v33 }
 0x9c9   : > { %v2580_v34 = vpop.xlane.xlu1 %2579 }
 0x9ca   : > { %v2600_v56 = vmul.f32 0.015625, %v2580_v34  ;;  %v2577_v13 = vpop.xlane.xlu0 %2576 }
 0x9cb   : > { %v2599_v18 = vmul.f32 0.015625, %v2577_v13 }
 0x9cc   : > { %v2608_v22 = vadd.f32 1e-05, %v2600_v56 }
 0x9cd   : > { %v2607_v17 = vadd.f32 1e-05, %v2599_v18 }
 0x9ce   : > { %4457 = vrsqrt.f32 %v2608_v22  ;;  %v2586_v6 = vpop.xlane.xlu1 %2585 }
 0x9cf   : > { %4459 = vrsqrt.f32 %v2607_v17  ;;  %v2602_v9 = vmul.f32 0.015625, %v2586_v6 }
 0x9d1   : > { %v2610_v53 = vadd.f32 1e-05, %v2602_v9 }
 0x9d2   : > { %v2592_v8 = vpop.xlane.xlu1 %2591  ;;  %v2583_v37 = vpop.xlane.xlu0 %2582 }
 0x9d3   : > { %4461 = vrsqrt.f32 %v2610_v53  ;;  %v2604_v14 = vmul.f32 0.015625, %v2592_v8  ;;  %v2601_v12 = vmul.f32 0.015625, %v2583_v37 }
 0x9d5   : > { %v2612_v58 = vadd.f32 1e-05, %v2604_v14  ;;  %v2609_v46 = vadd.f32 1e-05, %v2601_v12 }
 0x9d6   : > { %v2598_v49 = vpop.xlane.xlu1 %2597  ;;  %v2589_v47 = vpop.xlane.xlu0 %2588 }
 0x9d7   : > { %4463 = vrsqrt.f32 %v2612_v58  ;;  %v2606_v62 = vmul.f32 0.015625, %v2598_v49  ;;  %v2603_v35 = vmul.f32 0.015625, %v2589_v47 }
 0x9d8   : > { %v4458_v19 = vpop.eup %4457  ;;  %4465 = vrsqrt.f32 %v2609_v46 }
 0x9d9   : > { %v4460_v10 = vpop.eup %4459  ;;  %v2624_v4 = vmul.f32 %v4458_v19, %v5723_v31  ;;  %v2614_v20 = vadd.f32 1e-05, %v2606_v62  ;;  %v2611_v16 = vadd.f32 1e-05, %v2603_v35 }
 0x9da   : > { %v2623_v55 = vmul.f32 %v4460_v10, %v5725_v21  ;;  %v2595_v48 = vpop.xlane.xlu0 %2594 }
 0x9db   : > { %v2639_v42 = vmul.f32 %v2930_v7, %v2624_v4  ;;  %4467 = vrsqrt.f32 %v2614_v20  ;;  %v2605_v45 = vmul.f32 0.015625, %v2595_v48 }
 0x9dc   : > { %v2638_v26 = vmul.f32 %v2930_v7, %v2623_v55  ;;  %4469 = vrsqrt.f32 %v2611_v16 }
 0x9dd   : > { %v4462_v60 = vpop.eup %4461  ;;  %2647 = vst.msk [vmem:[%s5771_s16 + $0x8] sm:$0xff] %vm2517_vm10, %v2639_v42  ;;  %v2613_v31 = vadd.f32 1e-05, %v2605_v45 }
 0x9de   : > { %2646 = vst.msk [vmem:[%s5771_s16] sm:$0xff] %vm2517_vm10, %v2638_v26  ;;  %v2626_v40 = vmul.f32 %v4462_v60, %v5732_v15 }
 0x9df   : > { %4471 = vrsqrt.f32 %v2613_v31 }
 0x9e0   : > { %v2641_v24 = vmul.f32 %v2930_v7, %v2626_v40 }
 0x9e1   : > { %v4464_v21 = vpop.eup %4463 }
 0x9e2   : > { %v4466_v25 = vpop.eup %4465  ;;  %2649 = vst.msk [vmem:[%s5771_s16 + $0x18] sm:$0xff] %vm2517_vm10, %v2641_v24  ;;  %v2628_v59 = vmul.f32 %v4464_v21, %v5737_v50 }
 0x9e3   : > { %v2625_v39 = vmul.f32 %v4466_v25, %v5739_v63 }
 0x9e4   : > { %v2643_v11 = vmul.f32 %v2930_v7, %v2628_v59 }
 0x9e5   : > { %v4468_v28 = vpop.eup %4467  ;;  %v2640_v41 = vmul.f32 %v2930_v7, %v2625_v39 }
 0x9e6   : > { %v4470_v30 = vpop.eup %4469  ;;  %2651 = vst.msk [vmem:[%s5771_s16 + $0x28] sm:$0xff] %vm2517_vm10, %v2643_v11  ;;  %v2630_v15 = vmul.f32 %v4468_v28, %v5746_v23 }
 0x9e7   : > { %2648 = vst.msk [vmem:[%s5771_s16 + $0x10] sm:$0xff] %vm2517_vm10, %v2640_v41  ;;  %v2627_v51 = vmul.f32 %v4470_v30, %v5749_v57 }
 0x9e8   : > { %v2645_v3 = vmul.f32 %v2930_v7, %v2630_v15 }
 0x9e9   : > { %v4472_v38 = vpop.eup %4471  ;;  %v2642_v32 = vmul.f32 %v2930_v7, %v2627_v51 }
 0x9ea   : > { %2653 = vst.msk [vmem:[%s5771_s16 + $0x38] sm:$0xff] %vm2517_vm10, %v2645_v3  ;;  %v2629_v50 = vmul.f32 %v4472_v38, %v5757_v61 }
 0x9eb   : > { %2650 = vst.msk [vmem:[%s5771_s16 + $0x20] sm:$0xff] %vm2517_vm10, %v2642_v32 }
 0x9ec   : > { %v2644_v63 = vmul.f32 %v2930_v7, %v2629_v50 }
 0x9ee   : > { %2652 = vst.msk [vmem:[%s5771_s16 + $0x30] sm:$0xff] %vm2517_vm10, %v2644_v63 }
 0x9ef PF: > { %s17_s21 = sadd.s32 1, %s4495_s21  }
 0x9f0   : > { %p14_p4 = scmp.ge.s32.totalorder %s17_s21, 4  }
 0x9f2   :  { %16 = sbr.rel (!%p14_p4) target bundleno = 1 (0x1), region = 85 }

</bundles_post_ra>
